<compile_context>
chip_gen: v5e
topology: v5e:2x2
jax: 0.10.0
libtpu: 0.0.40
codegen_flags: <defaults>
</compile_context>

<pallas_src>
import jax
import jax.numpy as jnp
from jax.experimental import pallas as pl
from jax.experimental.pallas import tpu as pltpu


# bf16 operands for the MXU (keep accumulation + epilogue in f32).
MATMUL_DTYPE = jnp.bfloat16


# ---------------------------------------------------------------------------
# Pallas kernels
# ---------------------------------------------------------------------------

def _conv_bn_relu6_kernel(w_ref, pT_ref, shift_ref, o_ref):
    # w_ref:     (Cout, K)   folded conv weight (BN scale absorbed), bf16
    # pT_ref:    (K, TM)     transposed im2col patches (lane-dense), bf16
    # shift_ref: (Cout, 1)   folded conv-bias + BN shift, f32
    # o_ref:     (Cout, TM)  lane-dense output
    acc = jnp.dot(w_ref[...], pT_ref[...], preferred_element_type=jnp.float32)
    o_ref[...] = jnp.clip(acc + shift_ref[...], 0.0, 6.0)


def _conv_bn_relu6_fc_sigmoid_kernel(w_ref, pT_ref, shift_ref,
                                     fcw_ref, sel_ref, fcb_ref, o_ref):
    # Last conv layer fused with flatten(1) + Linear(fc_size -> 1) + Sigmoid.
    # z:        (Cout, B*OH*OW)  == z[b, c, h, w] at column b*OH*OW + h*OW + w
    # fcw_ref:  (Cout, B*OH*OW)  FC weight in (c, h*w) order, tiled per batch
    # sel_ref:  (B*OH*OW, B)     one-hot batch selector
    # fcb_ref:  (1, 1)           FC bias
    # o_ref:    (1, B)           gate probabilities
    z = jnp.dot(w_ref[...], pT_ref[...], preferred_element_type=jnp.float32)
    z = jnp.clip(z + shift_ref[...], 0.0, 6.0)
    prod = z * fcw_ref[...]
    colsum = jnp.sum(prod, axis=0, keepdims=True)          # sublane reduce
    logits = jnp.dot(colsum, sel_ref[...],
                     preferred_element_type=jnp.float32) + fcb_ref[...]
    o_ref[...] = jax.nn.sigmoid(logits)


# ---------------------------------------------------------------------------
# Pallas call wrappers
# ---------------------------------------------------------------------------

def _conv_pallas(w_folded, shift_col, pT):
    Cout, K = w_folded.shape
    M = pT.shape[1]
    # Two "parallel" M-blocks when they stay 128-lane aligned (only the cam1
    # layer, which holds nearly all of the FLOPs, qualifies) so both v7x
    # TensorCores get work; otherwise a single full-array block per layer.
    nblk = 2 if (M % 256 == 0) else 1
    tm = M // nblk
    return pl.pallas_call(
        _conv_bn_relu6_kernel,
        out_shape=jax.ShapeDtypeStruct((Cout, M), jnp.float32),
        grid=(nblk,),
        in_specs=[
            pl.BlockSpec((Cout, K), lambda i: (0, 0)),
            pl.BlockSpec((K, tm), lambda i: (0, i)),
            pl.BlockSpec((Cout, 1), lambda i: (0, 0)),
        ],
        out_specs=pl.BlockSpec((Cout, tm), lambda i: (0, i)),
        compiler_params=pltpu.CompilerParams(
            dimension_semantics=("parallel",)),
    )(w_folded, pT, shift_col)


def _im2col_T(x_cf, k, stride, pad):
    """x_cf: (Cin, B, H, W) -> (Cin*k*k, B*oh*ow) transposed patch matrix.

    Feature (row) order is (ci, kh, kw), matching w.reshape(Cout, Cin*k*k).
    """
    xp = jnp.pad(x_cf, ((0, 0), (0, 0), (pad, pad), (pad, pad)))
    Cin, B, Hp, Wp = xp.shape
    oh = (Hp - k) // stride + 1
    ow = (Wp - k) // stride + 1
    taps = [xp[:, :, i:i + stride * oh:stride, j:j + stride * ow:stride]
            for i in range(k) for j in range(k)]
    pT = jnp.stack(taps, axis=1).reshape(Cin * k * k, B * oh * ow)
    return pT, oh, ow


def _fold_conv_bn(p, eps=1e-5):
    """Fold BN (inference) + conv bias into (weight, shift)."""
    cout = p["w"].shape[0]
    scale = p["gamma"] / jnp.sqrt(p["var"] + eps)
    w2d = p["w"].reshape(cout, -1) * scale[:, None]           # (Cout, Cin*k*k)
    shift = (p["b"] - p["mean"]) * scale + p["beta"]          # (Cout,)
    return w2d.astype(MATMUL_DTYPE), shift.reshape(cout, 1).astype(jnp.float32)


def conv_bn_relu6(x_cf, p, k, stride, pad):
    """Fused Conv2d -> BatchNorm2d(eval) -> ReLU6 on channels-first input."""
    B = x_cf.shape[1]
    w2d, shift = _fold_conv_bn(p)
    pT, oh, ow = _im2col_T(x_cf, k, stride, pad)
    out = _conv_pallas(w2d, shift, pT.astype(MATMUL_DTYPE))
    return out.reshape(w2d.shape[0], B, oh, ow)


def conv_bn_relu6_fc_sigmoid(x_cf, p, fc_w, fc_b, k, stride, pad):
    """Last conv+BN+ReLU6 fused with flatten + Linear + Sigmoid."""
    B = x_cf.shape[1]
    w2d, shift = _fold_conv_bn(p)
    cout = w2d.shape[0]
    pT, oh, ow = _im2col_T(x_cf, k, stride, pad)
    # FC weight in (c, h*w) order, tiled per batch so it lines up with the
    # (Cout, B*oh*ow) conv output -> matches torch z.flatten(1) on NCHW.
    fcw_cf = fc_w.reshape(cout, oh * ow).astype(jnp.float32)
    fcw_big = jnp.tile(fcw_cf, (1, B))
    sel = jnp.repeat(jnp.eye(B, dtype=jnp.float32), oh * ow, axis=0)
    out = pl.pallas_call(
        _conv_bn_relu6_fc_sigmoid_kernel,
        out_shape=jax.ShapeDtypeStruct((1, B), jnp.float32),
    )(w2d, pT.astype(MATMUL_DTYPE), shift, fcw_big, sel,
      fc_b.reshape(1, 1).astype(jnp.float32))
    return out.T                                             # (B, 1)


def maxpool2x2_cf(x_cf):
    """2x2/2 max pool on (C, B, H, W). Assumes even H, W (true here).

    Plain XLA elementwise max of the 4 window phases (fuses with the
    neighbouring pad/slice glue; no extra kernel launch)."""
    a = x_cf[:, :, 0::2, 0::2]
    b = x_cf[:, :, 0::2, 1::2]
    c = x_cf[:, :, 1::2, 0::2]
    d = x_cf[:, :, 1::2, 1::2]
    return jnp.maximum(jnp.maximum(a, b), jnp.maximum(c, d))


# ---------------------------------------------------------------------------
# Parameter initialization (deterministic, synthetic)
# ---------------------------------------------------------------------------

def _make_conv_bn_params(key, cin, cout, k):
    kw_, kb, kg, kbe, km, kv = jax.random.split(key, 6)
    return dict(
        w=0.1 * jax.random.normal(kw_, (cout, cin, k, k), jnp.float32),
        b=0.1 * jax.random.normal(kb, (cout,), jnp.float32),
        gamma=1.0 + 0.1 * jax.random.normal(kg, (cout,), jnp.float32),
        beta=0.1 * jax.random.normal(kbe, (cout,), jnp.float32),
        mean=0.1 * jax.random.normal(km, (cout,), jnp.float32),
        var=1.0 + 0.1 * jax.random.uniform(kv, (cout,), jnp.float32),
    )


def init_params(key, num_channels_start=4):
    c = num_channels_start
    keys = jax.random.split(key, 10)
    fc_size = 8 * c * 6 * 6
    return dict(
        cam1=_make_conv_bn_params(keys[0], 1, c, 5),
        camblk_c1=_make_conv_bn_params(keys[1], c, c, 3),
        camblk_c2=_make_conv_bn_params(keys[2], c, c, 3),
        tof1=_make_conv_bn_params(keys[3], 1, c, 3),
        comb1_c1=_make_conv_bn_params(keys[4], 2 * c, 4 * c, 3),
        comb1_c2=_make_conv_bn_params(keys[5], 4 * c, 4 * c, 3),
        comb2_c1=_make_conv_bn_params(keys[6], 4 * c, 8 * c, 3),
        comb2_c2=_make_conv_bn_params(keys[7], 8 * c, 8 * c, 3),
        fc_w=0.05 * jax.random.normal(keys[8], (1, fc_size), jnp.float32),
        fc_b=0.05 * jax.random.normal(keys[9], (1,), jnp.float32),
    )


# ---------------------------------------------------------------------------
# Forward pass
# ---------------------------------------------------------------------------

def gate_classifier_forward(params, image_nchw, tof_nchw):
    # Channels-first working layout (C, B, H, W): channels on sublanes, the
    # large flattened (B,H,W) extent on lanes -> lane-dense GEMM I/O.
    img = jnp.transpose(image_nchw, (1, 0, 2, 3))
    tof = jnp.transpose(tof_nchw, (1, 0, 2, 3))

    # Camera branch
    x = conv_bn_relu6(img, params["cam1"], k=5, stride=2, pad=2)
    x = maxpool2x2_cf(x)
    x = conv_bn_relu6(x, params["camblk_c1"], k=3, stride=2, pad=1)
    x = conv_bn_relu6(x, params["camblk_c2"], k=3, stride=1, pad=1)

    # ToF branch
    y = conv_bn_relu6(tof, params["tof1"], k=3, stride=1, pad=1)

    # torch.cat((x, y), dim=1) == channel concat, camera first (axis 0 here).
    z = jnp.concatenate([x, y], axis=0)

    z = conv_bn_relu6(z, params["comb1_c1"], k=3, stride=2, pad=1)
    z = conv_bn_relu6(z, params["comb1_c2"], k=3, stride=1, pad=1)
    z = conv_bn_relu6(z, params["comb2_c1"], k=3, stride=2, pad=1)

    # Last conv + BN + ReLU6 + flatten(1) + Linear(1152->1) + Sigmoid fused.
    gate_probability = conv_bn_relu6_fc_sigmoid(
        z, params["comb2_c2"], params["fc_w"], params["fc_b"],
        k=3, stride=1, pad=1)
    return gate_probability


if __name__ == "__main__":
    key = jax.random.PRNGKey(0)
    kp, kimg, ktof = jax.random.split(key, 3)

    num_channels_start = 4
    params = init_params(kp, num_channels_start)

    # Shapes implied by the module: final feature map must be 6x6 so that
    # fc_size = 8*C*6*6 matches -> image 192x192, tof 24x24.
    B = 2
    image = jax.random.normal(kimg, (B, 1, 192, 192), jnp.float32)
    tof = jax.random.normal(ktof, (B, 1, 24, 24), jnp.float32)

    fwd = jax.jit(gate_classifier_forward)
    out = fwd(params, image, tof)
    out = jax.block_until_ready(out)

    assert out.shape == (B, 1), out.shape
    assert bool(jnp.all((out >= 0.0) & (out <= 1.0)))
    print("KERNEL_OK")
</pallas_src>

<mosaic_0001>
module attributes {stable_mosaic.version = 11 : i64} {
  func.func @_conv_bn_relu6_kernel(%arg0: i32, %arg1: memref<4x25xbf16, #tpu.memory_space<vmem>>, %arg2: memref<25x9216xbf16, #tpu.memory_space<vmem>>, %arg3: memref<4x1xf32, #tpu.memory_space<vmem>>, %arg4: memref<4x9216xf32, #tpu.memory_space<vmem>>) attributes {dimension_semantics = [#tpu.dimension_semantics<parallel>], iteration_bounds = array<i64: 2>, scalar_prefetch = 0 : i64, scratch_operands = 0 : i64, tpu.core_type = #tpu.core_type<tc>, window_params = [{pipeline_mode = #tpu.pipeline_mode<synchronous>, transform_indices = @transform_0, window_bounds = array<i64: 4, 25>}, {transform_indices = @transform_1, window_bounds = array<i64: 25, 9216>}, {pipeline_mode = #tpu.pipeline_mode<synchronous>, transform_indices = @transform_2, window_bounds = array<i64: 4, 1>}, {transform_indices = @transform_3, window_bounds = array<i64: 4, 9216>}]} {
    %c0 = arith.constant 0 : index
    %c0_0 = arith.constant 0 : index
    %0 = vector.load %arg1[%c0, %c0_0] : memref<4x25xbf16, #tpu.memory_space<vmem>>, vector<4x25xbf16>
    %c0_1 = arith.constant 0 : index
    %c0_2 = arith.constant 0 : index
    %1 = vector.load %arg2[%c0_1, %c0_2] : memref<25x9216xbf16, #tpu.memory_space<vmem>>, vector<25x9216xbf16>
    %cst = arith.constant dense<0.000000e+00> : vector<4x9216xf32>
    %2 = tpu.matmul %0, %1, %cst {dimension_numbers = #tpu.dot_dimension_numbers<[1], [0], [0], [1], [0, 0, 1, 1], [], []>} : vector<4x25xbf16>, vector<25x9216xbf16>, vector<4x9216xf32> -> vector<4x9216xf32>
    %c0_3 = arith.constant 0 : index
    %c0_4 = arith.constant 0 : index
    %3 = vector.load %arg3[%c0_3, %c0_4] : memref<4x1xf32, #tpu.memory_space<vmem>>, vector<4x1xf32>
    %4 = vector.broadcast %3 : vector<4x1xf32> to vector<4x9216xf32>
    %5 = arith.addf %2, %4 : vector<4x9216xf32>
    %cst_5 = arith.constant 0.000000e+00 : f32
    %cst_6 = arith.constant 6.000000e+00 : f32
    %6 = vector.broadcast %cst_5 : f32 to vector<4x9216xf32>
    %7 = arith.maximumf %6, %5 : vector<4x9216xf32>
    %8 = vector.broadcast %cst_6 : f32 to vector<4x9216xf32>
    %9 = arith.minimumf %8, %7 : vector<4x9216xf32>
    %c0_7 = arith.constant 0 : index
    %c0_8 = arith.constant 0 : index
    %10 = vector.load %arg4[%c0_7, %c0_8] : memref<4x9216xf32, #tpu.memory_space<vmem>>, vector<4x9216xf32>
    tpu.vector_store %arg4[%c0_7, %c0_8], %9 {strides = array<i32>} : memref<4x9216xf32, #tpu.memory_space<vmem>>, vector<4x9216xf32>,
    return
  }
  func.func @transform_0(%arg0: i32) -> (i32, i32) {
    %c0_i32 = arith.constant 0 : i32
    %c0_i32_0 = arith.constant 0 : i32
    %c0_i32_1 = arith.constant 0 : i32
    return %c0_i32, %c0_i32_0 : i32, i32
  }
  func.func @transform_1(%arg0: i32) -> (i32, i32) {
    %c0_i32 = arith.constant 0 : i32
    %c0_i32_0 = arith.constant 0 : i32
    return %c0_i32, %arg0 : i32, i32
  }
  func.func @transform_2(%arg0: i32) -> (i32, i32) {
    %c0_i32 = arith.constant 0 : i32
    %c0_i32_0 = arith.constant 0 : i32
    %c0_i32_1 = arith.constant 0 : i32
    return %c0_i32, %c0_i32_0 : i32, i32
  }
  func.func @transform_3(%arg0: i32) -> (i32, i32) {
    %c0_i32 = arith.constant 0 : i32
    %c0_i32_0 = arith.constant 0 : i32
    return %c0_i32, %arg0 : i32, i32
  }
}

module attributes {stable_mosaic.version = 11 : i64} {
  func.func @_conv_bn_relu6_kernel(%arg0: i32, %arg1: memref<4x36xbf16, #tpu.memory_space<vmem>>, %arg2: memref<36x1152xbf16, #tpu.memory_space<vmem>>, %arg3: memref<4x1xf32, #tpu.memory_space<vmem>>, %arg4: memref<4x1152xf32, #tpu.memory_space<vmem>>) attributes {dimension_semantics = [#tpu.dimension_semantics<parallel>], iteration_bounds = array<i64: 1>, scalar_prefetch = 0 : i64, scratch_operands = 0 : i64, tpu.core_type = #tpu.core_type<tc>, window_params = [{pipeline_mode = #tpu.pipeline_mode<synchronous>, transform_indices = @transform_0, window_bounds = array<i64: 4, 36>}, {transform_indices = @transform_1, window_bounds = array<i64: 36, 1152>}, {pipeline_mode = #tpu.pipeline_mode<synchronous>, transform_indices = @transform_2, window_bounds = array<i64: 4, 1>}, {transform_indices = @transform_3, window_bounds = array<i64: 4, 1152>}]} {
    %c0 = arith.constant 0 : index
    %c0_0 = arith.constant 0 : index
    %0 = vector.load %arg1[%c0, %c0_0] : memref<4x36xbf16, #tpu.memory_space<vmem>>, vector<4x36xbf16>
    %c0_1 = arith.constant 0 : index
    %c0_2 = arith.constant 0 : index
    %1 = vector.load %arg2[%c0_1, %c0_2] : memref<36x1152xbf16, #tpu.memory_space<vmem>>, vector<36x1152xbf16>
    %cst = arith.constant dense<0.000000e+00> : vector<4x1152xf32>
    %2 = tpu.matmul %0, %1, %cst {dimension_numbers = #tpu.dot_dimension_numbers<[1], [0], [0], [1], [0, 0, 1, 1], [], []>} : vector<4x36xbf16>, vector<36x1152xbf16>, vector<4x1152xf32> -> vector<4x1152xf32>
    %c0_3 = arith.constant 0 : index
    %c0_4 = arith.constant 0 : index
    %3 = vector.load %arg3[%c0_3, %c0_4] : memref<4x1xf32, #tpu.memory_space<vmem>>, vector<4x1xf32>
    %4 = vector.broadcast %3 : vector<4x1xf32> to vector<4x1152xf32>
    %5 = arith.addf %2, %4 : vector<4x1152xf32>
    %cst_5 = arith.constant 0.000000e+00 : f32
    %cst_6 = arith.constant 6.000000e+00 : f32
    %6 = vector.broadcast %cst_5 : f32 to vector<4x1152xf32>
    %7 = arith.maximumf %6, %5 : vector<4x1152xf32>
    %8 = vector.broadcast %cst_6 : f32 to vector<4x1152xf32>
    %9 = arith.minimumf %8, %7 : vector<4x1152xf32>
    %c0_7 = arith.constant 0 : index
    %c0_8 = arith.constant 0 : index
    %10 = vector.load %arg4[%c0_7, %c0_8] : memref<4x1152xf32, #tpu.memory_space<vmem>>, vector<4x1152xf32>
    tpu.vector_store %arg4[%c0_7, %c0_8], %9 {strides = array<i32>} : memref<4x1152xf32, #tpu.memory_space<vmem>>, vector<4x1152xf32>,
    return
  }
  func.func @transform_0(%arg0: i32) -> (i32, i32) {
    %c0_i32 = arith.constant 0 : i32
    %c0_i32_0 = arith.constant 0 : i32
    %c0_i32_1 = arith.constant 0 : i32
    return %c0_i32, %c0_i32_0 : i32, i32
  }
  func.func @transform_1(%arg0: i32) -> (i32, i32) {
    %c0_i32 = arith.constant 0 : i32
    %c0_i32_0 = arith.constant 0 : i32
    return %c0_i32, %arg0 : i32, i32
  }
  func.func @transform_2(%arg0: i32) -> (i32, i32) {
    %c0_i32 = arith.constant 0 : i32
    %c0_i32_0 = arith.constant 0 : i32
    %c0_i32_1 = arith.constant 0 : i32
    return %c0_i32, %c0_i32_0 : i32, i32
  }
  func.func @transform_3(%arg0: i32) -> (i32, i32) {
    %c0_i32 = arith.constant 0 : i32
    %c0_i32_0 = arith.constant 0 : i32
    return %c0_i32, %arg0 : i32, i32
  }
}

module attributes {stable_mosaic.version = 11 : i64} {
  func.func @_conv_bn_relu6_kernel(%arg0: i32, %arg1: memref<4x9xbf16, #tpu.memory_space<vmem>>, %arg2: memref<9x1152xbf16, #tpu.memory_space<vmem>>, %arg3: memref<4x1xf32, #tpu.memory_space<vmem>>, %arg4: memref<4x1152xf32, #tpu.memory_space<vmem>>) attributes {dimension_semantics = [#tpu.dimension_semantics<parallel>], iteration_bounds = array<i64: 1>, scalar_prefetch = 0 : i64, scratch_operands = 0 : i64, tpu.core_type = #tpu.core_type<tc>, window_params = [{pipeline_mode = #tpu.pipeline_mode<synchronous>, transform_indices = @transform_0, window_bounds = array<i64: 4, 9>}, {transform_indices = @transform_1, window_bounds = array<i64: 9, 1152>}, {pipeline_mode = #tpu.pipeline_mode<synchronous>, transform_indices = @transform_2, window_bounds = array<i64: 4, 1>}, {transform_indices = @transform_3, window_bounds = array<i64: 4, 1152>}]} {
    %c0 = arith.constant 0 : index
    %c0_0 = arith.constant 0 : index
    %0 = vector.load %arg1[%c0, %c0_0] : memref<4x9xbf16, #tpu.memory_space<vmem>>, vector<4x9xbf16>
    %c0_1 = arith.constant 0 : index
    %c0_2 = arith.constant 0 : index
    %1 = vector.load %arg2[%c0_1, %c0_2] : memref<9x1152xbf16, #tpu.memory_space<vmem>>, vector<9x1152xbf16>
    %cst = arith.constant dense<0.000000e+00> : vector<4x1152xf32>
    %2 = tpu.matmul %0, %1, %cst {dimension_numbers = #tpu.dot_dimension_numbers<[1], [0], [0], [1], [0, 0, 1, 1], [], []>} : vector<4x9xbf16>, vector<9x1152xbf16>, vector<4x1152xf32> -> vector<4x1152xf32>
    %c0_3 = arith.constant 0 : index
    %c0_4 = arith.constant 0 : index
    %3 = vector.load %arg3[%c0_3, %c0_4] : memref<4x1xf32, #tpu.memory_space<vmem>>, vector<4x1xf32>
    %4 = vector.broadcast %3 : vector<4x1xf32> to vector<4x1152xf32>
    %5 = arith.addf %2, %4 : vector<4x1152xf32>
    %cst_5 = arith.constant 0.000000e+00 : f32
    %cst_6 = arith.constant 6.000000e+00 : f32
    %6 = vector.broadcast %cst_5 : f32 to vector<4x1152xf32>
    %7 = arith.maximumf %6, %5 : vector<4x1152xf32>
    %8 = vector.broadcast %cst_6 : f32 to vector<4x1152xf32>
    %9 = arith.minimumf %8, %7 : vector<4x1152xf32>
    %c0_7 = arith.constant 0 : index
    %c0_8 = arith.constant 0 : index
    %10 = vector.load %arg4[%c0_7, %c0_8] : memref<4x1152xf32, #tpu.memory_space<vmem>>, vector<4x1152xf32>
    tpu.vector_store %arg4[%c0_7, %c0_8], %9 {strides = array<i32>} : memref<4x1152xf32, #tpu.memory_space<vmem>>, vector<4x1152xf32>,
    return
  }
  func.func @transform_0(%arg0: i32) -> (i32, i32) {
    %c0_i32 = arith.constant 0 : i32
    %c0_i32_0 = arith.constant 0 : i32
    %c0_i32_1 = arith.constant 0 : i32
    return %c0_i32, %c0_i32_0 : i32, i32
  }
  func.func @transform_1(%arg0: i32) -> (i32, i32) {
    %c0_i32 = arith.constant 0 : i32
    %c0_i32_0 = arith.constant 0 : i32
    return %c0_i32, %arg0 : i32, i32
  }
  func.func @transform_2(%arg0: i32) -> (i32, i32) {
    %c0_i32 = arith.constant 0 : i32
    %c0_i32_0 = arith.constant 0 : i32
    %c0_i32_1 = arith.constant 0 : i32
    return %c0_i32, %c0_i32_0 : i32, i32
  }
  func.func @transform_3(%arg0: i32) -> (i32, i32) {
    %c0_i32 = arith.constant 0 : i32
    %c0_i32_0 = arith.constant 0 : i32
    return %c0_i32, %arg0 : i32, i32
  }
}

module attributes {stable_mosaic.version = 11 : i64} {
  func.func @_conv_bn_relu6_kernel(%arg0: i32, %arg1: memref<16x72xbf16, #tpu.memory_space<vmem>>, %arg2: memref<72x288xbf16, #tpu.memory_space<vmem>>, %arg3: memref<16x1xf32, #tpu.memory_space<vmem>>, %arg4: memref<16x288xf32, #tpu.memory_space<vmem>>) attributes {dimension_semantics = [#tpu.dimension_semantics<parallel>], iteration_bounds = array<i64: 1>, scalar_prefetch = 0 : i64, scratch_operands = 0 : i64, tpu.core_type = #tpu.core_type<tc>, window_params = [{pipeline_mode = #tpu.pipeline_mode<synchronous>, transform_indices = @transform_0, window_bounds = array<i64: 16, 72>}, {transform_indices = @transform_1, window_bounds = array<i64: 72, 288>}, {pipeline_mode = #tpu.pipeline_mode<synchronous>, transform_indices = @transform_2, window_bounds = array<i64: 16, 1>}, {transform_indices = @transform_3, window_bounds = array<i64: 16, 288>}]} {
    %c0 = arith.constant 0 : index
    %c0_0 = arith.constant 0 : index
    %0 = vector.load %arg1[%c0, %c0_0] : memref<16x72xbf16, #tpu.memory_space<vmem>>, vector<16x72xbf16>
    %c0_1 = arith.constant 0 : index
    %c0_2 = arith.constant 0 : index
    %1 = vector.load %arg2[%c0_1, %c0_2] : memref<72x288xbf16, #tpu.memory_space<vmem>>, vector<72x288xbf16>
    %cst = arith.constant dense<0.000000e+00> : vector<16x288xf32>
    %2 = tpu.matmul %0, %1, %cst {dimension_numbers = #tpu.dot_dimension_numbers<[1], [0], [0], [1], [0, 0, 1, 1], [], []>} : vector<16x72xbf16>, vector<72x288xbf16>, vector<16x288xf32> -> vector<16x288xf32>
    %c0_3 = arith.constant 0 : index
    %c0_4 = arith.constant 0 : index
    %3 = vector.load %arg3[%c0_3, %c0_4] : memref<16x1xf32, #tpu.memory_space<vmem>>, vector<16x1xf32>
    %4 = vector.broadcast %3 : vector<16x1xf32> to vector<16x288xf32>
    %5 = arith.addf %2, %4 : vector<16x288xf32>
    %cst_5 = arith.constant 0.000000e+00 : f32
    %cst_6 = arith.constant 6.000000e+00 : f32
    %6 = vector.broadcast %cst_5 : f32 to vector<16x288xf32>
    %7 = arith.maximumf %6, %5 : vector<16x288xf32>
    %8 = vector.broadcast %cst_6 : f32 to vector<16x288xf32>
    %9 = arith.minimumf %8, %7 : vector<16x288xf32>
    %c0_7 = arith.constant 0 : index
    %c0_8 = arith.constant 0 : index
    %10 = vector.load %arg4[%c0_7, %c0_8] : memref<16x288xf32, #tpu.memory_space<vmem>>, vector<16x288xf32>
    tpu.vector_store %arg4[%c0_7, %c0_8], %9 {strides = array<i32>} : memref<16x288xf32, #tpu.memory_space<vmem>>, vector<16x288xf32>,
    return
  }
  func.func @transform_0(%arg0: i32) -> (i32, i32) {
    %c0_i32 = arith.constant 0 : i32
    %c0_i32_0 = arith.constant 0 : i32
    %c0_i32_1 = arith.constant 0 : i32
    return %c0_i32, %c0_i32_0 : i32, i32
  }
  func.func @transform_1(%arg0: i32) -> (i32, i32) {
    %c0_i32 = arith.constant 0 : i32
    %c0_i32_0 = arith.constant 0 : i32
    return %c0_i32, %arg0 : i32, i32
  }
  func.func @transform_2(%arg0: i32) -> (i32, i32) {
    %c0_i32 = arith.constant 0 : i32
    %c0_i32_0 = arith.constant 0 : i32
    %c0_i32_1 = arith.constant 0 : i32
    return %c0_i32, %c0_i32_0 : i32, i32
  }
  func.func @transform_3(%arg0: i32) -> (i32, i32) {
    %c0_i32 = arith.constant 0 : i32
    %c0_i32_0 = arith.constant 0 : i32
    return %c0_i32, %arg0 : i32, i32
  }
}

module attributes {stable_mosaic.version = 11 : i64} {
  func.func @_conv_bn_relu6_kernel(%arg0: i32, %arg1: memref<16x144xbf16, #tpu.memory_space<vmem>>, %arg2: memref<144x288xbf16, #tpu.memory_space<vmem>>, %arg3: memref<16x1xf32, #tpu.memory_space<vmem>>, %arg4: memref<16x288xf32, #tpu.memory_space<vmem>>) attributes {dimension_semantics = [#tpu.dimension_semantics<parallel>], iteration_bounds = array<i64: 1>, scalar_prefetch = 0 : i64, scratch_operands = 0 : i64, tpu.core_type = #tpu.core_type<tc>, window_params = [{pipeline_mode = #tpu.pipeline_mode<synchronous>, transform_indices = @transform_0, window_bounds = array<i64: 16, 144>}, {transform_indices = @transform_1, window_bounds = array<i64: 144, 288>}, {pipeline_mode = #tpu.pipeline_mode<synchronous>, transform_indices = @transform_2, window_bounds = array<i64: 16, 1>}, {transform_indices = @transform_3, window_bounds = array<i64: 16, 288>}]} {
    %c0 = arith.constant 0 : index
    %c0_0 = arith.constant 0 : index
    %0 = vector.load %arg1[%c0, %c0_0] : memref<16x144xbf16, #tpu.memory_space<vmem>>, vector<16x144xbf16>
    %c0_1 = arith.constant 0 : index
    %c0_2 = arith.constant 0 : index
    %1 = vector.load %arg2[%c0_1, %c0_2] : memref<144x288xbf16, #tpu.memory_space<vmem>>, vector<144x288xbf16>
    %cst = arith.constant dense<0.000000e+00> : vector<16x288xf32>
    %2 = tpu.matmul %0, %1, %cst {dimension_numbers = #tpu.dot_dimension_numbers<[1], [0], [0], [1], [0, 0, 1, 1], [], []>} : vector<16x144xbf16>, vector<144x288xbf16>, vector<16x288xf32> -> vector<16x288xf32>
    %c0_3 = arith.constant 0 : index
    %c0_4 = arith.constant 0 : index
    %3 = vector.load %arg3[%c0_3, %c0_4] : memref<16x1xf32, #tpu.memory_space<vmem>>, vector<16x1xf32>
    %4 = vector.broadcast %3 : vector<16x1xf32> to vector<16x288xf32>
    %5 = arith.addf %2, %4 : vector<16x288xf32>
    %cst_5 = arith.constant 0.000000e+00 : f32
    %cst_6 = arith.constant 6.000000e+00 : f32
    %6 = vector.broadcast %cst_5 : f32 to vector<16x288xf32>
    %7 = arith.maximumf %6, %5 : vector<16x288xf32>
    %8 = vector.broadcast %cst_6 : f32 to vector<16x288xf32>
    %9 = arith.minimumf %8, %7 : vector<16x288xf32>
    %c0_7 = arith.constant 0 : index
    %c0_8 = arith.constant 0 : index
    %10 = vector.load %arg4[%c0_7, %c0_8] : memref<16x288xf32, #tpu.memory_space<vmem>>, vector<16x288xf32>
    tpu.vector_store %arg4[%c0_7, %c0_8], %9 {strides = array<i32>} : memref<16x288xf32, #tpu.memory_space<vmem>>, vector<16x288xf32>,
    return
  }
  func.func @transform_0(%arg0: i32) -> (i32, i32) {
    %c0_i32 = arith.constant 0 : i32
    %c0_i32_0 = arith.constant 0 : i32
    %c0_i32_1 = arith.constant 0 : i32
    return %c0_i32, %c0_i32_0 : i32, i32
  }
  func.func @transform_1(%arg0: i32) -> (i32, i32) {
    %c0_i32 = arith.constant 0 : i32
    %c0_i32_0 = arith.constant 0 : i32
    return %c0_i32, %arg0 : i32, i32
  }
  func.func @transform_2(%arg0: i32) -> (i32, i32) {
    %c0_i32 = arith.constant 0 : i32
    %c0_i32_0 = arith.constant 0 : i32
    %c0_i32_1 = arith.constant 0 : i32
    return %c0_i32, %c0_i32_0 : i32, i32
  }
  func.func @transform_3(%arg0: i32) -> (i32, i32) {
    %c0_i32 = arith.constant 0 : i32
    %c0_i32_0 = arith.constant 0 : i32
    return %c0_i32, %arg0 : i32, i32
  }
}

module attributes {stable_mosaic.version = 11 : i64} {
  func.func @_conv_bn_relu6_kernel(%arg0: i32, %arg1: memref<32x144xbf16, #tpu.memory_space<vmem>>, %arg2: memref<144x72xbf16, #tpu.memory_space<vmem>>, %arg3: memref<32x1xf32, #tpu.memory_space<vmem>>, %arg4: memref<32x72xf32, #tpu.memory_space<vmem>>) attributes {dimension_semantics = [#tpu.dimension_semantics<parallel>], iteration_bounds = array<i64: 1>, scalar_prefetch = 0 : i64, scratch_operands = 0 : i64, tpu.core_type = #tpu.core_type<tc>, window_params = [{pipeline_mode = #tpu.pipeline_mode<synchronous>, transform_indices = @transform_0, window_bounds = array<i64: 32, 144>}, {transform_indices = @transform_1, window_bounds = array<i64: 144, 72>}, {pipeline_mode = #tpu.pipeline_mode<synchronous>, transform_indices = @transform_2, window_bounds = array<i64: 32, 1>}, {transform_indices = @transform_3, window_bounds = array<i64: 32, 72>}]} {
    %c0 = arith.constant 0 : index
    %c0_0 = arith.constant 0 : index
    %0 = vector.load %arg1[%c0, %c0_0] : memref<32x144xbf16, #tpu.memory_space<vmem>>, vector<32x144xbf16>
    %c0_1 = arith.constant 0 : index
    %c0_2 = arith.constant 0 : index
    %1 = vector.load %arg2[%c0_1, %c0_2] : memref<144x72xbf16, #tpu.memory_space<vmem>>, vector<144x72xbf16>
    %cst = arith.constant dense<0.000000e+00> : vector<32x72xf32>
    %2 = tpu.matmul %0, %1, %cst {dimension_numbers = #tpu.dot_dimension_numbers<[1], [0], [0], [1], [0, 0, 1, 1], [], []>} : vector<32x144xbf16>, vector<144x72xbf16>, vector<32x72xf32> -> vector<32x72xf32>
    %c0_3 = arith.constant 0 : index
    %c0_4 = arith.constant 0 : index
    %3 = vector.load %arg3[%c0_3, %c0_4] : memref<32x1xf32, #tpu.memory_space<vmem>>, vector<32x1xf32>
    %4 = vector.broadcast %3 : vector<32x1xf32> to vector<32x72xf32>
    %5 = arith.addf %2, %4 : vector<32x72xf32>
    %cst_5 = arith.constant 0.000000e+00 : f32
    %cst_6 = arith.constant 6.000000e+00 : f32
    %6 = vector.broadcast %cst_5 : f32 to vector<32x72xf32>
    %7 = arith.maximumf %6, %5 : vector<32x72xf32>
    %8 = vector.broadcast %cst_6 : f32 to vector<32x72xf32>
    %9 = arith.minimumf %8, %7 : vector<32x72xf32>
    %c0_7 = arith.constant 0 : index
    %c0_8 = arith.constant 0 : index
    %10 = vector.load %arg4[%c0_7, %c0_8] : memref<32x72xf32, #tpu.memory_space<vmem>>, vector<32x72xf32>
    tpu.vector_store %arg4[%c0_7, %c0_8], %9 {strides = array<i32>} : memref<32x72xf32, #tpu.memory_space<vmem>>, vector<32x72xf32>,
    return
  }
  func.func @transform_0(%arg0: i32) -> (i32, i32) {
    %c0_i32 = arith.constant 0 : i32
    %c0_i32_0 = arith.constant 0 : i32
    %c0_i32_1 = arith.constant 0 : i32
    return %c0_i32, %c0_i32_0 : i32, i32
  }
  func.func @transform_1(%arg0: i32) -> (i32, i32) {
    %c0_i32 = arith.constant 0 : i32
    %c0_i32_0 = arith.constant 0 : i32
    return %c0_i32, %arg0 : i32, i32
  }
  func.func @transform_2(%arg0: i32) -> (i32, i32) {
    %c0_i32 = arith.constant 0 : i32
    %c0_i32_0 = arith.constant 0 : i32
    %c0_i32_1 = arith.constant 0 : i32
    return %c0_i32, %c0_i32_0 : i32, i32
  }
  func.func @transform_3(%arg0: i32) -> (i32, i32) {
    %c0_i32 = arith.constant 0 : i32
    %c0_i32_0 = arith.constant 0 : i32
    return %c0_i32, %arg0 : i32, i32
  }
}

module attributes {stable_mosaic.version = 11 : i64} {
  func.func @_conv_bn_relu6_fc_sigmoid_kernel(%arg0: memref<32x288xbf16, #tpu.memory_space<vmem>>, %arg1: memref<288x72xbf16, #tpu.memory_space<vmem>>, %arg2: memref<32x1xf32, #tpu.memory_space<vmem>>, %arg3: memref<32x72xf32, #tpu.memory_space<vmem>>, %arg4: memref<72x2xf32, #tpu.memory_space<vmem>>, %arg5: memref<1x1xf32, #tpu.memory_space<vmem>>, %arg6: memref<1x2xf32, #tpu.memory_space<vmem>>) attributes {dimension_semantics = [], scalar_prefetch = 0 : i64, scratch_operands = 0 : i64, tpu.core_type = #tpu.core_type<tc>} {
    %c0 = arith.constant 0 : index
    %c0_0 = arith.constant 0 : index
    %0 = vector.load %arg0[%c0, %c0_0] : memref<32x288xbf16, #tpu.memory_space<vmem>>, vector<32x288xbf16>
    %c0_1 = arith.constant 0 : index
    %c0_2 = arith.constant 0 : index
    %1 = vector.load %arg1[%c0_1, %c0_2] : memref<288x72xbf16, #tpu.memory_space<vmem>>, vector<288x72xbf16>
    %cst = arith.constant dense<0.000000e+00> : vector<32x72xf32>
    %2 = tpu.matmul %0, %1, %cst {dimension_numbers = #tpu.dot_dimension_numbers<[1], [0], [0], [1], [0, 0, 1, 1], [], []>} : vector<32x288xbf16>, vector<288x72xbf16>, vector<32x72xf32> -> vector<32x72xf32>
    %c0_3 = arith.constant 0 : index
    %c0_4 = arith.constant 0 : index
    %3 = vector.load %arg2[%c0_3, %c0_4] : memref<32x1xf32, #tpu.memory_space<vmem>>, vector<32x1xf32>
    %4 = vector.broadcast %3 : vector<32x1xf32> to vector<32x72xf32>
    %5 = arith.addf %2, %4 : vector<32x72xf32>
    %cst_5 = arith.constant 0.000000e+00 : f32
    %cst_6 = arith.constant 6.000000e+00 : f32
    %6 = vector.broadcast %cst_5 : f32 to vector<32x72xf32>
    %7 = arith.maximumf %6, %5 : vector<32x72xf32>
    %8 = vector.broadcast %cst_6 : f32 to vector<32x72xf32>
    %9 = arith.minimumf %8, %7 : vector<32x72xf32>
    %c0_7 = arith.constant 0 : index
    %c0_8 = arith.constant 0 : index
    %10 = vector.load %arg3[%c0_7, %c0_8] : memref<32x72xf32, #tpu.memory_space<vmem>>, vector<32x72xf32>
    %11 = arith.mulf %9, %10 : vector<32x72xf32>
    %cst_9 = arith.constant dense<0.000000e+00> : vector<72xf32>
    %12 = vector.multi_reduction <add>, %11, %cst_9 [0] : vector<32x72xf32> to vector<72xf32>
    %13 = vector.shape_cast %12 : vector<72xf32> to vector<1x72xf32>
    %c0_10 = arith.constant 0 : index
    %c0_11 = arith.constant 0 : index
    %14 = vector.load %arg4[%c0_10, %c0_11] : memref<72x2xf32, #tpu.memory_space<vmem>>, vector<72x2xf32>
    %cst_12 = arith.constant dense<0.000000e+00> : vector<1x2xf32>
    %15 = tpu.matmul %13, %14, %cst_12 {dimension_numbers = #tpu.dot_dimension_numbers<[1], [0], [0], [1], [0, 0, 1, 1], [], []>} : vector<1x72xf32>, vector<72x2xf32>, vector<1x2xf32> -> vector<1x2xf32>
    %c0_13 = arith.constant 0 : index
    %c0_14 = arith.constant 0 : index
    %16 = vector.load %arg5[%c0_13, %c0_14] : memref<1x1xf32, #tpu.memory_space<vmem>>, vector<1x1xf32>
    %17 = vector.broadcast %16 : vector<1x1xf32> to vector<1x2xf32>
    %18 = arith.addf %15, %17 : vector<1x2xf32>
    %19 = arith.negf %18 : vector<1x2xf32>
    %20 = math.exp %19 : vector<1x2xf32>
    %cst_15 = arith.constant 1.000000e+00 : f32
    %21 = vector.broadcast %cst_15 : f32 to vector<1x2xf32>
    %22 = arith.addf %21, %20 : vector<1x2xf32>
    %23 = arith.divf %21, %22 : vector<1x2xf32>
    %c0_16 = arith.constant 0 : index
    %c0_17 = arith.constant 0 : index
    %24 = vector.load %arg6[%c0_16, %c0_17] : memref<1x2xf32, #tpu.memory_space<vmem>>, vector<1x2xf32>
    tpu.vector_store %arg6[%c0_16, %c0_17], %23 {strides = array<i32>} : memref<1x2xf32, #tpu.memory_space<vmem>>, vector<1x2xf32>,
    return
  }
}

</mosaic_0001>

<bundles_post_ra>
// kernel: gate_classifier_forward.8
= control target key start
LH: loop header
LB: loop body
LE: loop exit
PB: predicated region body
PF: predicated region fallthrough
CT: control target
= control target key end

     0   :  { %s3739_s12 = smov 0   ;;  %s3741_s13 = smov 0   ;;  %s4756_s0 = inlined_call_operand.vmem [shape: bf16[4,25], index: 0, kind: input, shape index: {}]   ;;  %s4757_s1 = inlined_call_operand.vmem [shape: bf16[25,18432], index: 1, kind: input, shape index: {}]   ;;  %s4758_s2 = inlined_call_operand.vmem [shape: f32[4,1], index: 2, kind: input, shape index: {}]   ;;  %s4759_s3 = inlined_call_operand.vmem [shape: f32[4,18432], index: 3, kind: output, shape index: {}]  }
   0x1   :  { %s3743_s14 = smov 0  }
   0x2 LB: > { %s2861_s15 = sadd.s32 4294967295, %s3715_s14   ;;  %s3756_s16 = sadd.s32 1, %s3715_s14   ;;  %s3715_s14 = sphi %s3743_s14, %s4762_s14   ;;  %s3711_s13 = sphi %s3741_s13, %s4761_s13   ;;  %s3707_s12 = sphi %s3739_s12, %s4760_s12  }
   0x3   : > { %s38_s17 = ssub.s32 %s3715_s14, %s3756_s16  ;;  %s41_s18 = sadd.s32 1, %s3711_s13 }
   0x4   : > { %p39_p0 = scmp.eq.s32.totalorder %s38_s17, 0  ;;  %p48_p1 = scmp.ne.s32.totalorder %s3711_s13, %s3707_s12 }
   0x5   : > { %p49_p2 = scmp.eq.s32.totalorder %s3715_s14, 0  ;;  %p2864_p4 = scmp.ge.s32.totalorder %s3715_s14, 2 }
   0x6   : > { %s3765_s19 = scalar_select %p39_p0, %s3711_s13, %s41_s18  }
   0x7   : > { %p50_p3 = por %p49_p2, %p48_p1  ;;  %127 = sbr.rel (%p2864_p4) target bundleno = 161 (0xa1), region = 24 }
   0xc   : > { %130 = sbr.rel (!%p50_p3) target bundleno = 161 (0xa1), region = 28  ;;  %s132_s20 = sand.u32 (%p50_p3), 1, %s3711_s13  }
   0xd   : > { %s3518_s21 = smul.u32 (%p50_p3), 288, %s3715_s14 }
   0xe   : > { %s3663_s22 = smul.u32 (%p50_p3), 1152, %s132_s20 }
   0xf   : > { %s3773_s25 = scalar_lea.vmem (%p50_p3), %s4757_s1, %s3518_s21 }
  0x10   : > { %v150_v0 = vld [vmem:[%s3773_s25] sm:$0xff] (%p50_p3)  ;;  %v152_v1 = vld [vmem:[%s3773_s25 + $0x8] sm:$0xff] (%p50_p3)  ;;  %v154_v2 = vld [vmem:[%s3773_s25 + $0x10] sm:$0xff] (%p50_p3)  ;;  %s3778_s26 = scalar_lea.vmem (%p50_p3), [#allocation2], %s3663_s22 }
  0x11   : > { %151 = vst [vmem:[%s3778_s26] sm:$0xff] %v150_v0  ;;  %v156_v3 = vld [vmem:[%s3773_s25 + $0x18] sm:$0xff]  ;;  %v158_v4 = vld [vmem:[%s3773_s25 + $0x20] sm:$0xff]  ;;  %v160_v5 = vld [vmem:[%s3773_s25 + $0x28] sm:$0xff] }
  0x12   : > { %153 = vst [vmem:[%s3778_s26 + $0x8] sm:$0xff] %v152_v1  ;;  %v162_v6 = vld [vmem:[%s3773_s25 + $0x30] sm:$0xff]  ;;  %v164_v7 = vld [vmem:[%s3773_s25 + $0x38] sm:$0xff]  ;;  %v166_v8 = vld [vmem:[%s3773_s25 + $0x40] sm:$0xff] }
  0x13   : > { %155 = vst [vmem:[%s3778_s26 + $0x10] sm:$0xff] %v154_v2  ;;  %v168_v9 = vld [vmem:[%s3773_s25 + $0x48] sm:$0xff]  ;;  %v170_v10 = vld [vmem:[%s3773_s25 + $0x50] sm:$0xff]  ;;  %v172_v11 = vld [vmem:[%s3773_s25 + $0x58] sm:$0xff] }
  0x14   : > { %157 = vst [vmem:[%s3778_s26 + $0x18] sm:$0xff] %v156_v3  ;;  %v174_v12 = vld [vmem:[%s3773_s25 + $0x60] sm:$0xff]  ;;  %v176_v13 = vld [vmem:[%s3773_s25 + $0x68] sm:$0xff]  ;;  %v178_v14 = vld [vmem:[%s3773_s25 + $0x70] sm:$0xff] }
  0x15   : > { %159 = vst [vmem:[%s3778_s26 + $0x20] sm:$0xff] %v158_v4  ;;  %v180_v15 = vld [vmem:[%s3773_s25 + $0x78] sm:$0xff]  ;;  %v182_v16 = vld [vmem:[%s3773_s25 + $0x80] sm:$0xff]  ;;  %v184_v17 = vld [vmem:[%s3773_s25 + $0x88] sm:$0xff] }
  0x16   : > { %161 = vst [vmem:[%s3778_s26 + $0x28] sm:$0xff] %v160_v5  ;;  %v186_v18 = vld [vmem:[%s3773_s25 + $0x90] sm:$0xff]  ;;  %v188_v19 = vld [vmem:[%s3773_s25 + $0x98] sm:$0xff]  ;;  %v190_v20 = vld [vmem:[%s3773_s25 + $0xa0] sm:$0xff] }
  0x17   : > { %163 = vst [vmem:[%s3778_s26 + $0x30] sm:$0xff] %v162_v6  ;;  %v192_v21 = vld [vmem:[%s3773_s25 + $0xa8] sm:$0xff]  ;;  %v194_v22 = vld [vmem:[%s3773_s25 + $0xb0] sm:$0xff]  ;;  %v196_v23 = vld [vmem:[%s3773_s25 + $0xb8] sm:$0xff] }
  0x18   : > { %165 = vst [vmem:[%s3778_s26 + $0x38] sm:$0xff] %v164_v7  ;;  %v198_v24 = vld [vmem:[%s3773_s25 + $0xc0] sm:$0xff]  ;;  %v200_v25 = vld [vmem:[%s3773_s25 + $0xc8] sm:$0xff]  ;;  %v202_v26 = vld [vmem:[%s3773_s25 + $0xd0] sm:$0xff] }
  0x19   : > { %167 = vst [vmem:[%s3778_s26 + $0x40] sm:$0xff] %v166_v8  ;;  %v204_v27 = vld [vmem:[%s3773_s25 + $0xd8] sm:$0xff]  ;;  %v206_v28 = vld [vmem:[%s3773_s25 + $0xe0] sm:$0xff]  ;;  %v208_v29 = vld [vmem:[%s3773_s25 + $0xe8] sm:$0xff] }
  0x1a   : > { %169 = vst [vmem:[%s3778_s26 + $0x48] sm:$0xff] %v168_v9  ;;  %v210_v30 = vld [vmem:[%s3773_s25 + $0xf0] sm:$0xff]  ;;  %v212_v31 = vld [vmem:[%s3773_s25 + $0xf8] sm:$0xff]  ;;  %v214_v32 = vld [vmem:[%s3773_s25 + $0x100] sm:$0xff] }
  0x1b   : > { %171 = vst [vmem:[%s3778_s26 + $0x50] sm:$0xff] %v170_v10  ;;  %v216_v33 = vld [vmem:[%s3773_s25 + $0x108] sm:$0xff]  ;;  %v218_v34 = vld [vmem:[%s3773_s25 + $0x110] sm:$0xff]  ;;  %v220_v35 = vld [vmem:[%s3773_s25 + $0x118] sm:$0xff] }
  0x1c   : > { %173 = vst [vmem:[%s3778_s26 + $0x58] sm:$0xff] %v172_v11  ;;  %v222_v36 = vld [vmem:[%s3773_s25 + $0x240] sm:$0xff]  ;;  %v224_v37 = vld [vmem:[%s3773_s25 + $0x248] sm:$0xff]  ;;  %v226_v38 = vld [vmem:[%s3773_s25 + $0x250] sm:$0xff] }
  0x1d   : > { %175 = vst [vmem:[%s3778_s26 + $0x60] sm:$0xff] %v174_v12  ;;  %v228_v39 = vld [vmem:[%s3773_s25 + $0x258] sm:$0xff]  ;;  %v230_v40 = vld [vmem:[%s3773_s25 + $0x260] sm:$0xff]  ;;  %v232_v41 = vld [vmem:[%s3773_s25 + $0x268] sm:$0xff] }
  0x1e   : > { %177 = vst [vmem:[%s3778_s26 + $0x68] sm:$0xff] %v176_v13  ;;  %v234_v42 = vld [vmem:[%s3773_s25 + $0x270] sm:$0xff]  ;;  %v236_v43 = vld [vmem:[%s3773_s25 + $0x278] sm:$0xff]  ;;  %v238_v44 = vld [vmem:[%s3773_s25 + $0x280] sm:$0xff] }
  0x1f   : > { %179 = vst [vmem:[%s3778_s26 + $0x70] sm:$0xff] %v178_v14  ;;  %v240_v45 = vld [vmem:[%s3773_s25 + $0x288] sm:$0xff]  ;;  %v242_v46 = vld [vmem:[%s3773_s25 + $0x290] sm:$0xff]  ;;  %v244_v47 = vld [vmem:[%s3773_s25 + $0x298] sm:$0xff] }
  0x20   : > { %181 = vst [vmem:[%s3778_s26 + $0x78] sm:$0xff] %v180_v15  ;;  %v246_v48 = vld [vmem:[%s3773_s25 + $0x2a0] sm:$0xff]  ;;  %v248_v49 = vld [vmem:[%s3773_s25 + $0x2a8] sm:$0xff]  ;;  %v250_v50 = vld [vmem:[%s3773_s25 + $0x2b0] sm:$0xff] }
  0x21   : > { %183 = vst [vmem:[%s3778_s26 + $0x80] sm:$0xff] %v182_v16  ;;  %v252_v51 = vld [vmem:[%s3773_s25 + $0x2b8] sm:$0xff]  ;;  %v254_v52 = vld [vmem:[%s3773_s25 + $0x2c0] sm:$0xff]  ;;  %v256_v53 = vld [vmem:[%s3773_s25 + $0x2c8] sm:$0xff] }
  0x22   : > { %185 = vst [vmem:[%s3778_s26 + $0x88] sm:$0xff] %v184_v17  ;;  %v258_v54 = vld [vmem:[%s3773_s25 + $0x2d0] sm:$0xff]  ;;  %v260_v55 = vld [vmem:[%s3773_s25 + $0x2d8] sm:$0xff]  ;;  %v262_v56 = vld [vmem:[%s3773_s25 + $0x2e0] sm:$0xff] }
  0x23   : > { %187 = vst [vmem:[%s3778_s26 + $0x90] sm:$0xff] %v186_v18  ;;  %v264_v57 = vld [vmem:[%s3773_s25 + $0x2e8] sm:$0xff]  ;;  %v266_v58 = vld [vmem:[%s3773_s25 + $0x2f0] sm:$0xff]  ;;  %v268_v59 = vld [vmem:[%s3773_s25 + $0x2f8] sm:$0xff] }
  0x24   : > { %189 = vst [vmem:[%s3778_s26 + $0x98] sm:$0xff] %v188_v19  ;;  %v270_v60 = vld [vmem:[%s3773_s25 + $0x300] sm:$0xff]  ;;  %v272_v61 = vld [vmem:[%s3773_s25 + $0x308] sm:$0xff]  ;;  %v274_v62 = vld [vmem:[%s3773_s25 + $0x310] sm:$0xff] }
  0x25   : > { %191 = vst [vmem:[%s3778_s26 + $0xa0] sm:$0xff] %v190_v20  ;;  %v276_v63 = vld [vmem:[%s3773_s25 + $0x318] sm:$0xff]  ;;  %v278_v0 = vld [vmem:[%s3773_s25 + $0x320] sm:$0xff]  ;;  %v280_v1 = vld [vmem:[%s3773_s25 + $0x328] sm:$0xff] }
  0x26   : > { %193 = vst [vmem:[%s3778_s26 + $0xa8] sm:$0xff] %v192_v21  ;;  %v282_v2 = vld [vmem:[%s3773_s25 + $0x330] sm:$0xff]  ;;  %v284_v3 = vld [vmem:[%s3773_s25 + $0x338] sm:$0xff]  ;;  %v286_v4 = vld [vmem:[%s3773_s25 + $0x340] sm:$0xff] }
  0x27   : > { %195 = vst [vmem:[%s3778_s26 + $0xb0] sm:$0xff] %v194_v22  ;;  %v288_v5 = vld [vmem:[%s3773_s25 + $0x348] sm:$0xff]  ;;  %v290_v6 = vld [vmem:[%s3773_s25 + $0x350] sm:$0xff]  ;;  %v292_v7 = vld [vmem:[%s3773_s25 + $0x358] sm:$0xff] }
  0x28   : > { %197 = vst [vmem:[%s3778_s26 + $0xb8] sm:$0xff] %v196_v23  ;;  %v294_v8 = vld [vmem:[%s3773_s25 + $0x480] sm:$0xff]  ;;  %v296_v9 = vld [vmem:[%s3773_s25 + $0x488] sm:$0xff]  ;;  %v298_v10 = vld [vmem:[%s3773_s25 + $0x490] sm:$0xff] }
  0x29   : > { %199 = vst [vmem:[%s3778_s26 + $0xc0] sm:$0xff] %v198_v24  ;;  %v300_v11 = vld [vmem:[%s3773_s25 + $0x498] sm:$0xff]  ;;  %v302_v12 = vld [vmem:[%s3773_s25 + $0x4a0] sm:$0xff]  ;;  %v304_v13 = vld [vmem:[%s3773_s25 + $0x4a8] sm:$0xff] }
  0x2a   : > { %201 = vst [vmem:[%s3778_s26 + $0xc8] sm:$0xff] %v200_v25  ;;  %v306_v14 = vld [vmem:[%s3773_s25 + $0x4b0] sm:$0xff]  ;;  %v308_v15 = vld [vmem:[%s3773_s25 + $0x4b8] sm:$0xff]  ;;  %v310_v16 = vld [vmem:[%s3773_s25 + $0x4c0] sm:$0xff] }
  0x2b   : > { %203 = vst [vmem:[%s3778_s26 + $0xd0] sm:$0xff] %v202_v26  ;;  %v312_v17 = vld [vmem:[%s3773_s25 + $0x4c8] sm:$0xff]  ;;  %v314_v18 = vld [vmem:[%s3773_s25 + $0x4d0] sm:$0xff]  ;;  %v316_v19 = vld [vmem:[%s3773_s25 + $0x4d8] sm:$0xff] }
  0x2c   : > { %205 = vst [vmem:[%s3778_s26 + $0xd8] sm:$0xff] %v204_v27  ;;  %v318_v20 = vld [vmem:[%s3773_s25 + $0x4e0] sm:$0xff]  ;;  %v320_v21 = vld [vmem:[%s3773_s25 + $0x4e8] sm:$0xff]  ;;  %v322_v22 = vld [vmem:[%s3773_s25 + $0x4f0] sm:$0xff] }
  0x2d   : > { %207 = vst [vmem:[%s3778_s26 + $0xe0] sm:$0xff] %v206_v28  ;;  %v324_v23 = vld [vmem:[%s3773_s25 + $0x4f8] sm:$0xff]  ;;  %v326_v24 = vld [vmem:[%s3773_s25 + $0x500] sm:$0xff]  ;;  %v328_v25 = vld [vmem:[%s3773_s25 + $0x508] sm:$0xff] }
  0x2e   : > { %209 = vst [vmem:[%s3778_s26 + $0xe8] sm:$0xff] %v208_v29  ;;  %v330_v26 = vld [vmem:[%s3773_s25 + $0x510] sm:$0xff]  ;;  %v332_v27 = vld [vmem:[%s3773_s25 + $0x518] sm:$0xff]  ;;  %v334_v28 = vld [vmem:[%s3773_s25 + $0x520] sm:$0xff] }
  0x2f   : > { %211 = vst [vmem:[%s3778_s26 + $0xf0] sm:$0xff] %v210_v30  ;;  %v336_v29 = vld [vmem:[%s3773_s25 + $0x528] sm:$0xff]  ;;  %v338_v30 = vld [vmem:[%s3773_s25 + $0x530] sm:$0xff] }
  0x30   : > { %213 = vst [vmem:[%s3778_s26 + $0xf8] sm:$0xff] %v212_v31  ;;  %v340_v31 = vld [vmem:[%s3773_s25 + $0x538] sm:$0xff] }
  0x31   : > { %215 = vst [vmem:[%s3778_s26 + $0x100] sm:$0xff] %v214_v32  ;;  %v342_v32 = vld [vmem:[%s3773_s25 + $0x540] sm:$0xff] }
  0x32   : > { %217 = vst [vmem:[%s3778_s26 + $0x108] sm:$0xff] %v216_v33  ;;  %v344_v33 = vld [vmem:[%s3773_s25 + $0x548] sm:$0xff] }
  0x33   : > { %219 = vst [vmem:[%s3778_s26 + $0x110] sm:$0xff] %v218_v34  ;;  %v346_v34 = vld [vmem:[%s3773_s25 + $0x550] sm:$0xff] }
  0x34   : > { %221 = vst [vmem:[%s3778_s26 + $0x118] sm:$0xff] %v220_v35  ;;  %v348_v35 = vld [vmem:[%s3773_s25 + $0x558] sm:$0xff] }
  0x35   : > { %223 = vst [vmem:[%s3778_s26 + $0x120] sm:$0xff] %v222_v36  ;;  %v350_v36 = vld [vmem:[%s3773_s25 + $0x560] sm:$0xff] }
  0x36   : > { %225 = vst [vmem:[%s3778_s26 + $0x128] sm:$0xff] %v224_v37  ;;  %v352_v37 = vld [vmem:[%s3773_s25 + $0x568] sm:$0xff] }
  0x37   : > { %227 = vst [vmem:[%s3778_s26 + $0x130] sm:$0xff] %v226_v38  ;;  %v354_v38 = vld [vmem:[%s3773_s25 + $0x570] sm:$0xff] }
  0x38   : > { %229 = vst [vmem:[%s3778_s26 + $0x138] sm:$0xff] %v228_v39  ;;  %v356_v39 = vld [vmem:[%s3773_s25 + $0x578] sm:$0xff] }
  0x39   : > { %231 = vst [vmem:[%s3778_s26 + $0x140] sm:$0xff] %v230_v40  ;;  %v358_v40 = vld [vmem:[%s3773_s25 + $0x580] sm:$0xff] }
  0x3a   : > { %233 = vst [vmem:[%s3778_s26 + $0x148] sm:$0xff] %v232_v41  ;;  %v360_v41 = vld [vmem:[%s3773_s25 + $0x588] sm:$0xff] }
  0x3b   : > { %235 = vst [vmem:[%s3778_s26 + $0x150] sm:$0xff] %v234_v42  ;;  %v362_v42 = vld [vmem:[%s3773_s25 + $0x590] sm:$0xff] }
  0x3c   : > { %237 = vst [vmem:[%s3778_s26 + $0x158] sm:$0xff] %v236_v43  ;;  %v364_v43 = vld [vmem:[%s3773_s25 + $0x598] sm:$0xff] }
  0x3d   : > { %239 = vst [vmem:[%s3778_s26 + $0x160] sm:$0xff] %v238_v44  ;;  %v366_v44 = vld [vmem:[%s3773_s25 + $0x6c0] sm:$0xff] }
  0x3e   : > { %241 = vst [vmem:[%s3778_s26 + $0x168] sm:$0xff] %v240_v45  ;;  %v368_v45 = vld [vmem:[%s3773_s25 + $0x6c8] sm:$0xff] }
  0x3f   : > { %243 = vst [vmem:[%s3778_s26 + $0x170] sm:$0xff] %v242_v46  ;;  %v370_v46 = vld [vmem:[%s3773_s25 + $0x6d0] sm:$0xff] }
  0x40   : > { %245 = vst [vmem:[%s3778_s26 + $0x178] sm:$0xff] %v244_v47  ;;  %v372_v47 = vld [vmem:[%s3773_s25 + $0x6d8] sm:$0xff] }
  0x41   : > { %247 = vst [vmem:[%s3778_s26 + $0x180] sm:$0xff] %v246_v48  ;;  %v374_v48 = vld [vmem:[%s3773_s25 + $0x6e0] sm:$0xff] }
  0x42   : > { %249 = vst [vmem:[%s3778_s26 + $0x188] sm:$0xff] %v248_v49  ;;  %v376_v49 = vld [vmem:[%s3773_s25 + $0x6e8] sm:$0xff] }
  0x43   : > { %251 = vst [vmem:[%s3778_s26 + $0x190] sm:$0xff] %v250_v50  ;;  %v378_v50 = vld [vmem:[%s3773_s25 + $0x6f0] sm:$0xff] }
  0x44   : > { %253 = vst [vmem:[%s3778_s26 + $0x198] sm:$0xff] %v252_v51  ;;  %v380_v51 = vld [vmem:[%s3773_s25 + $0x6f8] sm:$0xff] }
  0x45   : > { %255 = vst [vmem:[%s3778_s26 + $0x1a0] sm:$0xff] %v254_v52  ;;  %v382_v52 = vld [vmem:[%s3773_s25 + $0x700] sm:$0xff] }
  0x46   : > { %257 = vst [vmem:[%s3778_s26 + $0x1a8] sm:$0xff] %v256_v53  ;;  %v384_v53 = vld [vmem:[%s3773_s25 + $0x708] sm:$0xff] }
  0x47   : > { %259 = vst [vmem:[%s3778_s26 + $0x1b0] sm:$0xff] %v258_v54  ;;  %v386_v54 = vld [vmem:[%s3773_s25 + $0x710] sm:$0xff] }
  0x48   : > { %261 = vst [vmem:[%s3778_s26 + $0x1b8] sm:$0xff] %v260_v55  ;;  %v388_v55 = vld [vmem:[%s3773_s25 + $0x718] sm:$0xff] }
  0x49   : > { %263 = vst [vmem:[%s3778_s26 + $0x1c0] sm:$0xff] %v262_v56  ;;  %v390_v56 = vld [vmem:[%s3773_s25 + $0x720] sm:$0xff] }
  0x4a   : > { %265 = vst [vmem:[%s3778_s26 + $0x1c8] sm:$0xff] %v264_v57  ;;  %v392_v57 = vld [vmem:[%s3773_s25 + $0x728] sm:$0xff] }
  0x4b   : > { %267 = vst [vmem:[%s3778_s26 + $0x1d0] sm:$0xff] %v266_v58  ;;  %v394_v58 = vld [vmem:[%s3773_s25 + $0x730] sm:$0xff] }
  0x4c   : > { %269 = vst [vmem:[%s3778_s26 + $0x1d8] sm:$0xff] %v268_v59  ;;  %v396_v59 = vld [vmem:[%s3773_s25 + $0x738] sm:$0xff] }
  0x4d   : > { %271 = vst [vmem:[%s3778_s26 + $0x1e0] sm:$0xff] %v270_v60  ;;  %v398_v60 = vld [vmem:[%s3773_s25 + $0x740] sm:$0xff] }
  0x4e   : > { %273 = vst [vmem:[%s3778_s26 + $0x1e8] sm:$0xff] %v272_v61  ;;  %v400_v61 = vld [vmem:[%s3773_s25 + $0x748] sm:$0xff] }
  0x4f   : > { %275 = vst [vmem:[%s3778_s26 + $0x1f0] sm:$0xff] %v274_v62  ;;  %v402_v62 = vld [vmem:[%s3773_s25 + $0x750] sm:$0xff] }
  0x50   : > { %277 = vst [vmem:[%s3778_s26 + $0x1f8] sm:$0xff] %v276_v63  ;;  %v404_v63 = vld [vmem:[%s3773_s25 + $0x758] sm:$0xff] }
  0x51   : > { %279 = vst [vmem:[%s3778_s26 + $0x200] sm:$0xff] %v278_v0  ;;  %v406_v0 = vld [vmem:[%s3773_s25 + $0x760] sm:$0xff] }
  0x52   : > { %281 = vst [vmem:[%s3778_s26 + $0x208] sm:$0xff] %v280_v1  ;;  %v408_v1 = vld [vmem:[%s3773_s25 + $0x768] sm:$0xff] }
  0x53   : > { %283 = vst [vmem:[%s3778_s26 + $0x210] sm:$0xff] %v282_v2  ;;  %v410_v2 = vld [vmem:[%s3773_s25 + $0x770] sm:$0xff] }
  0x54   : > { %285 = vst [vmem:[%s3778_s26 + $0x218] sm:$0xff] %v284_v3  ;;  %v412_v3 = vld [vmem:[%s3773_s25 + $0x778] sm:$0xff] }
  0x55   : > { %287 = vst [vmem:[%s3778_s26 + $0x220] sm:$0xff] %v286_v4  ;;  %v414_v4 = vld [vmem:[%s3773_s25 + $0x780] sm:$0xff] }
  0x56   : > { %289 = vst [vmem:[%s3778_s26 + $0x228] sm:$0xff] %v288_v5  ;;  %v416_v5 = vld [vmem:[%s3773_s25 + $0x788] sm:$0xff] }
  0x57   : > { %291 = vst [vmem:[%s3778_s26 + $0x230] sm:$0xff] %v290_v6  ;;  %v418_v6 = vld [vmem:[%s3773_s25 + $0x790] sm:$0xff] }
  0x58   : > { %293 = vst [vmem:[%s3778_s26 + $0x238] sm:$0xff] %v292_v7  ;;  %v420_v7 = vld [vmem:[%s3773_s25 + $0x798] sm:$0xff] }
  0x59   : > { %295 = vst [vmem:[%s3778_s26 + $0x240] sm:$0xff] %v294_v8  ;;  %v422_v8 = vld [vmem:[%s3773_s25 + $0x7a0] sm:$0xff] }
  0x5a   : > { %297 = vst [vmem:[%s3778_s26 + $0x248] sm:$0xff] %v296_v9  ;;  %v424_v9 = vld [vmem:[%s3773_s25 + $0x7a8] sm:$0xff] }
  0x5b   : > { %299 = vst [vmem:[%s3778_s26 + $0x250] sm:$0xff] %v298_v10  ;;  %v426_v10 = vld [vmem:[%s3773_s25 + $0x7b0] sm:$0xff] }
  0x5c   : > { %301 = vst [vmem:[%s3778_s26 + $0x258] sm:$0xff] %v300_v11  ;;  %v428_v11 = vld [vmem:[%s3773_s25 + $0x7b8] sm:$0xff] }
  0x5d   : > { %303 = vst [vmem:[%s3778_s26 + $0x260] sm:$0xff] %v302_v12  ;;  %v430_v12 = vld [vmem:[%s3773_s25 + $0x7c0] sm:$0xff] }
  0x5e   : > { %305 = vst [vmem:[%s3778_s26 + $0x268] sm:$0xff] %v304_v13  ;;  %v432_v13 = vld [vmem:[%s3773_s25 + $0x7c8] sm:$0xff] }
  0x5f   : > { %307 = vst [vmem:[%s3778_s26 + $0x270] sm:$0xff] %v306_v14  ;;  %v434_v14 = vld [vmem:[%s3773_s25 + $0x7d0] sm:$0xff] }
  0x60   : > { %309 = vst [vmem:[%s3778_s26 + $0x278] sm:$0xff] %v308_v15  ;;  %v436_v15 = vld [vmem:[%s3773_s25 + $0x7d8] sm:$0xff] }
  0x61   : > { %311 = vst [vmem:[%s3778_s26 + $0x280] sm:$0xff] %v310_v16 }
  0x62   : > { %313 = vst [vmem:[%s3778_s26 + $0x288] sm:$0xff] %v312_v17 }
  0x63   : > { %315 = vst [vmem:[%s3778_s26 + $0x290] sm:$0xff] %v314_v18 }
  0x64   : > { %317 = vst [vmem:[%s3778_s26 + $0x298] sm:$0xff] %v316_v19 }
  0x65   : > { %319 = vst [vmem:[%s3778_s26 + $0x2a0] sm:$0xff] %v318_v20 }
  0x66   : > { %321 = vst [vmem:[%s3778_s26 + $0x2a8] sm:$0xff] %v320_v21 }
  0x67   : > { %323 = vst [vmem:[%s3778_s26 + $0x2b0] sm:$0xff] %v322_v22 }
  0x68   : > { %325 = vst [vmem:[%s3778_s26 + $0x2b8] sm:$0xff] %v324_v23 }
  0x69   : > { %327 = vst [vmem:[%s3778_s26 + $0x2c0] sm:$0xff] %v326_v24 }
  0x6a   : > { %329 = vst [vmem:[%s3778_s26 + $0x2c8] sm:$0xff] %v328_v25 }
  0x6b   : > { %331 = vst [vmem:[%s3778_s26 + $0x2d0] sm:$0xff] %v330_v26 }
  0x6c   : > { %333 = vst [vmem:[%s3778_s26 + $0x2d8] sm:$0xff] %v332_v27 }
  0x6d   : > { %335 = vst [vmem:[%s3778_s26 + $0x2e0] sm:$0xff] %v334_v28 }
  0x6e   : > { %337 = vst [vmem:[%s3778_s26 + $0x2e8] sm:$0xff] %v336_v29 }
  0x6f   : > { %339 = vst [vmem:[%s3778_s26 + $0x2f0] sm:$0xff] %v338_v30 }
  0x70   : > { %341 = vst [vmem:[%s3778_s26 + $0x2f8] sm:$0xff] %v340_v31 }
  0x71   : > { %343 = vst [vmem:[%s3778_s26 + $0x300] sm:$0xff] %v342_v32 }
  0x72   : > { %345 = vst [vmem:[%s3778_s26 + $0x308] sm:$0xff] %v344_v33 }
  0x73   : > { %347 = vst [vmem:[%s3778_s26 + $0x310] sm:$0xff] %v346_v34 }
  0x74   : > { %349 = vst [vmem:[%s3778_s26 + $0x318] sm:$0xff] %v348_v35 }
  0x75   : > { %351 = vst [vmem:[%s3778_s26 + $0x320] sm:$0xff] %v350_v36 }
  0x76   : > { %353 = vst [vmem:[%s3778_s26 + $0x328] sm:$0xff] %v352_v37 }
  0x77   : > { %355 = vst [vmem:[%s3778_s26 + $0x330] sm:$0xff] %v354_v38 }
  0x78   : > { %357 = vst [vmem:[%s3778_s26 + $0x338] sm:$0xff] %v356_v39 }
  0x79   : > { %359 = vst [vmem:[%s3778_s26 + $0x340] sm:$0xff] %v358_v40 }
  0x7a   : > { %361 = vst [vmem:[%s3778_s26 + $0x348] sm:$0xff] %v360_v41 }
  0x7b   : > { %363 = vst [vmem:[%s3778_s26 + $0x350] sm:$0xff] %v362_v42 }
  0x7c   : > { %365 = vst [vmem:[%s3778_s26 + $0x358] sm:$0xff] %v364_v43 }
  0x7d   : > { %367 = vst [vmem:[%s3778_s26 + $0x360] sm:$0xff] %v366_v44 }
  0x7e   : > { %369 = vst [vmem:[%s3778_s26 + $0x368] sm:$0xff] %v368_v45 }
  0x7f   : > { %371 = vst [vmem:[%s3778_s26 + $0x370] sm:$0xff] %v370_v46 }
  0x80   : > { %373 = vst [vmem:[%s3778_s26 + $0x378] sm:$0xff] %v372_v47 }
  0x81   : > { %375 = vst [vmem:[%s3778_s26 + $0x380] sm:$0xff] %v374_v48 }
  0x82   : > { %377 = vst [vmem:[%s3778_s26 + $0x388] sm:$0xff] %v376_v49 }
  0x83   : > { %379 = vst [vmem:[%s3778_s26 + $0x390] sm:$0xff] %v378_v50 }
  0x84   : > { %381 = vst [vmem:[%s3778_s26 + $0x398] sm:$0xff] %v380_v51 }
  0x85   : > { %383 = vst [vmem:[%s3778_s26 + $0x3a0] sm:$0xff] %v382_v52 }
  0x86   : > { %385 = vst [vmem:[%s3778_s26 + $0x3a8] sm:$0xff] %v384_v53 }
  0x87   : > { %387 = vst [vmem:[%s3778_s26 + $0x3b0] sm:$0xff] %v386_v54 }
  0x88   : > { %389 = vst [vmem:[%s3778_s26 + $0x3b8] sm:$0xff] %v388_v55 }
  0x89   : > { %391 = vst [vmem:[%s3778_s26 + $0x3c0] sm:$0xff] %v390_v56 }
  0x8a   : > { %393 = vst [vmem:[%s3778_s26 + $0x3c8] sm:$0xff] %v392_v57 }
  0x8b   : > { %395 = vst [vmem:[%s3778_s26 + $0x3d0] sm:$0xff] %v394_v58 }
  0x8c   : > { %397 = vst [vmem:[%s3778_s26 + $0x3d8] sm:$0xff] %v396_v59 }
  0x8d   : > { %399 = vst [vmem:[%s3778_s26 + $0x3e0] sm:$0xff] %v398_v60 }
  0x8e   : > { %401 = vst [vmem:[%s3778_s26 + $0x3e8] sm:$0xff] %v400_v61 }
  0x8f   : > { %403 = vst [vmem:[%s3778_s26 + $0x3f0] sm:$0xff] %v402_v62 }
  0x90   : > { %405 = vst [vmem:[%s3778_s26 + $0x3f8] sm:$0xff] %v404_v63 }
  0x91   : > { %407 = vst [vmem:[%s3778_s26 + $0x400] sm:$0xff] %v406_v0 }
  0x92   : > { %409 = vst [vmem:[%s3778_s26 + $0x408] sm:$0xff] %v408_v1 }
  0x93   : > { %411 = vst [vmem:[%s3778_s26 + $0x410] sm:$0xff] %v410_v2 }
  0x94   : > { %413 = vst [vmem:[%s3778_s26 + $0x418] sm:$0xff] %v412_v3 }
  0x95   : > { %415 = vst [vmem:[%s3778_s26 + $0x420] sm:$0xff] %v414_v4 }
  0x96   : > { %417 = vst [vmem:[%s3778_s26 + $0x428] sm:$0xff] %v416_v5 }
  0x97   : > { %419 = vst [vmem:[%s3778_s26 + $0x430] sm:$0xff] %v418_v6 }
  0x98   : > { %421 = vst [vmem:[%s3778_s26 + $0x438] sm:$0xff] %v420_v7 }
  0x99   : > { %423 = vst [vmem:[%s3778_s26 + $0x440] sm:$0xff] %v422_v8 }
  0x9a   : > { %425 = vst [vmem:[%s3778_s26 + $0x448] sm:$0xff] %v424_v9 }
  0x9b   : > { %427 = vst [vmem:[%s3778_s26 + $0x450] sm:$0xff] %v426_v10 }
  0x9c   : > { %429 = vst [vmem:[%s3778_s26 + $0x458] sm:$0xff] %v428_v11 }
  0x9d   : > { %431 = vst [vmem:[%s3778_s26 + $0x460] sm:$0xff] %v430_v12 }
  0x9e   : > { %433 = vst [vmem:[%s3778_s26 + $0x468] sm:$0xff] %v432_v13 }
  0x9f   : > { %435 = vst [vmem:[%s3778_s26 + $0x470] sm:$0xff] %v434_v14 }
  0xa0   : > { %437 = vst [vmem:[%s3778_s26 + $0x478] sm:$0xff] %v436_v15 }
  0xa1 PF: > { %p2866_p5 = scmp.ge.s32.totalorder %s3715_s14, 1  ;;  %p442_p6 = scmp.lt.s32.totalorder %s3715_s14, 3 }
  0xa3   : > { %p443_p7 = pnand %p2866_p5, %p442_p6 }
  0xa4   : > { %s449_s27 = sand.u32 (!%p443_p7), 1, %s3707_s12   ;;  %s473_s7 = smul.u32 (!%p443_p7), 72, %s2861_s15 }
  0xa5   : > { %446 = sbr.rel (%p443_p7) target bundleno = 600 (0x258), region = 51 }
  0xa6   : > { %s3664_s28 = smul.u32 (!%p443_p7), 1152, %s449_s27  ;;  %p474_p8 = scmp.lt.s32.totalorder (!%p443_p7), %s473_s7, 143 }
  0xa8   : > { %s4074_s4 = scalar_lea.vmem (!%p443_p7), [#allocation2], %s3664_s28 }
  0xaa   : > { %vm1283_vm0 = vcmask 1043456   ;;  %vm1284_vm1 = vcmask 1044480   ;;  %v3717_v16 = vmov 65535   ;;  %v3718_v18 = vmov 0   ;;  %v625_v19 = vld [vmem:[%s4758_s2] sm:$0xf] }
  0xab   : > { %v1285_v17 = vsel %vm1283_vm0, 4294967295, %v3717_v16  ;;  %3691 = vset.pattern.permute.xlu0 %v3718_v18  ;;  %v3158_v21 = vld [vmem:[%s4074_s4 + $0x240] sm:$0xf]  ;;  %v3591_v23 = vld [vmem:[%s4074_s4 + $0x244] sm:$0xf]  ;;  %vm1279_vm2 = vcmask 203776  }
  0xac   : > { %v4072_v20 = vsel %vm1284_vm1, %v1285_v17, 0  ;;  %628 = vperm.xlu0 %3691, %v625_v19   ;;  %v3627_v22 = vld [vmem:[%s4074_s4 + $0x35c] sm:$0x10]  ;;  %v3160_v25 = vld [vmem:[%s4074_s4 + $0x360] sm:$0x10]  ;;  %s4764_s7 = smov (!%p474_p8, %s473_s7), 143 }
  0xad   : > { %v3159_v24 = vor.u32 %v3627_v22, %v3158_v21  ;;  %v3166_v26 = vld [vmem:[%s4074_s4 + $0x248] sm:$0xf]  ;;  %v3163_v28 = vor.u32 %v3591_v23, %v3160_v25  ;;  %v3592_v30 = vld [vmem:[%s4074_s4 + $0x24c] sm:$0xf]  ;;  %v2870_v32 = vld [vmem:[%s4074_s4] sm:$0xf] }
  0xae   : > { %v3628_v27 = vld [vmem:[%s4074_s4 + $0x364] sm:$0x10]  ;;  %v3168_v31 = vld [vmem:[%s4074_s4 + $0x368] sm:$0x10]  ;;  %v3555_v35 = vld [vmem:[%s4074_s4 + $0x11c] sm:$0xf0] }
  0xaf   : > { %v3167_v29 = vor.u32 %v3628_v27, %v3166_v26  ;;  %v1288_v33 = vand.u32 %v3159_v24, %v4072_v20  ;;  %v3171_v34 = vor.u32 %v3592_v30, %v3168_v31  ;;  %v3519_v36 = vld [vmem:[%s4074_s4 + $0x4] sm:$0xf]  ;;  %v1291_v38 = vand.u32 %v3163_v28, %v4072_v20  ;;  %v2878_v40 = vld [vmem:[%s4074_s4 + $0x8] sm:$0xf]  ;;  %v3520_v42 = vld [vmem:[%s4074_s4 + $0xc] sm:$0xf] }
  0xb0   : > { %v2872_v37 = vld [vmem:[%s4074_s4 + $0x120] sm:$0xf0]  ;;  %v3556_v41 = vld [vmem:[%s4074_s4 + $0x124] sm:$0xf0]  ;;  %v2871_v44 = vor.u32 %v3555_v35, %v2870_v32  ;;  %v2880_v45 = vld [vmem:[%s4074_s4 + $0x128] sm:$0xf0] }
  0xb1   : > { %v1294_v39 = vand.u32 %v3167_v29, %v4072_v20  ;;  %1509 = vmatpush.bf16.msra.mxu0 %v1288_v33  ;;  %v1297_v43 = vand.u32 %v3171_v34, %v4072_v20  ;;  %v3594_v46 = vld [vmem:[%s4074_s4 + $0x25c] sm:$0xf]  ;;  %1522 = vmatpush.bf16.msra.mxu1 %v1291_v38  ;;  %v2875_v48 = vor.u32 %v3519_v36, %v2872_v37  ;;  %v3182_v51 = vld [vmem:[%s4074_s4 + $0x258] sm:$0xf]  ;;  %v3593_v53 = vld [vmem:[%s4074_s4 + $0x254] sm:$0xf] }
  0xb2   : > { %v3184_v47 = vld [vmem:[%s4074_s4 + $0x378] sm:$0x10]  ;;  %v2879_v49 = vor.u32 %v3556_v41, %v2878_v40  ;;  %v3630_v52 = vld [vmem:[%s4074_s4 + $0x374] sm:$0x10]  ;;  %v2883_v54 = vor.u32 %v3520_v42, %v2880_v45  ;;  %v3176_v56 = vld [vmem:[%s4074_s4 + $0x370] sm:$0x10] }
  0xb3   : > { %1535 = vmatpush.bf16.msra.mxu2 %v1294_v39  ;;  %v3187_v50 = vor.u32 %v3594_v46, %v3184_v47  ;;  %1548 = vmatpush.bf16.msra.mxu3 %v1297_v43  ;;  %v3183_v55 = vor.u32 %v3630_v52, %v3182_v51  ;;  %v3174_v57 = vld [vmem:[%s4074_s4 + $0x250] sm:$0xf]  ;;  %v4107_v59 = vld [vmem:[%s4756_s0] sm:$0x3]  ;;  %v3179_v61 = vor.u32 %v3593_v53, %v3176_v56  ;;  %v2894_v63 = vld [vmem:[%s4074_s4 + $0x18] sm:$0xf] }
  0xb4   : > { %v3629_v58 = vld [vmem:[%s4074_s4 + $0x36c] sm:$0x10]  ;;  %v3522_v1 = vld [vmem:[%s4074_s4 + $0x1c] sm:$0xf]  ;;  %v3558_v3 = vld [vmem:[%s4074_s4 + $0x134] sm:$0xf0] }
  0xb5   : > { %v1309_v60 = vand.u32 %v3187_v50, %v4072_v20  ;;  %v3175_v62 = vor.u32 %v3629_v58, %v3174_v57  ;;  %1510 = vmatpush.bf16.msra.mxu0 %v2871_v44  ;;  %v1306_v0 = vand.u32 %v3183_v55, %v4072_v20  ;;  %v2896_v2 = vld [vmem:[%s4074_s4 + $0x138] sm:$0xf0]  ;;  %1523 = vmatpush.bf16.msra.mxu1 %v2875_v48  ;;  %v2886_v5 = vld [vmem:[%s4074_s4 + $0x10] sm:$0xf]  ;;  %v3521_v7 = vld [vmem:[%s4074_s4 + $0x14] sm:$0xf] }
  0xb6   : > { %v1303_v4 = vand.u32 %v3179_v61, %v4072_v20  ;;  %v3557_v6 = vld [vmem:[%s4074_s4 + $0x12c] sm:$0xf0]  ;;  %v2888_v8 = vld [vmem:[%s4074_s4 + $0x130] sm:$0xf0]  ;;  %v3596_v9 = vld [vmem:[%s4074_s4 + $0x26c] sm:$0xf]  ;;  %v2895_v11 = vor.u32 %v3558_v3, %v2894_v63  ;;  %v2899_v15 = vor.u32 %v3522_v1, %v2896_v2 }
  0xb7   : > { %1536 = vmatpush.bf16.msra.mxu2 %v2879_v49  ;;  %1549 = vmatpush.bf16.msra.mxu3 %v2883_v54  ;;  %v1300_v10 = vand.u32 %v3175_v62, %v4072_v20  ;;  %v3200_v12 = vld [vmem:[%s4074_s4 + $0x388] sm:$0x10]  ;;  %v3198_v13 = vld [vmem:[%s4074_s4 + $0x268] sm:$0xf]  ;;  %v3595_v18 = vld [vmem:[%s4074_s4 + $0x264] sm:$0xf]  ;;  %v2891_v22 = vor.u32 %v3521_v7, %v2888_v8  ;;  %v2887_v32 = vor.u32 %v3557_v6, %v2886_v5 }
  0xb8   : > { %v3632_v14 = vld [vmem:[%s4074_s4 + $0x384] sm:$0x10]  ;;  %3444 = vmatmul.msk.bf16.vlgmr.msra.gmra.mxu0 %vm1279_vm2, %v4107_v59  ;;  %v3203_v16 = vor.u32 %v3596_v9, %v3200_v12  ;;  %v3192_v19 = vld [vmem:[%s4074_s4 + $0x380] sm:$0x10]  ;;  %v3190_v21 = vld [vmem:[%s4074_s4 + $0x260] sm:$0xf]  ;;  %3445 = vmatmul.msk.bf16.vlgmr.msra.gmra.mxu1 %vm1279_vm2, %v4107_v59 }
  0xb9   : > { %v3199_v17 = vor.u32 %v3632_v14, %v3198_v13  ;;  %v3195_v23 = vor.u32 %v3595_v18, %v3192_v19  ;;  %v3631_v24 = vld [vmem:[%s4074_s4 + $0x37c] sm:$0x10]  ;;  %v3524_v25 = vld [vmem:[%s4074_s4 + $0x2c] sm:$0xf]  ;;  %1574 = vmatpush.bf16.msrb.mxu1 %v1303_v4  ;;  %v2910_v30 = vld [vmem:[%s4074_s4 + $0x28] sm:$0xf]  ;;  %1561 = vmatpush.bf16.msrb.mxu0 %v1300_v10 }
  0xba   : > { %3446 = vmatmul.msk.bf16.vlgmr.msra.gmra.mxu2 %vm1279_vm2, %v4107_v59  ;;  %3447 = vmatmul.msk.bf16.vlgmr.msra.gmra.mxu3 %vm1279_vm2, %v4107_v59  ;;  %v1321_v26 = vand.u32 %v3203_v16, %v4072_v20  ;;  %v3191_v28 = vor.u32 %v3631_v24, %v3190_v21  ;;  %v2912_v29 = vld [vmem:[%s4074_s4 + $0x148] sm:$0xf0]  ;;  %v3560_v31 = vld [vmem:[%s4074_s4 + $0x144] sm:$0xf0]  ;;  %v3523_v36 = vld [vmem:[%s4074_s4 + $0x24] sm:$0xf] }
  0xbb   : > { %1587 = vmatpush.bf16.msrb.mxu2 %v1306_v0  ;;  %1600 = vmatpush.bf16.msrb.mxu3 %v1309_v60  ;;  %v1318_v27 = vand.u32 %v3199_v17, %v4072_v20  ;;  %v1315_v33 = vand.u32 %v3195_v23, %v4072_v20  ;;  %v2911_v35 = vor.u32 %v3560_v31, %v2910_v30  ;;  %v2904_v37 = vld [vmem:[%s4074_s4 + $0x140] sm:$0xf0]  ;;  %v2902_v39 = vld [vmem:[%s4074_s4 + $0x20] sm:$0xf]  ;;  %v3598_v42 = vld [vmem:[%s4074_s4 + $0x27c] sm:$0xf] }
  0xbc   : > { %v1312_v34 = vand.u32 %v3191_v28, %v4072_v20  ;;  %v2915_v38 = vor.u32 %v3524_v25, %v2912_v29  ;;  %v3559_v40 = vld [vmem:[%s4074_s4 + $0x13c] sm:$0xf0]  ;;  %v2907_v41 = vor.u32 %v3523_v36, %v2904_v37  ;;  %v3214_v43 = vld [vmem:[%s4074_s4 + $0x278] sm:$0xf]  ;;  %v3216_v46 = vld [vmem:[%s4074_s4 + $0x398] sm:$0x10] }
  0xbd   : > { %1575 = vmatpush.bf16.msrb.mxu1 %v2891_v22  ;;  %1562 = vmatpush.bf16.msrb.mxu0 %v2887_v32  ;;  %v3634_v44 = vld [vmem:[%s4074_s4 + $0x394] sm:$0x10]  ;;  %v2903_v45 = vor.u32 %v3559_v40, %v2902_v39  ;;  %v3597_v47 = vld [vmem:[%s4074_s4 + $0x274] sm:$0xf]  ;;  %v3206_v49 = vld [vmem:[%s4074_s4 + $0x270] sm:$0xf]  ;;  %v3219_v52 = vor.u32 %v3598_v42, %v3216_v46 }
  0xbe   : > { %v3208_v48 = vld [vmem:[%s4074_s4 + $0x390] sm:$0x10]  ;;  %v3633_v50 = vld [vmem:[%s4074_s4 + $0x38c] sm:$0x10]  ;;  %v3215_v51 = vor.u32 %v3634_v44, %v3214_v43  ;;  %v3526_v58 = vld [vmem:[%s4074_s4 + $0x3c] sm:$0xf] }
  0xbf   : > { %1588 = vmatpush.bf16.msrb.mxu2 %v2895_v11  ;;  %1601 = vmatpush.bf16.msrb.mxu3 %v2899_v15  ;;  %v3211_v53 = vor.u32 %v3597_v47, %v3208_v48  ;;  %v3207_v54 = vor.u32 %v3633_v50, %v3206_v49  ;;  %v1333_v56 = vand.u32 %v3219_v52, %v4072_v20  ;;  %v2926_v60 = vld [vmem:[%s4074_s4 + $0x38] sm:$0xf]  ;;  %v2928_v63 = vld [vmem:[%s4074_s4 + $0x158] sm:$0xf0]  ;;  %v3525_v0 = vld [vmem:[%s4074_s4 + $0x34] sm:$0xf] }
  0xc0   : > { %v1330_v55 = vand.u32 %v3215_v51, %v4072_v20  ;;  %v3562_v61 = vld [vmem:[%s4074_s4 + $0x154] sm:$0xf0]  ;;  %v2920_v1 = vld [vmem:[%s4074_s4 + $0x150] sm:$0xf0]  ;;  %v2918_v2 = vld [vmem:[%s4074_s4 + $0x30] sm:$0xf]  ;;  %v2931_v5 = vor.u32 %v3526_v58, %v2928_v63 }
  0xc1   : > { %1626 = vmatpush.bf16.msra.mxu1 %v1315_v33  ;;  %1613 = vmatpush.bf16.msra.mxu0 %v1312_v34  ;;  %v1327_v57 = vand.u32 %v3211_v53, %v4072_v20  ;;  %v1324_v62 = vand.u32 %v3207_v54, %v4072_v20  ;;  %v3561_v3 = vld [vmem:[%s4074_s4 + $0x14c] sm:$0xf0]  ;;  %v2927_v4 = vor.u32 %v3562_v61, %v2926_v60  ;;  %v3600_v8 = vld [vmem:[%s4074_s4 + $0x28c] sm:$0xf]  ;;  %v3230_v9 = vld [vmem:[%s4074_s4 + $0x288] sm:$0xf] }
  0xc2   : > { %v2923_v6 = vor.u32 %v3525_v0, %v2920_v1  ;;  %v2919_v7 = vor.u32 %v3561_v3, %v2918_v2  ;;  %v3636_v10 = vld [vmem:[%s4074_s4 + $0x3a4] sm:$0x10]  ;;  %v3232_v11 = vld [vmem:[%s4074_s4 + $0x3a8] sm:$0x10]  ;;  %v3599_v12 = vld [vmem:[%s4074_s4 + $0x284] sm:$0xf] }
  0xc3   : > { %1639 = vmatpush.bf16.msra.mxu2 %v1318_v27  ;;  %1652 = vmatpush.bf16.msra.mxu3 %v1321_v26  ;;  %v3224_v13 = vld [vmem:[%s4074_s4 + $0x3a0] sm:$0x10]  ;;  %v3222_v14 = vld [vmem:[%s4074_s4 + $0x280] sm:$0xf]  ;;  %v3231_v16 = vor.u32 %v3636_v10, %v3230_v9  ;;  %v3235_v17 = vor.u32 %v3600_v8, %v3232_v11  ;;  %v3528_v24 = vld [vmem:[%s4074_s4 + $0x4c] sm:$0xf] }
  0xc4   : > { %v3635_v15 = vld [vmem:[%s4074_s4 + $0x39c] sm:$0x10]  ;;  %v3227_v18 = vor.u32 %v3599_v12, %v3224_v13  ;;  %v2942_v25 = vld [vmem:[%s4074_s4 + $0x48] sm:$0xf]  ;;  %v2944_v28 = vld [vmem:[%s4074_s4 + $0x168] sm:$0xf0] }
  0xc5   : > { %1627 = vmatpush.bf16.msra.mxu1 %v2907_v41  ;;  %1614 = vmatpush.bf16.msra.mxu0 %v2903_v45  ;;  %v3223_v19 = vor.u32 %v3635_v15, %v3222_v14  ;;  %v1342_v21 = vand.u32 %v3231_v16, %v4072_v20  ;;  %v1345_v22 = vand.u32 %v3235_v17, %v4072_v20  ;;  %v3564_v26 = vld [vmem:[%s4074_s4 + $0x164] sm:$0xf0]  ;;  %v3527_v29 = vld [vmem:[%s4074_s4 + $0x44] sm:$0xf]  ;;  %v2934_v31 = vld [vmem:[%s4074_s4 + $0x40] sm:$0xf] }
  0xc6   : > { %v1339_v23 = vand.u32 %v3227_v18, %v4072_v20  ;;  %v2936_v30 = vld [vmem:[%s4074_s4 + $0x160] sm:$0xf0]  ;;  %v3563_v32 = vld [vmem:[%s4074_s4 + $0x15c] sm:$0xf0]  ;;  %v2943_v33 = vor.u32 %v3564_v26, %v2942_v25  ;;  %v2947_v34 = vor.u32 %v3528_v24, %v2944_v28  ;;  %v3602_v37 = vld [vmem:[%s4074_s4 + $0x29c] sm:$0xf] }
  0xc7   : > { %1640 = vmatpush.bf16.msra.mxu2 %v2911_v35  ;;  %1653 = vmatpush.bf16.msra.mxu3 %v2915_v38  ;;  %v1336_v27 = vand.u32 %v3223_v19, %v4072_v20  ;;  %v2939_v35 = vor.u32 %v3527_v29, %v2936_v30  ;;  %v2935_v36 = vor.u32 %v3563_v32, %v2934_v31  ;;  %v3246_v38 = vld [vmem:[%s4074_s4 + $0x298] sm:$0xf]  ;;  %v3248_v40 = vld [vmem:[%s4074_s4 + $0x3b8] sm:$0x10]  ;;  %v3601_v41 = vld [vmem:[%s4074_s4 + $0x294] sm:$0xf] }
  0xc8   : > { %3448 = vmatmul.msk.bf16.vlgmr.msrb.gmra.mxu0 %vm1279_vm2, %v4107_v59  ;;  %3449 = vmatmul.msk.bf16.vlgmr.msrb.gmra.mxu1 %vm1279_vm2, %v4107_v59  ;;  %v3638_v39 = vld [vmem:[%s4074_s4 + $0x3b4] sm:$0x10]  ;;  %v3240_v42 = vld [vmem:[%s4074_s4 + $0x3b0] sm:$0x10]  ;;  %v3238_v43 = vld [vmem:[%s4074_s4 + $0x290] sm:$0xf]  ;;  %v3251_v46 = vor.u32 %v3602_v37, %v3248_v40 }
  0xc9   : > { %1678 = vmatpush.bf16.msrb.mxu1 %v1327_v57  ;;  %1665 = vmatpush.bf16.msrb.mxu0 %v1324_v62  ;;  %v3637_v44 = vld [vmem:[%s4074_s4 + $0x3ac] sm:$0x10]  ;;  %v3247_v45 = vor.u32 %v3638_v39, %v3246_v38  ;;  %v3243_v47 = vor.u32 %v3601_v41, %v3240_v42  ;;  %v3530_v52 = vld [vmem:[%s4074_s4 + $0x5c] sm:$0xf]  ;;  %v2958_v53 = vld [vmem:[%s4074_s4 + $0x58] sm:$0xf] }
  0xca   : > { %3450 = vmatmul.msk.bf16.vlgmr.msrb.gmra.mxu2 %vm1279_vm2, %v4107_v59  ;;  %3451 = vmatmul.msk.bf16.vlgmr.msrb.gmra.mxu3 %vm1279_vm2, %v4107_v59  ;;  %v3239_v48 = vor.u32 %v3637_v44, %v3238_v43  ;;  %v1357_v50 = vand.u32 %v3251_v46, %v4072_v20  ;;  %v3566_v54 = vld [vmem:[%s4074_s4 + $0x174] sm:$0xf0]  ;;  %v3529_v57 = vld [vmem:[%s4074_s4 + $0x54] sm:$0xf]  ;;  %v2950_v60 = vld [vmem:[%s4074_s4 + $0x50] sm:$0xf] }
  0xcb   : > { %1691 = vmatpush.bf16.msrb.mxu2 %v1330_v55  ;;  %1704 = vmatpush.bf16.msrb.mxu3 %v1333_v56  ;;  %v1354_v49 = vand.u32 %v3247_v45, %v4072_v20  ;;  %v1351_v51 = vand.u32 %v3243_v47, %v4072_v20  ;;  %v2960_v56 = vld [vmem:[%s4074_s4 + $0x178] sm:$0xf0]  ;;  %v2952_v58 = vld [vmem:[%s4074_s4 + $0x170] sm:$0xf0]  ;;  %v3565_v61 = vld [vmem:[%s4074_s4 + $0x16c] sm:$0xf0]  ;;  %v2959_v62 = vor.u32 %v3566_v54, %v2958_v53 }
  0xcc   : > { %v1348_v55 = vand.u32 %v3239_v48, %v4072_v20  ;;  %v2963_v63 = vor.u32 %v3530_v52, %v2960_v56  ;;  %v2955_v0 = vor.u32 %v3529_v57, %v2952_v58  ;;  %v2951_v1 = vor.u32 %v3565_v61, %v2950_v60  ;;  %v3604_v2 = vld [vmem:[%s4074_s4 + $0x2ac] sm:$0xf]  ;;  %v3262_v3 = vld [vmem:[%s4074_s4 + $0x2a8] sm:$0xf]  ;;  %v3254_v8 = vld [vmem:[%s4074_s4 + $0x2a0] sm:$0xf] }
  0xcd   : > { %1679 = vmatpush.bf16.msrb.mxu1 %v2923_v6  ;;  %1666 = vmatpush.bf16.msrb.mxu0 %v2919_v7  ;;  %v3603_v6 = vld [vmem:[%s4074_s4 + $0x2a4] sm:$0xf]  ;;  %v3639_v9 = vld [vmem:[%s4074_s4 + $0x3bc] sm:$0x10]  ;;  %v3532_v17 = vld [vmem:[%s4074_s4 + $0x6c] sm:$0xf] }
  0xce   : > { %v3256_v7 = vld [vmem:[%s4074_s4 + $0x3c0] sm:$0x10]  ;;  %v3255_v13 = vor.u32 %v3639_v9, %v3254_v8  ;;  %v2974_v18 = vld [vmem:[%s4074_s4 + $0x68] sm:$0xf]  ;;  %v2966_v25 = vld [vmem:[%s4074_s4 + $0x60] sm:$0xf] }
  0xcf   : > { %1692 = vmatpush.bf16.msrb.mxu2 %v2927_v4  ;;  %1705 = vmatpush.bf16.msrb.mxu3 %v2931_v5  ;;  %v3640_v4 = vld [vmem:[%s4074_s4 + $0x3c4] sm:$0x10]  ;;  %v3264_v5 = vld [vmem:[%s4074_s4 + $0x3c8] sm:$0x10]  ;;  %v3259_v12 = vor.u32 %v3603_v6, %v3256_v7  ;;  %v2968_v24 = vld [vmem:[%s4074_s4 + $0x180] sm:$0xf0] }
  0xd0   : > { %v3263_v10 = vor.u32 %v3640_v4, %v3262_v3  ;;  %v3267_v11 = vor.u32 %v3604_v2, %v3264_v5  ;;  %v3568_v19 = vld [vmem:[%s4074_s4 + $0x184] sm:$0xf0]  ;;  %v3567_v26 = vld [vmem:[%s4074_s4 + $0x17c] sm:$0xf0]  ;;  %v3606_v31 = vld [vmem:[%s4074_s4 + $0x2bc] sm:$0xf] }
  0xd1   : > { %v1363_v16 = vand.u32 %v3259_v12, %v4072_v20  ;;  %v2967_v30 = vor.u32 %v3567_v26, %v2966_v25  ;;  %v3278_v32 = vld [vmem:[%s4074_s4 + $0x2b8] sm:$0xf]  ;;  %v3270_v37 = vld [vmem:[%s4074_s4 + $0x2b0] sm:$0xf]  ;;  %v3534_v46 = vld [vmem:[%s4074_s4 + $0x7c] sm:$0xf] }
  0xd2   : > { %v1366_v14 = vand.u32 %v3263_v10, %v4072_v20  ;;  %v1369_v15 = vand.u32 %v3267_v11, %v4072_v20  ;;  %v3641_v38 = vld [vmem:[%s4074_s4 + $0x3cc] sm:$0x10]  ;;  %v2990_v47 = vld [vmem:[%s4074_s4 + $0x78] sm:$0xf]  ;;  %v2984_v52 = vld [vmem:[%s4074_s4 + $0x190] sm:$0xf0] }
  0xd3   : > { %v3271_v42 = vor.u32 %v3641_v38, %v3270_v37  ;;  %v3570_v48 = vld [vmem:[%s4074_s4 + $0x194] sm:$0xf0]  ;;  %v2982_v53 = vld [vmem:[%s4074_s4 + $0x70] sm:$0xf]  ;;  %v3608_v60 = vld [vmem:[%s4074_s4 + $0x2cc] sm:$0xf] }
  0xd4   : > { %v3569_v54 = vld [vmem:[%s4074_s4 + $0x18c] sm:$0xf0]  ;;  %v3294_v61 = vld [vmem:[%s4074_s4 + $0x2c8] sm:$0xf]  ;;  %v3286_v2 = vld [vmem:[%s4074_s4 + $0x2c0] sm:$0xf] }
  0xd5   : > { %v2983_v58 = vor.u32 %v3569_v54, %v2982_v53  ;;  %v3643_v3 = vld [vmem:[%s4074_s4 + $0x3dc] sm:$0x10]  ;;  %v3536_v11 = vld [vmem:[%s4074_s4 + $0x8c] sm:$0xf]  ;;  %v3006_v12 = vld [vmem:[%s4074_s4 + $0x88] sm:$0xf] }
  0xd6   : > { %v3287_v7 = vor.u32 %v3643_v3, %v3286_v2  ;;  %v3610_v25 = vld [vmem:[%s4074_s4 + $0x2dc] sm:$0xf]  ;;  %v3310_v26 = vld [vmem:[%s4074_s4 + $0x2d8] sm:$0xf]  ;;  %v3612_v53 = vld [vmem:[%s4074_s4 + $0x2ec] sm:$0xf] }
  0xd7   : > { %v3326_v54 = vld [vmem:[%s4074_s4 + $0x2e8] sm:$0xf]  ;;  %s2867_s8 = sshll.u32 %s4764_s7, 2 }
  0xd8   : > { %3452 = vmatmul.msk.bf16.vlgmr.msra.gmra.mxu0 %vm1279_vm2, %v4107_v59  ;;  %3453 = vmatmul.msk.bf16.vlgmr.msra.gmra.mxu1 %vm1279_vm2, %v4107_v59  ;;  %s4385_s11 = scalar_lea.vmem %s4759_s3, %s2867_s8 }
  0xd9   : > { %1730 = vmatpush.bf16.msra.mxu1 %v1339_v23  ;;  %1717 = vmatpush.bf16.msra.mxu0 %v1336_v27  ;;  %v3531_v23 = vld [vmem:[%s4074_s4 + $0x64] sm:$0xf]  ;;  %v2975_v27 = vor.u32 %v3568_v19, %v2974_v18  ;;  %v2998_v18 = vld [vmem:[%s4074_s4 + $0x80] sm:$0xf] }
  0xda   : > { %3454 = vmatmul.msk.bf16.vlgmr.msra.gmra.mxu2 %vm1279_vm2, %v4107_v59  ;;  %3455 = vmatmul.msk.bf16.vlgmr.msra.gmra.mxu3 %vm1279_vm2, %v4107_v59  ;;  %v2971_v29 = vor.u32 %v3531_v23, %v2968_v24  ;;  %v3571_v19 = vld [vmem:[%s4074_s4 + $0x19c] sm:$0xf0] }
  0xdb   : > { %1743 = vmatpush.bf16.msra.mxu2 %v1342_v21  ;;  %1756 = vmatpush.bf16.msra.mxu3 %v1345_v22  ;;  %v1360_v21 = vand.u32 %v3255_v13, %v4072_v20  ;;  %v2976_v22 = vld [vmem:[%s4074_s4 + $0x188] sm:$0xf0]  ;;  %v3572_v13 = vld [vmem:[%s4074_s4 + $0x1a4] sm:$0xf0]  ;;  %v2999_v24 = vor.u32 %v3571_v19, %v2998_v18  ;;  %v3030_v19 = vld [vmem:[%s4074_s4 + $0xa0] sm:$0xf] }
  0xdc   : > { %v2979_v28 = vor.u32 %v3532_v17, %v2976_v22  ;;  %v3000_v17 = vld [vmem:[%s4074_s4 + $0x1a0] sm:$0xf0] }
  0xdd   : > { %1731 = vmatpush.bf16.msra.mxu1 %v2939_v35  ;;  %1718 = vmatpush.bf16.msra.mxu0 %v2935_v36  ;;  %v3605_v35 = vld [vmem:[%s4074_s4 + $0x2b4] sm:$0xf] }
  0xde   : > { %v3272_v36 = vld [vmem:[%s4074_s4 + $0x3d0] sm:$0x10] }
  0xdf   : > { %1744 = vmatpush.bf16.msra.mxu2 %v2943_v33  ;;  %1757 = vmatpush.bf16.msra.mxu3 %v2947_v34  ;;  %v3642_v33 = vld [vmem:[%s4074_s4 + $0x3d4] sm:$0x10]  ;;  %v3280_v34 = vld [vmem:[%s4074_s4 + $0x3d8] sm:$0x10]  ;;  %v3275_v41 = vor.u32 %v3605_v35, %v3272_v36 }
  0xe0   : > { %v3279_v39 = vor.u32 %v3642_v33, %v3278_v32  ;;  %v3283_v40 = vor.u32 %v3606_v31, %v3280_v34  ;;  %v3302_v31 = vld [vmem:[%s4074_s4 + $0x2d0] sm:$0xf] }
  0xe1   : > { %v1375_v45 = vand.u32 %v3275_v41, %v4072_v20  ;;  %v3645_v32 = vld [vmem:[%s4074_s4 + $0x3ec] sm:$0x10]  ;;  %v3022_v41 = vld [vmem:[%s4074_s4 + $0x98] sm:$0xf] }
  0xe2   : > { %v1378_v43 = vand.u32 %v3279_v39, %v4072_v20  ;;  %v1381_v44 = vand.u32 %v3283_v40, %v4072_v20  ;;  %v3303_v36 = vor.u32 %v3645_v32, %v3302_v31  ;;  %v3538_v40 = vld [vmem:[%s4074_s4 + $0x9c] sm:$0xf] }
  0xe8   : > { %3456 = vmatmul.msk.bf16.vlgmr.msrb.gmra.mxu0 %vm1279_vm2, %v4107_v59  ;;  %3457 = vmatmul.msk.bf16.vlgmr.msrb.gmra.mxu1 %vm1279_vm2, %v4107_v59 }
  0xe9   : > { %1782 = vmatpush.bf16.msrb.mxu1 %v1351_v51  ;;  %1769 = vmatpush.bf16.msrb.mxu0 %v1348_v55  ;;  %v3533_v51 = vld [vmem:[%s4074_s4 + $0x74] sm:$0xf]  ;;  %v2991_v55 = vor.u32 %v3570_v48, %v2990_v47  ;;  %v3014_v47 = vld [vmem:[%s4074_s4 + $0x90] sm:$0xf] }
  0xea   : > { %3458 = vmatmul.msk.bf16.vlgmr.msrb.gmra.mxu2 %vm1279_vm2, %v4107_v59  ;;  %3459 = vmatmul.msk.bf16.vlgmr.msrb.gmra.mxu3 %vm1279_vm2, %v4107_v59  ;;  %v2987_v57 = vor.u32 %v3533_v51, %v2984_v52  ;;  %v3573_v48 = vld [vmem:[%s4074_s4 + $0x1ac] sm:$0xf0] }
  0xeb   : > { %1795 = vmatpush.bf16.msrb.mxu2 %v1354_v49  ;;  %1808 = vmatpush.bf16.msrb.mxu3 %v1357_v50  ;;  %v1372_v49 = vand.u32 %v3271_v42, %v4072_v20  ;;  %v2992_v50 = vld [vmem:[%s4074_s4 + $0x198] sm:$0xf0]  ;;  %v3574_v42 = vld [vmem:[%s4074_s4 + $0x1b4] sm:$0xf0]  ;;  %v3015_v52 = vor.u32 %v3573_v48, %v3014_v47 }
  0xec   : > { %v2995_v56 = vor.u32 %v3534_v46, %v2992_v50  ;;  %v3016_v46 = vld [vmem:[%s4074_s4 + $0x1b0] sm:$0xf0] }
  0xed   : > { %1783 = vmatpush.bf16.msrb.mxu1 %v2955_v0  ;;  %1770 = vmatpush.bf16.msrb.mxu0 %v2951_v1  ;;  %v3607_v0 = vld [vmem:[%s4074_s4 + $0x2c4] sm:$0xf] }
  0xee   : > { %v3288_v1 = vld [vmem:[%s4074_s4 + $0x3e0] sm:$0x10] }
  0xef   : > { %1796 = vmatpush.bf16.msrb.mxu2 %v2959_v62  ;;  %1809 = vmatpush.bf16.msrb.mxu3 %v2963_v63  ;;  %v3644_v62 = vld [vmem:[%s4074_s4 + $0x3e4] sm:$0x10]  ;;  %v3296_v63 = vld [vmem:[%s4074_s4 + $0x3e8] sm:$0x10]  ;;  %v3291_v6 = vor.u32 %v3607_v0, %v3288_v1 }
  0xf0   : > { %v3295_v4 = vor.u32 %v3644_v62, %v3294_v61  ;;  %v3299_v5 = vor.u32 %v3608_v60, %v3296_v63  ;;  %v3318_v60 = vld [vmem:[%s4074_s4 + $0x2e0] sm:$0xf] }
  0xf1   : > { %v1387_v10 = vand.u32 %v3291_v6, %v4072_v20  ;;  %v3647_v61 = vld [vmem:[%s4074_s4 + $0x3fc] sm:$0x10] }
  0xf2   : > { %v1390_v8 = vand.u32 %v3295_v4, %v4072_v20  ;;  %v1393_v9 = vand.u32 %v3299_v5, %v4072_v20  ;;  %v3319_v2 = vor.u32 %v3647_v61, %v3318_v60  ;;  %v3542_v61 = vld [vmem:[%s4074_s4 + $0xbc] sm:$0xf] }
  0xf8   : > { %3460 = vmatmul.msk.bf16.vlgmr.msra.gmra.mxu0 %vm1279_vm2, %v4107_v59  ;;  %3461 = vmatmul.msk.bf16.vlgmr.msra.gmra.mxu1 %vm1279_vm2, %v4107_v59 }
  0xf9   : > { %1834 = vmatpush.bf16.msra.mxu1 %v1363_v16  ;;  %1821 = vmatpush.bf16.msra.mxu0 %v1360_v21  ;;  %v3535_v16 = vld [vmem:[%s4074_s4 + $0x84] sm:$0xf]  ;;  %v3007_v21 = vor.u32 %v3572_v13, %v3006_v12  ;;  %v3038_v12 = vld [vmem:[%s4074_s4 + $0xa8] sm:$0xf] }
  0xfa   : > { %3462 = vmatmul.msk.bf16.vlgmr.msra.gmra.mxu2 %vm1279_vm2, %v4107_v59  ;;  %3463 = vmatmul.msk.bf16.vlgmr.msra.gmra.mxu3 %vm1279_vm2, %v4107_v59  ;;  %v3003_v23 = vor.u32 %v3535_v16, %v3000_v17  ;;  %v3576_v13 = vld [vmem:[%s4074_s4 + $0x1c4] sm:$0xf0]  ;;  %v3539_v16 = vld [vmem:[%s4074_s4 + $0xa4] sm:$0xf] }
  0xfb   : > { %1847 = vmatpush.bf16.msra.mxu2 %v1366_v14  ;;  %1860 = vmatpush.bf16.msra.mxu3 %v1369_v15  ;;  %v1384_v14 = vand.u32 %v3287_v7, %v4072_v20  ;;  %v3008_v15 = vld [vmem:[%s4074_s4 + $0x1a8] sm:$0xf0]  ;;  %v3032_v17 = vld [vmem:[%s4074_s4 + $0x1c0] sm:$0xf0] }
  0xfc   : > { %v3011_v22 = vor.u32 %v3536_v11, %v3008_v15  ;;  %v3540_v7 = vld [vmem:[%s4074_s4 + $0xac] sm:$0xf]  ;;  %v1408_v15 = vand.u32 %v3319_v2, %v4072_v20 }
  0xfd   : > { %1835 = vmatpush.bf16.msra.mxu1 %v2971_v29  ;;  %1822 = vmatpush.bf16.msra.mxu0 %v2967_v30  ;;  %v3609_v29 = vld [vmem:[%s4074_s4 + $0x2d4] sm:$0xf]  ;;  %v3040_v11 = vld [vmem:[%s4074_s4 + $0x1c8] sm:$0xf0] }
  0xfe   : > { %v3304_v30 = vld [vmem:[%s4074_s4 + $0x3f0] sm:$0x10] }
  0xff   : > { %1848 = vmatpush.bf16.msra.mxu2 %v2975_v27  ;;  %1861 = vmatpush.bf16.msra.mxu3 %v2979_v28  ;;  %v3646_v27 = vld [vmem:[%s4074_s4 + $0x3f4] sm:$0x10]  ;;  %v3312_v28 = vld [vmem:[%s4074_s4 + $0x3f8] sm:$0x10]  ;;  %v3307_v35 = vor.u32 %v3609_v29, %v3304_v30 }
 0x100   : > { %v3311_v33 = vor.u32 %v3646_v27, %v3310_v26  ;;  %v3315_v34 = vor.u32 %v3610_v25, %v3312_v28  ;;  %v3043_v25 = vor.u32 %v3540_v7, %v3040_v11  ;;  %v3035_v26 = vor.u32 %v3539_v16, %v3032_v17  ;;  %v3541_v7 = vld [vmem:[%s4074_s4 + $0xb4] sm:$0xf]  ;;  %v3577_v11 = vld [vmem:[%s4074_s4 + $0x1cc] sm:$0xf0] }
 0x101   : > { %v1399_v39 = vand.u32 %v3307_v35, %v4072_v20  ;;  %v3614_v35 = vld [vmem:[%s4074_s4 + $0x2fc] sm:$0xf] }
 0x102   : > { %v1402_v37 = vand.u32 %v3311_v33, %v4072_v20  ;;  %v1405_v38 = vand.u32 %v3315_v34, %v4072_v20 }
 0x108   : > { %3464 = vmatmul.msk.bf16.vlgmr.msrb.gmra.mxu0 %vm1279_vm2, %v4107_v59  ;;  %3465 = vmatmul.msk.bf16.vlgmr.msrb.gmra.mxu1 %vm1279_vm2, %v4107_v59 }
 0x109   : > { %1886 = vmatpush.bf16.msrb.mxu1 %v1375_v45  ;;  %1873 = vmatpush.bf16.msrb.mxu0 %v1372_v49  ;;  %v3537_v45 = vld [vmem:[%s4074_s4 + $0x94] sm:$0xf]  ;;  %v3023_v49 = vor.u32 %v3574_v42, %v3022_v41 }
 0x10a   : > { %3466 = vmatmul.msk.bf16.vlgmr.msrb.gmra.mxu2 %vm1279_vm2, %v4107_v59  ;;  %3467 = vmatmul.msk.bf16.vlgmr.msrb.gmra.mxu3 %vm1279_vm2, %v4107_v59  ;;  %v3019_v51 = vor.u32 %v3537_v45, %v3016_v46  ;;  %v3613_v42 = vld [vmem:[%s4074_s4 + $0x2f4] sm:$0xf]  ;;  %v3649_v45 = vld [vmem:[%s4074_s4 + $0x40c] sm:$0x10] }
 0x10b   : > { %1899 = vmatpush.bf16.msrb.mxu2 %v1378_v43  ;;  %1912 = vmatpush.bf16.msrb.mxu3 %v1381_v44  ;;  %v1396_v43 = vand.u32 %v3303_v36, %v4072_v20  ;;  %v3024_v44 = vld [vmem:[%s4074_s4 + $0x1b8] sm:$0xf0] }
 0x10c   : > { %v3027_v50 = vor.u32 %v3538_v40, %v3024_v44  ;;  %v3344_v36 = vld [vmem:[%s4074_s4 + $0x418] sm:$0x10]  ;;  %v3650_v40 = vld [vmem:[%s4074_s4 + $0x414] sm:$0x10]  ;;  %v3334_v44 = vld [vmem:[%s4074_s4 + $0x2f0] sm:$0xf] }
 0x10d   : > { %1887 = vmatpush.bf16.msrb.mxu1 %v2987_v57  ;;  %1874 = vmatpush.bf16.msrb.mxu0 %v2983_v58  ;;  %v3611_v57 = vld [vmem:[%s4074_s4 + $0x2e4] sm:$0xf] }
 0x10e   : > { %v3320_v58 = vld [vmem:[%s4074_s4 + $0x400] sm:$0x10] }
 0x10f   : > { %1900 = vmatpush.bf16.msrb.mxu2 %v2991_v55  ;;  %1913 = vmatpush.bf16.msrb.mxu3 %v2995_v56  ;;  %v3648_v55 = vld [vmem:[%s4074_s4 + $0x404] sm:$0x10]  ;;  %v3328_v56 = vld [vmem:[%s4074_s4 + $0x408] sm:$0x10]  ;;  %v3323_v0 = vor.u32 %v3611_v57, %v3320_v58 }
 0x110   : > { %v3327_v62 = vor.u32 %v3648_v55, %v3326_v54  ;;  %v3331_v63 = vor.u32 %v3612_v53, %v3328_v56  ;;  %v3335_v53 = vor.u32 %v3649_v45, %v3334_v44 }
 0x112   : > { %v1414_v6 = vand.u32 %v3327_v62, %v4072_v20  ;;  %v3056_v62 = vld [vmem:[%s4074_s4 + $0x1d8] sm:$0xf0] }
 0x118   : > { %3468 = vmatmul.msk.bf16.vlgmr.msra.gmra.mxu0 %vm1279_vm2, %v4107_v59  ;;  %3469 = vmatmul.msk.bf16.vlgmr.msra.gmra.mxu1 %vm1279_vm2, %v4107_v59 }
 0x119   : > { %1938 = vmatpush.bf16.msra.mxu1 %v1387_v10  ;;  %1925 = vmatpush.bf16.msra.mxu0 %v1384_v14  ;;  %v1411_v10 = vand.u32 %v3323_v0, %v4072_v20 }
 0x11a   : > { %3470 = vmatmul.msk.bf16.vlgmr.msra.gmra.mxu2 %vm1279_vm2, %v4107_v59  ;;  %3471 = vmatmul.msk.bf16.vlgmr.msra.gmra.mxu3 %vm1279_vm2, %v4107_v59 }
 0x11b   : > { %1951 = vmatpush.bf16.msra.mxu2 %v1390_v8  ;;  %1964 = vmatpush.bf16.msra.mxu3 %v1393_v9  ;;  %v1417_v9 = vand.u32 %v3331_v63, %v4072_v20 }
 0x11d   : > { %1939 = vmatpush.bf16.msra.mxu1 %v3003_v23  ;;  %1926 = vmatpush.bf16.msra.mxu0 %v2999_v24 }
 0x11e   : > { %v4355_v1 = vpop.permute.xlu0 %628 }
 0x11f   : > { %1952 = vmatpush.bf16.msra.mxu2 %v3007_v21  ;;  %1965 = vmatpush.bf16.msra.mxu3 %v3011_v22  ;;  %v3575_v21 = vld [vmem:[%s4074_s4 + $0x1bc] sm:$0xf0]  ;;  %v3039_v22 = vor.u32 %v3576_v13, %v3038_v12 }
 0x120   : > { %v3031_v28 = vor.u32 %v3575_v21, %v3030_v19 }
 0x128   : > { %3472 = vmatmul.msk.bf16.vlgmr.msrb.gmra.mxu0 %vm1279_vm2, %v4107_v59  ;;  %3473 = vmatmul.msk.bf16.vlgmr.msrb.gmra.mxu1 %vm1279_vm2, %v4107_v59 }
 0x129   : > { %1990 = vmatpush.bf16.msrb.mxu1 %v1399_v39  ;;  %1977 = vmatpush.bf16.msrb.mxu0 %v1396_v43  ;;  %v3342_v39 = vld [vmem:[%s4074_s4 + $0x2f8] sm:$0xf]  ;;  %v3336_v43 = vld [vmem:[%s4074_s4 + $0x410] sm:$0x10] }
 0x12a   : > { %3474 = vmatmul.msk.bf16.vlgmr.msrb.gmra.mxu2 %vm1279_vm2, %v4107_v59  ;;  %3475 = vmatmul.msk.bf16.vlgmr.msrb.gmra.mxu3 %vm1279_vm2, %v4107_v59  ;;  %v3343_v48 = vor.u32 %v3650_v40, %v3342_v39 }
 0x12b   : > { %2003 = vmatpush.bf16.msrb.mxu2 %v1402_v37  ;;  %2016 = vmatpush.bf16.msrb.mxu3 %v1405_v38 }
 0x12c   : > { %v1426_v60 = vand.u32 %v3343_v48, %v4072_v20 }
 0x12d   : > { %1991 = vmatpush.bf16.msrb.mxu1 %v3019_v51  ;;  %1978 = vmatpush.bf16.msrb.mxu0 %v3015_v52 }
 0x12f   : > { %2004 = vmatpush.bf16.msrb.mxu2 %v3023_v49  ;;  %2017 = vmatpush.bf16.msrb.mxu3 %v3027_v50  ;;  %v3347_v49 = vor.u32 %v3614_v35, %v3344_v36  ;;  %v3339_v50 = vor.u32 %v3613_v42, %v3336_v43  ;;  %v3651_v35 = vld [vmem:[%s4074_s4 + $0x41c] sm:$0x10] }
 0x131   : > { %v1429_v0 = vand.u32 %v3347_v49, %v4072_v20  ;;  %v1423_v2 = vand.u32 %v3339_v50, %v4072_v20  ;;  %v3544_v50 = vld [vmem:[%s4074_s4 + $0xcc] sm:$0xf] }
 0x135   : > { %v1512_v3 = vpop.f32.mrf.mxu0  ;;  %v1525_v4 = vpop.f32.mrf.mxu1 }
 0x136   : > { %v1513_v5 = vadd.f32 %v1512_v3, %v4355_v1  ;;  %v1526_v8 = vadd.f32 %v1525_v4, %v4355_v1  ;;  %v3054_v3 = vld [vmem:[%s4074_s4 + $0xb8] sm:$0xf] }
 0x137   : > { %v3578_v4 = vld [vmem:[%s4074_s4 + $0x1d4] sm:$0xf0] }
 0x138   : > { %3476 = vmatmul.msk.bf16.vlgmr.msra.gmra.mxu0 %vm1279_vm2, %v4107_v59  ;;  %v2439_v14 = vmax.f32 %v1513_v5, 0.0  ;;  %3477 = vmatmul.msk.bf16.vlgmr.msra.gmra.mxu1 %vm1279_vm2, %v4107_v59  ;;  %v2440_v18 = vmax.f32 %v1526_v8, 0.0  ;;  %v3048_v8 = vld [vmem:[%s4074_s4 + $0x1d0] sm:$0xf0]  ;;  %v3055_v12 = vor.u32 %v3578_v4, %v3054_v3 }
 0x139   : > { %2042 = vmatpush.bf16.msra.mxu1 %v1411_v10  ;;  %2029 = vmatpush.bf16.msra.mxu0 %v1408_v15  ;;  %v3046_v10 = vld [vmem:[%s4074_s4 + $0xb0] sm:$0xf]  ;;  %v3059_v15 = vor.u32 %v3542_v61, %v3056_v62  ;;  %v3051_v16 = vor.u32 %v3541_v7, %v3048_v8  ;;  %v3543_v61 = vld [vmem:[%s4074_s4 + $0xc4] sm:$0xf] }
 0x13a   : > { %3478 = vmatmul.msk.bf16.vlgmr.msra.gmra.mxu2 %vm1279_vm2, %v4107_v59  ;;  %3479 = vmatmul.msk.bf16.vlgmr.msra.gmra.mxu3 %vm1279_vm2, %v4107_v59  ;;  %v2511_v23 = vmin.f32 %v2439_v14, 6.0  ;;  %v2512_v24 = vmin.f32 %v2440_v18, 6.0  ;;  %v3047_v18 = vor.u32 %v3577_v11, %v3046_v10  ;;  %v3064_v62 = vld [vmem:[%s4074_s4 + $0x1e0] sm:$0xf0] }
 0x13b   : > { %2055 = vmatpush.bf16.msra.mxu2 %v1414_v6  ;;  %2068 = vmatpush.bf16.msra.mxu3 %v1417_v9  ;;  %v1420_v6 = vand.u32 %v3335_v53, %v4072_v20  ;;  %v3067_v7 = vor.u32 %v3543_v61, %v3064_v62 }
 0x13c   : > { %v2655_v29 = vrot.slane %v2512_v24, 4 }
 0x13d   : > { %v1538_v27 = vpop.f32.mrf.mxu2  ;;  %v1551_v31 = vpop.f32.mrf.mxu3  ;;  %2043 = vmatpush.bf16.msra.mxu1 %v3035_v26  ;;  %2030 = vmatpush.bf16.msra.mxu0 %v3031_v28  ;;  %v3360_v26 = vld [vmem:[%s4074_s4 + $0x428] sm:$0x10] }
 0x13e   : > { %v1539_v30 = vadd.f32 %v1538_v27, %v4355_v1  ;;  %v1514_v32 = vpop.f32.mrf.mxu0  ;;  %v1552_v33 = vadd.f32 %v1551_v31, %v4355_v1  ;;  %v1527_v34 = vpop.f32.mrf.mxu1  ;;  %v2691_v37 = vsel %vm1283_vm0, %v2511_v23, %v2655_v29  ;;  %v3358_v29 = vld [vmem:[%s4074_s4 + $0x308] sm:$0xf] }
 0x13f   : > { %2056 = vmatpush.bf16.msra.mxu2 %v3039_v22  ;;  %2069 = vmatpush.bf16.msra.mxu3 %v3043_v25  ;;  %2763 = vst [vmem:[%s4385_s11] sm:$0xff] %v2691_v37  ;;  %v3616_v25 = vld [vmem:[%s4074_s4 + $0x30c] sm:$0xf]  ;;  %v3615_v32 = vld [vmem:[%s4074_s4 + $0x304] sm:$0xf]  ;;  %v3350_v34 = vld [vmem:[%s4074_s4 + $0x300] sm:$0xf] }
 0x140   : > { %v2441_v38 = vmax.f32 %v1539_v30, 0.0  ;;  %v2442_v41 = vmax.f32 %v1552_v33, 0.0  ;;  %v3652_v30 = vld [vmem:[%s4074_s4 + $0x424] sm:$0x10]  ;;  %v3352_v33 = vld [vmem:[%s4074_s4 + $0x420] sm:$0x10]  ;;  %v3363_v39 = vor.u32 %v3616_v25, %v3360_v26  ;;  %v3351_v43 = vor.u32 %v3651_v35, %v3350_v34 }
 0x141   : > { %v3355_v40 = vor.u32 %v3615_v32, %v3352_v33  ;;  %v3366_v25 = vld [vmem:[%s4074_s4 + $0x310] sm:$0xf] }
 0x142   : > { %v2513_v46 = vmin.f32 %v2441_v38, 6.0  ;;  %v2514_v47 = vmin.f32 %v2442_v41, 6.0  ;;  %v3359_v38 = vor.u32 %v3652_v30, %v3358_v29  ;;  %v1441_v53 = vand.u32 %v3363_v39, %v4072_v20  ;;  %v3653_v26 = vld [vmem:[%s4074_s4 + $0x42c] sm:$0x10] }
 0x143   : > { %v3367_v34 = vor.u32 %v3653_v26, %v3366_v25 }
 0x144   : > { %v2656_v51 = vrot.slane %v2514_v47, 4  ;;  %v1438_v49 = vand.u32 %v3359_v38, %v4072_v20 }
 0x145   : > { %v1540_v52 = vpop.f32.mrf.mxu2  ;;  %v1553_v54 = vpop.f32.mrf.mxu3 }
 0x146   : > { %v1564_v55 = vpop.f32.mrf.mxu0  ;;  %v2692_v56 = vsel %vm1283_vm0, %v2513_v46, %v2656_v51  ;;  %v1577_v58 = vpop.f32.mrf.mxu1  ;;  %v3072_v51 = vld [vmem:[%s4074_s4 + $0x1e8] sm:$0xf0]  ;;  %v1435_v54 = vand.u32 %v3355_v40, %v4072_v20 }
 0x147   : > { %v1565_v57 = vadd.f32 %v1564_v55, %v4355_v1  ;;  %2764 = vst [vmem:[%s4385_s11 + $0x8] sm:$0xff] %v2692_v56  ;;  %v1578_v63 = vadd.f32 %v1577_v58, %v4355_v1  ;;  %v3070_v55 = vld [vmem:[%s4074_s4 + $0xc8] sm:$0xf]  ;;  %v4449_v58 = vld [vmem:[%s4756_s0] sm:$0x3] }
 0x148   : > { %3480 = vmatmul.msk.bf16.vlgmr.msrb.gmra.mxu0 %vm1279_vm2, %v4107_v59  ;;  %3481 = vmatmul.msk.bf16.vlgmr.msrb.gmra.mxu1 %vm1279_vm2, %v4107_v59  ;;  %v3580_v56 = vld [vmem:[%s4074_s4 + $0x1e4] sm:$0xf0] }
 0x149   : > { %v2443_v5 = vmax.f32 %v1565_v57, 0.0  ;;  %v2444_v9 = vmax.f32 %v1578_v63, 0.0  ;;  %2094 = vmatpush.bf16.msrb.mxu1 %v1423_v2  ;;  %2081 = vmatpush.bf16.msrb.mxu0 %v1420_v6  ;;  %v3579_v2 = vld [vmem:[%s4074_s4 + $0x1dc] sm:$0xf0]  ;;  %v3071_v3 = vor.u32 %v3580_v56, %v3070_v55  ;;  %v3075_v6 = vor.u32 %v3544_v50, %v3072_v51  ;;  %v3545_v50 = vld [vmem:[%s4074_s4 + $0xd4] sm:$0xf] }
 0x14a   : > { %3482 = vmatmul.msk.bf16.vlgmr.msrb.gmra.mxu2 %vm1279_vm2, %v4107_v59  ;;  %3483 = vmatmul.msk.bf16.vlgmr.msrb.gmra.mxu3 %vm1279_vm2, %v4107_v59  ;;  %v3080_v51 = vld [vmem:[%s4074_s4 + $0x1f0] sm:$0xf0] }
 0x14b   : > { %2107 = vmatpush.bf16.msrb.mxu2 %v1426_v60  ;;  %v2515_v13 = vmin.f32 %v2443_v5, 6.0  ;;  %v2516_v14 = vmin.f32 %v2444_v9, 6.0  ;;  %2120 = vmatpush.bf16.msrb.mxu3 %v1429_v0  ;;  %v1432_v60 = vand.u32 %v3351_v43, %v4072_v20  ;;  %v3062_v0 = vld [vmem:[%s4074_s4 + $0xc0] sm:$0xf]  ;;  %v3083_v61 = vor.u32 %v3545_v50, %v3080_v51 }
 0x14c   : > { %v3063_v9 = vor.u32 %v3579_v2, %v3062_v0 }
 0x14d   : > { %v1590_v17 = vpop.f32.mrf.mxu2  ;;  %v2657_v19 = vrot.slane %v2516_v14, 4  ;;  %v1603_v59 = vpop.f32.mrf.mxu3  ;;  %2095 = vmatpush.bf16.msrb.mxu1 %v3051_v16  ;;  %2082 = vmatpush.bf16.msrb.mxu0 %v3047_v18  ;;  %v3618_v16 = vld [vmem:[%s4074_s4 + $0x31c] sm:$0xf] }
 0x14e   : > { %v1591_v21 = vadd.f32 %v1590_v17, %v4355_v1  ;;  %v1566_v22 = vpop.f32.mrf.mxu0  ;;  %v1604_v23 = vadd.f32 %v1603_v59, %v4355_v1  ;;  %v1579_v24 = vpop.f32.mrf.mxu1  ;;  %v3376_v17 = vld [vmem:[%s4074_s4 + $0x438] sm:$0x10]  ;;  %v3654_v59 = vld [vmem:[%s4074_s4 + $0x434] sm:$0x10] }
 0x14f   : > { %2108 = vmatpush.bf16.msrb.mxu2 %v3055_v12  ;;  %v2693_v27 = vsel %vm1283_vm0, %v2515_v13, %v2657_v19  ;;  %2121 = vmatpush.bf16.msrb.mxu3 %v3059_v15  ;;  %v3368_v24 = vld [vmem:[%s4074_s4 + $0x430] sm:$0x10]  ;;  %v3379_v30 = vor.u32 %v3618_v16, %v3376_v17  ;;  %v3382_v16 = vld [vmem:[%s4074_s4 + $0x320] sm:$0xf] }
 0x150   : > { %v2445_v28 = vmax.f32 %v1591_v21, 0.0  ;;  %2765 = vst [vmem:[%s4385_s11 + $0x10] sm:$0xff] %v2693_v27  ;;  %v2446_v31 = vmax.f32 %v1604_v23, 0.0  ;;  %v3374_v21 = vld [vmem:[%s4074_s4 + $0x318] sm:$0xf] }
 0x151   : > { %v3617_v23 = vld [vmem:[%s4074_s4 + $0x314] sm:$0xf]  ;;  %v3375_v29 = vor.u32 %v3654_v59, %v3374_v21  ;;  %v3655_v17 = vld [vmem:[%s4074_s4 + $0x43c] sm:$0x10] }
 0x152   : > { %v2517_v36 = vmin.f32 %v2445_v28, 6.0  ;;  %v2518_v37 = vmin.f32 %v2446_v31, 6.0  ;;  %v3371_v31 = vor.u32 %v3617_v23, %v3368_v24  ;;  %v3383_v25 = vor.u32 %v3655_v17, %v3382_v16 }
 0x153   : > { %v1450_v40 = vand.u32 %v3375_v29, %v4072_v20 }
 0x154   : > { %v2658_v41 = vrot.slane %v2518_v37, 4 }
 0x155   : > { %v1592_v42 = vpop.f32.mrf.mxu2  ;;  %v1605_v44 = vpop.f32.mrf.mxu3 }
 0x156   : > { %v1616_v45 = vpop.f32.mrf.mxu0  ;;  %v2694_v46 = vsel %vm1283_vm0, %v2517_v36, %v2658_v41  ;;  %v1629_v48 = vpop.f32.mrf.mxu1  ;;  %v3546_v41 = vld [vmem:[%s4074_s4 + $0xdc] sm:$0xf]  ;;  %v1453_v44 = vand.u32 %v3379_v30, %v4072_v20 }
 0x157   : > { %v1617_v47 = vadd.f32 %v1616_v45, %v4355_v1  ;;  %2766 = vst [vmem:[%s4385_s11 + $0x18] sm:$0xff] %v2694_v46  ;;  %v1630_v52 = vadd.f32 %v1629_v48, %v4355_v1  ;;  %v3088_v42 = vld [vmem:[%s4074_s4 + $0x1f8] sm:$0xf0]  ;;  %v1447_v45 = vand.u32 %v3371_v31, %v4072_v20  ;;  %v3086_v46 = vld [vmem:[%s4074_s4 + $0xd8] sm:$0xf] }
 0x158   : > { %3484 = vmatmul.msk.bf16.vlgmr.msra.gmra.mxu0 %vm1279_vm2, %v4449_v58  ;;  %3485 = vmatmul.msk.bf16.vlgmr.msra.gmra.mxu1 %vm1279_vm2, %v4449_v58 }
 0x159   : > { %v2447_v57 = vmax.f32 %v1617_v47, 0.0  ;;  %v2448_v63 = vmax.f32 %v1630_v52, 0.0  ;;  %2146 = vmatpush.bf16.msra.mxu1 %v1435_v54  ;;  %2133 = vmatpush.bf16.msra.mxu0 %v1432_v60  ;;  %v3582_v47 = vld [vmem:[%s4074_s4 + $0x1f4] sm:$0xf0]  ;;  %v3581_v54 = vld [vmem:[%s4074_s4 + $0x1ec] sm:$0xf0]  ;;  %v3091_v60 = vor.u32 %v3546_v41, %v3088_v42 }
 0x15a   : > { %3486 = vmatmul.msk.bf16.vlgmr.msra.gmra.mxu2 %vm1279_vm2, %v4449_v58  ;;  %3487 = vmatmul.msk.bf16.vlgmr.msra.gmra.mxu3 %vm1279_vm2, %v4449_v58  ;;  %v3087_v55 = vor.u32 %v3582_v47, %v3086_v46  ;;  %v3547_v41 = vld [vmem:[%s4074_s4 + $0xe4] sm:$0xf] }
 0x15b   : > { %2159 = vmatpush.bf16.msra.mxu2 %v1438_v49  ;;  %v2519_v4 = vmin.f32 %v2447_v57, 6.0  ;;  %v2520_v5 = vmin.f32 %v2448_v63, 6.0  ;;  %2172 = vmatpush.bf16.msra.mxu3 %v1441_v53  ;;  %v1444_v49 = vand.u32 %v3367_v34, %v4072_v20  ;;  %v3078_v53 = vld [vmem:[%s4074_s4 + $0xd0] sm:$0xf]  ;;  %v3096_v42 = vld [vmem:[%s4074_s4 + $0x200] sm:$0xf0] }
 0x15c   : > { %v3079_v63 = vor.u32 %v3581_v54, %v3078_v53  ;;  %v3099_v50 = vor.u32 %v3547_v41, %v3096_v42 }
 0x15d   : > { %v1642_v8 = vpop.f32.mrf.mxu2  ;;  %v2659_v10 = vrot.slane %v2520_v5, 4  ;;  %v1655_v12 = vpop.f32.mrf.mxu3  ;;  %2147 = vmatpush.bf16.msra.mxu1 %v3067_v7  ;;  %2134 = vmatpush.bf16.msra.mxu0 %v3063_v9  ;;  %v3620_v7 = vld [vmem:[%s4074_s4 + $0x32c] sm:$0xf] }
 0x15e   : > { %v1643_v11 = vadd.f32 %v1642_v8, %v4355_v1  ;;  %v1618_v13 = vpop.f32.mrf.mxu0  ;;  %v1656_v14 = vadd.f32 %v1655_v12, %v4355_v1  ;;  %v1631_v15 = vpop.f32.mrf.mxu1  ;;  %v3392_v8 = vld [vmem:[%s4074_s4 + $0x448] sm:$0x10]  ;;  %v3656_v12 = vld [vmem:[%s4074_s4 + $0x444] sm:$0x10] }
 0x15f   : > { %2160 = vmatpush.bf16.msra.mxu2 %v3071_v3  ;;  %v2695_v18 = vsel %vm1283_vm0, %v2519_v4, %v2659_v10  ;;  %2173 = vmatpush.bf16.msra.mxu3 %v3075_v6  ;;  %v3384_v15 = vld [vmem:[%s4074_s4 + $0x440] sm:$0x10]  ;;  %v3395_v59 = vor.u32 %v3620_v7, %v3392_v8  ;;  %v3398_v7 = vld [vmem:[%s4074_s4 + $0x330] sm:$0xf] }
 0x160   : > { %v2449_v19 = vmax.f32 %v1643_v11, 0.0  ;;  %2767 = vst [vmem:[%s4385_s11 + $0x20] sm:$0xff] %v2695_v18  ;;  %v2450_v22 = vmax.f32 %v1656_v14, 0.0  ;;  %v3390_v11 = vld [vmem:[%s4074_s4 + $0x328] sm:$0xf] }
 0x161   : > { %v3619_v14 = vld [vmem:[%s4074_s4 + $0x324] sm:$0xf]  ;;  %v3391_v21 = vor.u32 %v3656_v12, %v3390_v11  ;;  %v3657_v8 = vld [vmem:[%s4074_s4 + $0x44c] sm:$0x10] }
 0x162   : > { %v2521_v27 = vmin.f32 %v2449_v19, 6.0  ;;  %v2522_v28 = vmin.f32 %v2450_v22, 6.0  ;;  %v3387_v22 = vor.u32 %v3619_v14, %v3384_v15  ;;  %v3399_v16 = vor.u32 %v3657_v8, %v3398_v7 }
 0x163   : > { %v1462_v31 = vand.u32 %v3391_v21, %v4072_v20 }
 0x164   : > { %v2660_v32 = vrot.slane %v2522_v28, 4 }
 0x165   : > { %v1644_v33 = vpop.f32.mrf.mxu2  ;;  %v1657_v35 = vpop.f32.mrf.mxu3 }
 0x166   : > { %v1668_v36 = vpop.f32.mrf.mxu0  ;;  %v2696_v37 = vsel %vm1283_vm0, %v2521_v27, %v2660_v32  ;;  %v1681_v39 = vpop.f32.mrf.mxu1  ;;  %v3548_v32 = vld [vmem:[%s4074_s4 + $0xec] sm:$0xf]  ;;  %v1465_v35 = vand.u32 %v3395_v59, %v4072_v20 }
 0x167   : > { %v1669_v38 = vadd.f32 %v1668_v36, %v4355_v1  ;;  %2768 = vst [vmem:[%s4385_s11 + $0x28] sm:$0xff] %v2696_v37  ;;  %v1682_v43 = vadd.f32 %v1681_v39, %v4355_v1  ;;  %v3104_v33 = vld [vmem:[%s4074_s4 + $0x208] sm:$0xf0]  ;;  %v1459_v36 = vand.u32 %v3387_v22, %v4072_v20  ;;  %v3102_v37 = vld [vmem:[%s4074_s4 + $0xe8] sm:$0xf] }
 0x168   : > { %3488 = vmatmul.msk.bf16.vlgmr.msrb.gmra.mxu0 %vm1279_vm2, %v4449_v58  ;;  %3489 = vmatmul.msk.bf16.vlgmr.msrb.gmra.mxu1 %vm1279_vm2, %v4449_v58 }
 0x169   : > { %v2451_v48 = vmax.f32 %v1669_v38, 0.0  ;;  %v2452_v52 = vmax.f32 %v1682_v43, 0.0  ;;  %2198 = vmatpush.bf16.msrb.mxu1 %v1447_v45  ;;  %2185 = vmatpush.bf16.msrb.mxu0 %v1444_v49  ;;  %v3584_v38 = vld [vmem:[%s4074_s4 + $0x204] sm:$0xf0]  ;;  %v3583_v45 = vld [vmem:[%s4074_s4 + $0x1fc] sm:$0xf0]  ;;  %v3107_v49 = vor.u32 %v3548_v32, %v3104_v33 }
 0x16a   : > { %3490 = vmatmul.msk.bf16.vlgmr.msrb.gmra.mxu2 %vm1279_vm2, %v4449_v58  ;;  %3491 = vmatmul.msk.bf16.vlgmr.msrb.gmra.mxu3 %vm1279_vm2, %v4449_v58  ;;  %v3103_v46 = vor.u32 %v3584_v38, %v3102_v37  ;;  %v3549_v32 = vld [vmem:[%s4074_s4 + $0xf4] sm:$0xf] }
 0x16b   : > { %2211 = vmatpush.bf16.msrb.mxu2 %v1450_v40  ;;  %v2523_v56 = vmin.f32 %v2451_v48, 6.0  ;;  %v2524_v57 = vmin.f32 %v2452_v52, 6.0  ;;  %2224 = vmatpush.bf16.msrb.mxu3 %v1453_v44  ;;  %v1456_v40 = vand.u32 %v3383_v25, %v4072_v20  ;;  %v3094_v44 = vld [vmem:[%s4074_s4 + $0xe0] sm:$0xf]  ;;  %v3112_v33 = vld [vmem:[%s4074_s4 + $0x210] sm:$0xf0] }
 0x16c   : > { %v3095_v52 = vor.u32 %v3583_v45, %v3094_v44  ;;  %v3115_v41 = vor.u32 %v3549_v32, %v3112_v33 }
 0x16d   : > { %v1694_v62 = vpop.f32.mrf.mxu2  ;;  %v2661_v0 = vrot.slane %v2524_v57, 4  ;;  %v1707_v3 = vpop.f32.mrf.mxu3  ;;  %2199 = vmatpush.bf16.msrb.mxu1 %v3083_v61  ;;  %2186 = vmatpush.bf16.msrb.mxu0 %v3079_v63  ;;  %v3622_v61 = vld [vmem:[%s4074_s4 + $0x33c] sm:$0xf] }
 0x16e   : > { %v1695_v2 = vadd.f32 %v1694_v62, %v4355_v1  ;;  %v1670_v4 = vpop.f32.mrf.mxu0  ;;  %v1708_v5 = vadd.f32 %v1707_v3, %v4355_v1  ;;  %v1683_v6 = vpop.f32.mrf.mxu1  ;;  %v3408_v62 = vld [vmem:[%s4074_s4 + $0x458] sm:$0x10]  ;;  %v3658_v3 = vld [vmem:[%s4074_s4 + $0x454] sm:$0x10] }
 0x16f   : > { %2212 = vmatpush.bf16.msrb.mxu2 %v3087_v55  ;;  %v2697_v9 = vsel %vm1283_vm0, %v2523_v56, %v2661_v0  ;;  %2225 = vmatpush.bf16.msrb.mxu3 %v3091_v60  ;;  %v3400_v6 = vld [vmem:[%s4074_s4 + $0x450] sm:$0x10]  ;;  %v3411_v12 = vor.u32 %v3622_v61, %v3408_v62  ;;  %v3414_v61 = vld [vmem:[%s4074_s4 + $0x340] sm:$0xf] }
 0x170   : > { %v2453_v10 = vmax.f32 %v1695_v2, 0.0  ;;  %2769 = vst [vmem:[%s4385_s11 + $0x30] sm:$0xff] %v2697_v9  ;;  %v2454_v13 = vmax.f32 %v1708_v5, 0.0  ;;  %v3406_v2 = vld [vmem:[%s4074_s4 + $0x338] sm:$0xf] }
 0x171   : > { %v3621_v5 = vld [vmem:[%s4074_s4 + $0x334] sm:$0xf]  ;;  %v3407_v11 = vor.u32 %v3658_v3, %v3406_v2  ;;  %v3659_v62 = vld [vmem:[%s4074_s4 + $0x45c] sm:$0x10] }
 0x172   : > { %v2525_v18 = vmin.f32 %v2453_v10, 6.0  ;;  %v2526_v19 = vmin.f32 %v2454_v13, 6.0  ;;  %v3403_v13 = vor.u32 %v3621_v5, %v3400_v6  ;;  %v3415_v7 = vor.u32 %v3659_v62, %v3414_v61 }
 0x173   : > { %v1474_v22 = vand.u32 %v3407_v11, %v4072_v20 }
 0x174   : > { %v2662_v23 = vrot.slane %v2526_v19, 4 }
 0x175   : > { %v1696_v24 = vpop.f32.mrf.mxu2  ;;  %v1709_v26 = vpop.f32.mrf.mxu3 }
 0x176   : > { %v1720_v27 = vpop.f32.mrf.mxu0  ;;  %v2698_v28 = vsel %vm1283_vm0, %v2525_v18, %v2662_v23  ;;  %v1733_v30 = vpop.f32.mrf.mxu1  ;;  %v3550_v23 = vld [vmem:[%s4074_s4 + $0xfc] sm:$0xf]  ;;  %v1477_v26 = vand.u32 %v3411_v12, %v4072_v20 }
 0x177   : > { %v1721_v29 = vadd.f32 %v1720_v27, %v4355_v1  ;;  %2770 = vst [vmem:[%s4385_s11 + $0x38] sm:$0xff] %v2698_v28  ;;  %v1734_v34 = vadd.f32 %v1733_v30, %v4355_v1  ;;  %v3120_v24 = vld [vmem:[%s4074_s4 + $0x218] sm:$0xf0]  ;;  %v1471_v27 = vand.u32 %v3403_v13, %v4072_v20  ;;  %v3118_v28 = vld [vmem:[%s4074_s4 + $0xf8] sm:$0xf] }
 0x178   : > { %3492 = vmatmul.msk.bf16.vlgmr.msra.gmra.mxu0 %vm1279_vm2, %v4449_v58  ;;  %3493 = vmatmul.msk.bf16.vlgmr.msra.gmra.mxu1 %vm1279_vm2, %v4449_v58 }
 0x179   : > { %v2455_v39 = vmax.f32 %v1721_v29, 0.0  ;;  %v2456_v43 = vmax.f32 %v1734_v34, 0.0  ;;  %2250 = vmatpush.bf16.msra.mxu1 %v1459_v36  ;;  %2237 = vmatpush.bf16.msra.mxu0 %v1456_v40  ;;  %v3586_v29 = vld [vmem:[%s4074_s4 + $0x214] sm:$0xf0]  ;;  %v3585_v36 = vld [vmem:[%s4074_s4 + $0x20c] sm:$0xf0]  ;;  %v3123_v40 = vor.u32 %v3550_v23, %v3120_v24 }
 0x17a   : > { %3494 = vmatmul.msk.bf16.vlgmr.msra.gmra.mxu2 %vm1279_vm2, %v4449_v58  ;;  %3495 = vmatmul.msk.bf16.vlgmr.msra.gmra.mxu3 %vm1279_vm2, %v4449_v58  ;;  %v3119_v37 = vor.u32 %v3586_v29, %v3118_v28  ;;  %v3551_v23 = vld [vmem:[%s4074_s4 + $0x104] sm:$0xf] }
 0x17b   : > { %2263 = vmatpush.bf16.msra.mxu2 %v1462_v31  ;;  %v2527_v47 = vmin.f32 %v2455_v39, 6.0  ;;  %v2528_v48 = vmin.f32 %v2456_v43, 6.0  ;;  %2276 = vmatpush.bf16.msra.mxu3 %v1465_v35  ;;  %v1468_v31 = vand.u32 %v3399_v16, %v4072_v20  ;;  %v3110_v35 = vld [vmem:[%s4074_s4 + $0xf0] sm:$0xf]  ;;  %v3128_v24 = vld [vmem:[%s4074_s4 + $0x220] sm:$0xf0] }
 0x17c   : > { %v3111_v43 = vor.u32 %v3585_v36, %v3110_v35  ;;  %v3131_v32 = vor.u32 %v3551_v23, %v3128_v24 }
 0x17d   : > { %v1746_v51 = vpop.f32.mrf.mxu2  ;;  %v2663_v53 = vrot.slane %v2528_v48, 4  ;;  %v1759_v55 = vpop.f32.mrf.mxu3  ;;  %2251 = vmatpush.bf16.msra.mxu1 %v3099_v50  ;;  %2238 = vmatpush.bf16.msra.mxu0 %v3095_v52  ;;  %v3624_v50 = vld [vmem:[%s4074_s4 + $0x34c] sm:$0xf] }
 0x17e   : > { %v1747_v54 = vadd.f32 %v1746_v51, %v4355_v1  ;;  %v1722_v56 = vpop.f32.mrf.mxu0  ;;  %v1760_v57 = vadd.f32 %v1759_v55, %v4355_v1  ;;  %v1735_v60 = vpop.f32.mrf.mxu1  ;;  %v3424_v51 = vld [vmem:[%s4074_s4 + $0x468] sm:$0x10]  ;;  %v3660_v55 = vld [vmem:[%s4074_s4 + $0x464] sm:$0x10] }
 0x17f   : > { %2264 = vmatpush.bf16.msra.mxu2 %v3103_v46  ;;  %v2699_v63 = vsel %vm1283_vm0, %v2527_v47, %v2663_v53  ;;  %2277 = vmatpush.bf16.msra.mxu3 %v3107_v49  ;;  %v3416_v60 = vld [vmem:[%s4074_s4 + $0x460] sm:$0x10]  ;;  %v3427_v3 = vor.u32 %v3624_v50, %v3424_v51  ;;  %v3430_v50 = vld [vmem:[%s4074_s4 + $0x350] sm:$0xf] }
 0x180   : > { %v2457_v0 = vmax.f32 %v1747_v54, 0.0  ;;  %2771 = vst [vmem:[%s4385_s11 + $0x40] sm:$0xff] %v2699_v63  ;;  %v2458_v4 = vmax.f32 %v1760_v57, 0.0  ;;  %v3422_v54 = vld [vmem:[%s4074_s4 + $0x348] sm:$0xf] }
 0x181   : > { %v3623_v57 = vld [vmem:[%s4074_s4 + $0x344] sm:$0xf]  ;;  %v3423_v2 = vor.u32 %v3660_v55, %v3422_v54  ;;  %v3661_v51 = vld [vmem:[%s4074_s4 + $0x46c] sm:$0x10] }
 0x182   : > { %v2529_v9 = vmin.f32 %v2457_v0, 6.0  ;;  %v2530_v10 = vmin.f32 %v2458_v4, 6.0  ;;  %v3419_v4 = vor.u32 %v3623_v57, %v3416_v60  ;;  %v3431_v61 = vor.u32 %v3661_v51, %v3430_v50 }
 0x183   : > { %v1486_v13 = vand.u32 %v3423_v2, %v4072_v20 }
 0x184   : > { %v2664_v14 = vrot.slane %v2530_v10, 4 }
 0x185   : > { %v1748_v15 = vpop.f32.mrf.mxu2  ;;  %v1761_v17 = vpop.f32.mrf.mxu3 }
 0x186   : > { %v1772_v18 = vpop.f32.mrf.mxu0  ;;  %v2700_v19 = vsel %vm1283_vm0, %v2529_v9, %v2664_v14  ;;  %v1785_v59 = vpop.f32.mrf.mxu1  ;;  %v3552_v14 = vld [vmem:[%s4074_s4 + $0x10c] sm:$0xf]  ;;  %v1489_v17 = vand.u32 %v3427_v3, %v4072_v20 }
 0x187   : > { %v1773_v21 = vadd.f32 %v1772_v18, %v4355_v1  ;;  %2772 = vst [vmem:[%s4385_s11 + $0x48] sm:$0xff] %v2700_v19  ;;  %v1786_v25 = vadd.f32 %v1785_v59, %v4355_v1  ;;  %v3136_v15 = vld [vmem:[%s4074_s4 + $0x228] sm:$0xf0]  ;;  %v1483_v18 = vand.u32 %v3419_v4, %v4072_v20  ;;  %v3134_v19 = vld [vmem:[%s4074_s4 + $0x108] sm:$0xf] }
 0x188   : > { %3496 = vmatmul.msk.bf16.vlgmr.msrb.gmra.mxu0 %vm1279_vm2, %v4449_v58  ;;  %3497 = vmatmul.msk.bf16.vlgmr.msrb.gmra.mxu1 %vm1279_vm2, %v4449_v58 }
 0x189   : > { %v2459_v30 = vmax.f32 %v1773_v21, 0.0  ;;  %v2460_v34 = vmax.f32 %v1786_v25, 0.0  ;;  %2302 = vmatpush.bf16.msrb.mxu1 %v1471_v27  ;;  %2289 = vmatpush.bf16.msrb.mxu0 %v1468_v31  ;;  %v3588_v21 = vld [vmem:[%s4074_s4 + $0x224] sm:$0xf0]  ;;  %v3587_v27 = vld [vmem:[%s4074_s4 + $0x21c] sm:$0xf0]  ;;  %v3139_v31 = vor.u32 %v3552_v14, %v3136_v15 }
 0x18a   : > { %3498 = vmatmul.msk.bf16.vlgmr.msrb.gmra.mxu2 %vm1279_vm2, %v4449_v58  ;;  %3499 = vmatmul.msk.bf16.vlgmr.msrb.gmra.mxu3 %vm1279_vm2, %v4449_v58  ;;  %v3135_v28 = vor.u32 %v3588_v21, %v3134_v19  ;;  %v3553_v14 = vld [vmem:[%s4074_s4 + $0x114] sm:$0xf] }
 0x18b   : > { %2315 = vmatpush.bf16.msrb.mxu2 %v1474_v22  ;;  %v2531_v38 = vmin.f32 %v2459_v30, 6.0  ;;  %v2532_v39 = vmin.f32 %v2460_v34, 6.0  ;;  %2328 = vmatpush.bf16.msrb.mxu3 %v1477_v26  ;;  %v1480_v22 = vand.u32 %v3415_v7, %v4072_v20  ;;  %v3126_v26 = vld [vmem:[%s4074_s4 + $0x100] sm:$0xf]  ;;  %v3144_v15 = vld [vmem:[%s4074_s4 + $0x230] sm:$0xf0] }
 0x18c   : > { %v3127_v34 = vor.u32 %v3587_v27, %v3126_v26 }
 0x18d   : > { %v1798_v42 = vpop.f32.mrf.mxu2  ;;  %v2665_v44 = vrot.slane %v2532_v39, 4  ;;  %v1811_v46 = vpop.f32.mrf.mxu3  ;;  %2303 = vmatpush.bf16.msrb.mxu1 %v3115_v41  ;;  %2290 = vmatpush.bf16.msrb.mxu0 %v3111_v43  ;;  %v3626_v41 = vld [vmem:[%s4074_s4 + $0x35c] sm:$0xf] }
 0x18e   : > { %v1799_v45 = vadd.f32 %v1798_v42, %v4355_v1  ;;  %v1774_v47 = vpop.f32.mrf.mxu0  ;;  %v1812_v48 = vadd.f32 %v1811_v46, %v4355_v1  ;;  %v1787_v49 = vpop.f32.mrf.mxu1  ;;  %v3440_v42 = vld [vmem:[%s4074_s4 + $0x478] sm:$0x10]  ;;  %v3662_v46 = vld [vmem:[%s4074_s4 + $0x474] sm:$0x10] }
 0x18f   : > { %2316 = vmatpush.bf16.msrb.mxu2 %v3119_v37  ;;  %v2701_v52 = vsel %vm1283_vm0, %v2531_v38, %v2665_v44  ;;  %2329 = vmatpush.bf16.msrb.mxu3 %v3123_v40  ;;  %v3432_v49 = vld [vmem:[%s4074_s4 + $0x470] sm:$0x10]  ;;  %v3443_v55 = vor.u32 %v3626_v41, %v3440_v42 }
 0x190   : > { %v2461_v53 = vmax.f32 %v1799_v45, 0.0  ;;  %2773 = vst [vmem:[%s4385_s11 + $0x50] sm:$0xff] %v2701_v52  ;;  %v2462_v56 = vmax.f32 %v1812_v48, 0.0  ;;  %v3438_v45 = vld [vmem:[%s4074_s4 + $0x358] sm:$0xf] }
 0x191   : > { %v3625_v48 = vld [vmem:[%s4074_s4 + $0x354] sm:$0xf]  ;;  %v3439_v54 = vor.u32 %v3662_v46, %v3438_v45 }
 0x192   : > { %v2533_v63 = vmin.f32 %v2461_v53, 6.0  ;;  %v2534_v0 = vmin.f32 %v2462_v56, 6.0  ;;  %v3435_v56 = vor.u32 %v3625_v48, %v3432_v49 }
 0x193   : > { %v1498_v4 = vand.u32 %v3439_v54, %v4072_v20 }
 0x194   : > { %v2666_v5 = vrot.slane %v2534_v0, 4 }
 0x195   : > { %v1800_v6 = vpop.f32.mrf.mxu2  ;;  %v1813_v8 = vpop.f32.mrf.mxu3 }
 0x196   : > { %v1824_v9 = vpop.f32.mrf.mxu0  ;;  %v2702_v10 = vsel %vm1283_vm0, %v2533_v63, %v2666_v5  ;;  %v1837_v12 = vpop.f32.mrf.mxu1  ;;  %v3554_v5 = vld [vmem:[%s4074_s4 + $0x11c] sm:$0xf]  ;;  %v1501_v8 = vand.u32 %v3443_v55, %v4072_v20 }
 0x197   : > { %v1825_v11 = vadd.f32 %v1824_v9, %v4355_v1  ;;  %2774 = vst [vmem:[%s4385_s11 + $0x58] sm:$0xff] %v2702_v10  ;;  %v1838_v16 = vadd.f32 %v1837_v12, %v4355_v1  ;;  %v3152_v6 = vld [vmem:[%s4074_s4 + $0x238] sm:$0xf0]  ;;  %v1495_v9 = vand.u32 %v3435_v56, %v4072_v20  ;;  %v3150_v10 = vld [vmem:[%s4074_s4 + $0x118] sm:$0xf] }
 0x198   : > { %3500 = vmatmul.msk.bf16.vlgmr.msra.gmra.mxu0 %vm1279_vm2, %v4449_v58  ;;  %3501 = vmatmul.msk.bf16.vlgmr.msra.gmra.mxu1 %vm1279_vm2, %v4449_v58 }
 0x199   : > { %v2463_v59 = vmax.f32 %v1825_v11, 0.0  ;;  %v2464_v25 = vmax.f32 %v1838_v16, 0.0  ;;  %2354 = vmatpush.bf16.msra.mxu1 %v1483_v18  ;;  %2341 = vmatpush.bf16.msra.mxu0 %v1480_v22  ;;  %v3590_v11 = vld [vmem:[%s4074_s4 + $0x234] sm:$0xf0]  ;;  %v3589_v18 = vld [vmem:[%s4074_s4 + $0x22c] sm:$0xf0]  ;;  %v3147_v22 = vor.u32 %v3553_v14, %v3144_v15 }
 0x19a   : > { %3502 = vmatmul.msk.bf16.vlgmr.msra.gmra.mxu2 %vm1279_vm2, %v4449_v58  ;;  %3503 = vmatmul.msk.bf16.vlgmr.msra.gmra.mxu3 %vm1279_vm2, %v4449_v58  ;;  %v3151_v19 = vor.u32 %v3590_v11, %v3150_v10 }
 0x19b   : > { %2367 = vmatpush.bf16.msra.mxu2 %v1486_v13  ;;  %v2535_v29 = vmin.f32 %v2463_v59, 6.0  ;;  %v2536_v30 = vmin.f32 %v2464_v25, 6.0  ;;  %2380 = vmatpush.bf16.msra.mxu3 %v1489_v17  ;;  %v1492_v13 = vand.u32 %v3431_v61, %v4072_v20  ;;  %v3142_v17 = vld [vmem:[%s4074_s4 + $0x110] sm:$0xf]  ;;  %v3155_v20 = vor.u32 %v3554_v5, %v3152_v6 }
 0x19c   : > { %v3143_v24 = vor.u32 %v3589_v18, %v3142_v17 }
 0x19d   : > { %v1850_v33 = vpop.f32.mrf.mxu2  ;;  %v2667_v35 = vrot.slane %v2536_v30, 4  ;;  %v1863_v37 = vpop.f32.mrf.mxu3  ;;  %2355 = vmatpush.bf16.msra.mxu1 %v3131_v32  ;;  %2342 = vmatpush.bf16.msra.mxu0 %v3127_v34 }
 0x19e   : > { %v1851_v36 = vadd.f32 %v1850_v33, %v4355_v1  ;;  %v1826_v38 = vpop.f32.mrf.mxu0  ;;  %v1864_v39 = vadd.f32 %v1863_v37, %v4355_v1  ;;  %v1839_v40 = vpop.f32.mrf.mxu1 }
 0x19f   : > { %2368 = vmatpush.bf16.msra.mxu2 %v3135_v28  ;;  %v2703_v43 = vsel %vm1283_vm0, %v2535_v29, %v2667_v35  ;;  %2381 = vmatpush.bf16.msra.mxu3 %v3139_v31 }
 0x1a0   : > { %v2465_v44 = vmax.f32 %v1851_v36, 0.0  ;;  %2775 = vst [vmem:[%s4385_s11 + $0x60] sm:$0xff] %v2703_v43  ;;  %v2466_v47 = vmax.f32 %v1864_v39, 0.0 }
 0x1a2   : > { %v2537_v52 = vmin.f32 %v2465_v44, 6.0  ;;  %v2538_v53 = vmin.f32 %v2466_v47, 6.0 }
 0x1a4   : > { %v2668_v57 = vrot.slane %v2538_v53, 4 }
 0x1a5   : > { %v1852_v60 = vpop.f32.mrf.mxu2  ;;  %v1865_v62 = vpop.f32.mrf.mxu3 }
 0x1a6   : > { %v1876_v63 = vpop.f32.mrf.mxu0  ;;  %v2704_v0 = vsel %vm1283_vm0, %v2537_v52, %v2668_v57  ;;  %v1889_v3 = vpop.f32.mrf.mxu1 }
 0x1a7   : > { %v1877_v2 = vadd.f32 %v1876_v63, %v4355_v1  ;;  %2776 = vst [vmem:[%s4385_s11 + $0x68] sm:$0xff] %v2704_v0  ;;  %v1890_v7 = vadd.f32 %v1889_v3, %v4355_v1 }
 0x1a8   : > { %3504 = vmatmul.msk.bf16.vlgmr.msrb.gmra.mxu0 %vm1279_vm2, %v4449_v58  ;;  %3505 = vmatmul.msk.bf16.vlgmr.msrb.gmra.mxu1 %vm1279_vm2, %v4449_v58 }
 0x1a9   : > { %v2467_v12 = vmax.f32 %v1877_v2, 0.0  ;;  %v2468_v16 = vmax.f32 %v1890_v7, 0.0  ;;  %2406 = vmatpush.bf16.msrb.mxu1 %v1495_v9  ;;  %2393 = vmatpush.bf16.msrb.mxu0 %v1492_v13 }
 0x1aa   : > { %3506 = vmatmul.msk.bf16.vlgmr.msrb.gmra.mxu2 %vm1279_vm2, %v4449_v58  ;;  %3507 = vmatmul.msk.bf16.vlgmr.msrb.gmra.mxu3 %vm1279_vm2, %v4449_v58 }
 0x1ab   : > { %2419 = vmatpush.bf16.msrb.mxu2 %v1498_v4  ;;  %v2539_v21 = vmin.f32 %v2467_v12, 6.0  ;;  %v2540_v59 = vmin.f32 %v2468_v16, 6.0  ;;  %2432 = vmatpush.bf16.msrb.mxu3 %v1501_v8 }
 0x1ad   : > { %v1902_v23 = vpop.f32.mrf.mxu2  ;;  %v2669_v25 = vrot.slane %v2540_v59, 4  ;;  %v1915_v27 = vpop.f32.mrf.mxu3  ;;  %2407 = vmatpush.bf16.msrb.mxu1 %v3147_v22  ;;  %2394 = vmatpush.bf16.msrb.mxu0 %v3143_v24 }
 0x1ae   : > { %v1903_v26 = vadd.f32 %v1902_v23, %v4355_v1  ;;  %v1878_v28 = vpop.f32.mrf.mxu0  ;;  %v1916_v29 = vadd.f32 %v1915_v27, %v4355_v1  ;;  %v1891_v30 = vpop.f32.mrf.mxu1 }
 0x1af   : > { %2420 = vmatpush.bf16.msrb.mxu2 %v3151_v19  ;;  %v2705_v31 = vsel %vm1283_vm0, %v2539_v21, %v2669_v25  ;;  %2433 = vmatpush.bf16.msrb.mxu3 %v3155_v20 }
 0x1b0   : > { %v2469_v32 = vmax.f32 %v1903_v26, 0.0  ;;  %2777 = vst [vmem:[%s4385_s11 + $0x70] sm:$0xff] %v2705_v31  ;;  %v2470_v33 = vmax.f32 %v1916_v29, 0.0 }
 0x1b2   : > { %v2541_v34 = vmin.f32 %v2469_v32, 6.0  ;;  %v2542_v35 = vmin.f32 %v2470_v33, 6.0 }
 0x1b4   : > { %v2670_v36 = vrot.slane %v2542_v35, 4 }
 0x1b5   : > { %v1904_v37 = vpop.f32.mrf.mxu2  ;;  %v1917_v38 = vpop.f32.mrf.mxu3 }
 0x1b6   : > { %v1928_v39 = vpop.f32.mrf.mxu0  ;;  %v2706_v40 = vsel %vm1283_vm0, %v2541_v34, %v2670_v36  ;;  %v1941_v42 = vpop.f32.mrf.mxu1 }
 0x1b7   : > { %v1929_v41 = vadd.f32 %v1928_v39, %v4355_v1  ;;  %2778 = vst [vmem:[%s4385_s11 + $0x78] sm:$0xff] %v2706_v40  ;;  %v1942_v43 = vadd.f32 %v1941_v42, %v4355_v1 }
 0x1b8   : > { %3508 = vmatmul.msk.bf16.vlgmr.msra.gmra.mxu0 %vm1279_vm2, %v4449_v58  ;;  %3509 = vmatmul.msk.bf16.vlgmr.msra.gmra.mxu1 %vm1279_vm2, %v4449_v58 }
 0x1b9   : > { %v2471_v44 = vmax.f32 %v1929_v41, 0.0  ;;  %v2472_v45 = vmax.f32 %v1942_v43, 0.0 }
 0x1ba   : > { %3510 = vmatmul.msk.bf16.vlgmr.msra.gmra.mxu2 %vm1279_vm2, %v4449_v58  ;;  %3511 = vmatmul.msk.bf16.vlgmr.msra.gmra.mxu3 %vm1279_vm2, %v4449_v58 }
 0x1bb   : > { %v2543_v46 = vmin.f32 %v2471_v44, 6.0  ;;  %v2544_v47 = vmin.f32 %v2472_v45, 6.0 }
 0x1bd   : > { %v1954_v48 = vpop.f32.mrf.mxu2  ;;  %v2671_v49 = vrot.slane %v2544_v47, 4  ;;  %v1967_v51 = vpop.f32.mrf.mxu3 }
 0x1be   : > { %v1955_v50 = vadd.f32 %v1954_v48, %v4355_v1  ;;  %v1930_v52 = vpop.f32.mrf.mxu0  ;;  %v1968_v53 = vadd.f32 %v1967_v51, %v4355_v1  ;;  %v1943_v54 = vpop.f32.mrf.mxu1 }
 0x1bf   : > { %v2707_v55 = vsel %vm1283_vm0, %v2543_v46, %v2671_v49 }
 0x1c0   : > { %v2473_v56 = vmax.f32 %v1955_v50, 0.0  ;;  %2779 = vst [vmem:[%s4385_s11 + $0x80] sm:$0xff] %v2707_v55  ;;  %v2474_v57 = vmax.f32 %v1968_v53, 0.0 }
 0x1c2   : > { %v2545_v60 = vmin.f32 %v2473_v56, 6.0  ;;  %v2546_v61 = vmin.f32 %v2474_v57, 6.0 }
 0x1c4   : > { %v2672_v62 = vrot.slane %v2546_v61, 4 }
 0x1c5   : > { %v1956_v63 = vpop.f32.mrf.mxu2  ;;  %v1969_v0 = vpop.f32.mrf.mxu3 }
 0x1c6   : > { %v1980_v2 = vpop.f32.mrf.mxu0  ;;  %v2708_v3 = vsel %vm1283_vm0, %v2545_v60, %v2672_v62  ;;  %v1993_v5 = vpop.f32.mrf.mxu1 }
 0x1c7   : > { %v1981_v4 = vadd.f32 %v1980_v2, %v4355_v1  ;;  %2780 = vst [vmem:[%s4385_s11 + $0x88] sm:$0xff] %v2708_v3  ;;  %v1994_v6 = vadd.f32 %v1993_v5, %v4355_v1 }
 0x1c8   : > { %3512 = vmatmul.msk.bf16.vlgmr.msrb.gmra.mxu0 %vm1279_vm2, %v4449_v58  ;;  %3513 = vmatmul.msk.bf16.vlgmr.msrb.gmra.mxu1 %vm1279_vm2, %v4449_v58 }
 0x1c9   : > { %v2475_v7 = vmax.f32 %v1981_v4, 0.0  ;;  %v2476_v8 = vmax.f32 %v1994_v6, 0.0 }
 0x1ca   : > { %3514 = vmatmul.msk.bf16.vlgmr.msrb.gmra.mxu2 %vm1279_vm2, %v4449_v58  ;;  %3515 = vmatmul.msk.bf16.vlgmr.msrb.gmra.mxu3 %vm1279_vm2, %v4449_v58 }
 0x1cb   : > { %v2547_v9 = vmin.f32 %v2475_v7, 6.0  ;;  %v2548_v10 = vmin.f32 %v2476_v8, 6.0 }
 0x1cd   : > { %v2006_v11 = vpop.f32.mrf.mxu2  ;;  %v2673_v12 = vrot.slane %v2548_v10, 4  ;;  %v2019_v14 = vpop.f32.mrf.mxu3 }
 0x1ce   : > { %v2007_v13 = vadd.f32 %v2006_v11, %v4355_v1  ;;  %v1982_v15 = vpop.f32.mrf.mxu0  ;;  %v2020_v16 = vadd.f32 %v2019_v14, %v4355_v1  ;;  %v1995_v17 = vpop.f32.mrf.mxu1 }
 0x1cf   : > { %v2709_v18 = vsel %vm1283_vm0, %v2547_v9, %v2673_v12 }
 0x1d0   : > { %v2477_v19 = vmax.f32 %v2007_v13, 0.0  ;;  %2781 = vst [vmem:[%s4385_s11 + $0x90] sm:$0xff] %v2709_v18  ;;  %v2478_v21 = vmax.f32 %v2020_v16, 0.0 }
 0x1d2   : > { %v2549_v59 = vmin.f32 %v2477_v19, 6.0  ;;  %v2550_v20 = vmin.f32 %v2478_v21, 6.0 }
 0x1d4   : > { %v2674_v58 = vrot.slane %v2550_v20, 4 }
 0x1d5   : > { %v2008_v22 = vpop.f32.mrf.mxu2  ;;  %v2021_v23 = vpop.f32.mrf.mxu3 }
 0x1d6   : > { %v2032_v24 = vpop.f32.mrf.mxu0  ;;  %v2710_v25 = vsel %vm1283_vm0, %v2549_v59, %v2674_v58  ;;  %v2045_v27 = vpop.f32.mrf.mxu1 }
 0x1d7   : > { %v2033_v26 = vadd.f32 %v2032_v24, %v4355_v1  ;;  %2782 = vst [vmem:[%s4385_s11 + $0x98] sm:$0xff] %v2710_v25  ;;  %v2046_v28 = vadd.f32 %v2045_v27, %v4355_v1 }
 0x1d9   : > { %v2479_v29 = vmax.f32 %v2033_v26, 0.0  ;;  %v2480_v30 = vmax.f32 %v2046_v28, 0.0 }
 0x1db   : > { %v2551_v31 = vmin.f32 %v2479_v29, 6.0  ;;  %v2552_v32 = vmin.f32 %v2480_v30, 6.0 }
 0x1dd   : > { %v2058_v33 = vpop.f32.mrf.mxu2  ;;  %v2675_v34 = vrot.slane %v2552_v32, 4  ;;  %v2071_v36 = vpop.f32.mrf.mxu3 }
 0x1de   : > { %v2059_v35 = vadd.f32 %v2058_v33, %v4355_v1  ;;  %v2034_v37 = vpop.f32.mrf.mxu0  ;;  %v2072_v38 = vadd.f32 %v2071_v36, %v4355_v1  ;;  %v2047_v39 = vpop.f32.mrf.mxu1 }
 0x1df   : > { %v2711_v40 = vsel %vm1283_vm0, %v2551_v31, %v2675_v34 }
 0x1e0   : > { %v2481_v41 = vmax.f32 %v2059_v35, 0.0  ;;  %2783 = vst [vmem:[%s4385_s11 + $0xa0] sm:$0xff] %v2711_v40  ;;  %v2482_v42 = vmax.f32 %v2072_v38, 0.0 }
 0x1e2   : > { %v2553_v43 = vmin.f32 %v2481_v41, 6.0  ;;  %v2554_v44 = vmin.f32 %v2482_v42, 6.0 }
 0x1e4   : > { %v2676_v45 = vrot.slane %v2554_v44, 4 }
 0x1e5   : > { %v2060_v46 = vpop.f32.mrf.mxu2  ;;  %v2073_v47 = vpop.f32.mrf.mxu3 }
 0x1e6   : > { %v2084_v48 = vpop.f32.mrf.mxu0  ;;  %v2712_v49 = vsel %vm1283_vm0, %v2553_v43, %v2676_v45  ;;  %v2097_v51 = vpop.f32.mrf.mxu1 }
 0x1e7   : > { %v2085_v50 = vadd.f32 %v2084_v48, %v4355_v1  ;;  %2784 = vst [vmem:[%s4385_s11 + $0xa8] sm:$0xff] %v2712_v49  ;;  %v2098_v52 = vadd.f32 %v2097_v51, %v4355_v1 }
 0x1e9   : > { %v2483_v53 = vmax.f32 %v2085_v50, 0.0  ;;  %v2484_v54 = vmax.f32 %v2098_v52, 0.0 }
 0x1eb   : > { %v2555_v55 = vmin.f32 %v2483_v53, 6.0  ;;  %v2556_v56 = vmin.f32 %v2484_v54, 6.0 }
 0x1ed   : > { %v2110_v57 = vpop.f32.mrf.mxu2  ;;  %v2677_v60 = vrot.slane %v2556_v56, 4  ;;  %v2123_v62 = vpop.f32.mrf.mxu3 }
 0x1ee   : > { %v2111_v61 = vadd.f32 %v2110_v57, %v4355_v1  ;;  %v2086_v63 = vpop.f32.mrf.mxu0  ;;  %v2124_v0 = vadd.f32 %v2123_v62, %v4355_v1  ;;  %v2099_v2 = vpop.f32.mrf.mxu1 }
 0x1ef   : > { %v2713_v3 = vsel %vm1283_vm0, %v2555_v55, %v2677_v60 }
 0x1f0   : > { %v2485_v4 = vmax.f32 %v2111_v61, 0.0  ;;  %2785 = vst [vmem:[%s4385_s11 + $0xb0] sm:$0xff] %v2713_v3  ;;  %v2486_v5 = vmax.f32 %v2124_v0, 0.0 }
 0x1f2   : > { %v2557_v6 = vmin.f32 %v2485_v4, 6.0  ;;  %v2558_v7 = vmin.f32 %v2486_v5, 6.0 }
 0x1f4   : > { %v2678_v8 = vrot.slane %v2558_v7, 4 }
 0x1f5   : > { %v2112_v9 = vpop.f32.mrf.mxu2  ;;  %v2125_v10 = vpop.f32.mrf.mxu3 }
 0x1f6   : > { %v2136_v11 = vpop.f32.mrf.mxu0  ;;  %v2714_v12 = vsel %vm1283_vm0, %v2557_v6, %v2678_v8  ;;  %v2149_v14 = vpop.f32.mrf.mxu1 }
 0x1f7   : > { %v2137_v13 = vadd.f32 %v2136_v11, %v4355_v1  ;;  %2786 = vst [vmem:[%s4385_s11 + $0xb8] sm:$0xff] %v2714_v12  ;;  %v2150_v15 = vadd.f32 %v2149_v14, %v4355_v1 }
 0x1f9   : > { %v2487_v16 = vmax.f32 %v2137_v13, 0.0  ;;  %v2488_v17 = vmax.f32 %v2150_v15, 0.0 }
 0x1fb   : > { %v2559_v18 = vmin.f32 %v2487_v16, 6.0  ;;  %v2560_v19 = vmin.f32 %v2488_v17, 6.0 }
 0x1fd   : > { %v2162_v21 = vpop.f32.mrf.mxu2  ;;  %v2679_v59 = vrot.slane %v2560_v19, 4  ;;  %v2175_v58 = vpop.f32.mrf.mxu3 }
 0x1fe   : > { %v2163_v20 = vadd.f32 %v2162_v21, %v4355_v1  ;;  %v2138_v22 = vpop.f32.mrf.mxu0  ;;  %v2176_v23 = vadd.f32 %v2175_v58, %v4355_v1  ;;  %v2151_v24 = vpop.f32.mrf.mxu1 }
 0x1ff   : > { %v2715_v25 = vsel %vm1283_vm0, %v2559_v18, %v2679_v59 }
 0x200   : > { %v2489_v26 = vmax.f32 %v2163_v20, 0.0  ;;  %2787 = vst [vmem:[%s4385_s11 + $0xc0] sm:$0xff] %v2715_v25  ;;  %v2490_v27 = vmax.f32 %v2176_v23, 0.0 }
 0x202   : > { %v2561_v28 = vmin.f32 %v2489_v26, 6.0  ;;  %v2562_v29 = vmin.f32 %v2490_v27, 6.0 }
 0x204   : > { %v2680_v30 = vrot.slane %v2562_v29, 4 }
 0x205   : > { %v2164_v31 = vpop.f32.mrf.mxu2  ;;  %v2177_v32 = vpop.f32.mrf.mxu3 }
 0x206   : > { %v2188_v33 = vpop.f32.mrf.mxu0  ;;  %v2716_v34 = vsel %vm1283_vm0, %v2561_v28, %v2680_v30  ;;  %v2201_v36 = vpop.f32.mrf.mxu1 }
 0x207   : > { %v2189_v35 = vadd.f32 %v2188_v33, %v4355_v1  ;;  %2788 = vst [vmem:[%s4385_s11 + $0xc8] sm:$0xff] %v2716_v34  ;;  %v2202_v37 = vadd.f32 %v2201_v36, %v4355_v1 }
 0x209   : > { %v2491_v38 = vmax.f32 %v2189_v35, 0.0  ;;  %v2492_v39 = vmax.f32 %v2202_v37, 0.0 }
 0x20b   : > { %v2563_v40 = vmin.f32 %v2491_v38, 6.0  ;;  %v2564_v41 = vmin.f32 %v2492_v39, 6.0 }
 0x20d   : > { %v2214_v42 = vpop.f32.mrf.mxu2  ;;  %v2681_v43 = vrot.slane %v2564_v41, 4  ;;  %v2227_v45 = vpop.f32.mrf.mxu3 }
 0x20e   : > { %v2215_v44 = vadd.f32 %v2214_v42, %v4355_v1  ;;  %v2190_v46 = vpop.f32.mrf.mxu0  ;;  %v2228_v47 = vadd.f32 %v2227_v45, %v4355_v1  ;;  %v2203_v48 = vpop.f32.mrf.mxu1 }
 0x20f   : > { %v2717_v49 = vsel %vm1283_vm0, %v2563_v40, %v2681_v43 }
 0x210   : > { %v2493_v50 = vmax.f32 %v2215_v44, 0.0  ;;  %2789 = vst [vmem:[%s4385_s11 + $0xd0] sm:$0xff] %v2717_v49  ;;  %v2494_v51 = vmax.f32 %v2228_v47, 0.0 }
 0x212   : > { %v2565_v52 = vmin.f32 %v2493_v50, 6.0  ;;  %v2566_v53 = vmin.f32 %v2494_v51, 6.0 }
 0x214   : > { %v2682_v54 = vrot.slane %v2566_v53, 4 }
 0x215   : > { %v2216_v55 = vpop.f32.mrf.mxu2  ;;  %v2229_v56 = vpop.f32.mrf.mxu3 }
 0x216   : > { %v2240_v57 = vpop.f32.mrf.mxu0  ;;  %v2718_v60 = vsel %vm1283_vm0, %v2565_v52, %v2682_v54  ;;  %v2253_v62 = vpop.f32.mrf.mxu1 }
 0x217   : > { %v2241_v61 = vadd.f32 %v2240_v57, %v4355_v1  ;;  %2790 = vst [vmem:[%s4385_s11 + $0xd8] sm:$0xff] %v2718_v60  ;;  %v2254_v63 = vadd.f32 %v2253_v62, %v4355_v1 }
 0x219   : > { %v2495_v0 = vmax.f32 %v2241_v61, 0.0  ;;  %v2496_v2 = vmax.f32 %v2254_v63, 0.0 }
 0x21b   : > { %v2567_v3 = vmin.f32 %v2495_v0, 6.0  ;;  %v2568_v4 = vmin.f32 %v2496_v2, 6.0 }
 0x21d   : > { %v2266_v5 = vpop.f32.mrf.mxu2  ;;  %v2683_v6 = vrot.slane %v2568_v4, 4  ;;  %v2279_v8 = vpop.f32.mrf.mxu3 }
 0x21e   : > { %v2267_v7 = vadd.f32 %v2266_v5, %v4355_v1  ;;  %v2242_v9 = vpop.f32.mrf.mxu0  ;;  %v2280_v10 = vadd.f32 %v2279_v8, %v4355_v1  ;;  %v2255_v11 = vpop.f32.mrf.mxu1 }
 0x21f   : > { %v2719_v12 = vsel %vm1283_vm0, %v2567_v3, %v2683_v6 }
 0x220   : > { %v2497_v13 = vmax.f32 %v2267_v7, 0.0  ;;  %2791 = vst [vmem:[%s4385_s11 + $0xe0] sm:$0xff] %v2719_v12  ;;  %v2498_v14 = vmax.f32 %v2280_v10, 0.0 }
 0x222   : > { %v2569_v15 = vmin.f32 %v2497_v13, 6.0  ;;  %v2570_v16 = vmin.f32 %v2498_v14, 6.0 }
 0x224   : > { %v2684_v17 = vrot.slane %v2570_v16, 4 }
 0x225   : > { %v2268_v18 = vpop.f32.mrf.mxu2  ;;  %v2281_v19 = vpop.f32.mrf.mxu3 }
 0x226   : > { %v2292_v21 = vpop.f32.mrf.mxu0  ;;  %v2720_v59 = vsel %vm1283_vm0, %v2569_v15, %v2684_v17  ;;  %v2305_v58 = vpop.f32.mrf.mxu1 }
 0x227   : > { %v2293_v20 = vadd.f32 %v2292_v21, %v4355_v1  ;;  %2792 = vst [vmem:[%s4385_s11 + $0xe8] sm:$0xff] %v2720_v59  ;;  %v2306_v22 = vadd.f32 %v2305_v58, %v4355_v1 }
 0x229   : > { %v2499_v23 = vmax.f32 %v2293_v20, 0.0  ;;  %v2500_v24 = vmax.f32 %v2306_v22, 0.0 }
 0x22b   : > { %v2571_v25 = vmin.f32 %v2499_v23, 6.0  ;;  %v2572_v26 = vmin.f32 %v2500_v24, 6.0 }
 0x22d   : > { %v2318_v27 = vpop.f32.mrf.mxu2  ;;  %v2685_v28 = vrot.slane %v2572_v26, 4  ;;  %v2331_v30 = vpop.f32.mrf.mxu3 }
 0x22e   : > { %v2319_v29 = vadd.f32 %v2318_v27, %v4355_v1  ;;  %v2294_v31 = vpop.f32.mrf.mxu0  ;;  %v2332_v32 = vadd.f32 %v2331_v30, %v4355_v1  ;;  %v2307_v33 = vpop.f32.mrf.mxu1 }
 0x22f   : > { %v2721_v34 = vsel %vm1283_vm0, %v2571_v25, %v2685_v28 }
 0x230   : > { %v2501_v35 = vmax.f32 %v2319_v29, 0.0  ;;  %2793 = vst [vmem:[%s4385_s11 + $0xf0] sm:$0xff] %v2721_v34  ;;  %v2502_v36 = vmax.f32 %v2332_v32, 0.0 }
 0x232   : > { %v2573_v37 = vmin.f32 %v2501_v35, 6.0  ;;  %v2574_v38 = vmin.f32 %v2502_v36, 6.0 }
 0x234   : > { %v2686_v39 = vrot.slane %v2574_v38, 4 }
 0x235   : > { %v2320_v40 = vpop.f32.mrf.mxu2  ;;  %v2333_v41 = vpop.f32.mrf.mxu3 }
 0x236   : > { %v2344_v42 = vpop.f32.mrf.mxu0  ;;  %v2722_v43 = vsel %vm1283_vm0, %v2573_v37, %v2686_v39  ;;  %v2357_v45 = vpop.f32.mrf.mxu1 }
 0x237   : > { %v2345_v44 = vadd.f32 %v2344_v42, %v4355_v1  ;;  %2794 = vst [vmem:[%s4385_s11 + $0xf8] sm:$0xff] %v2722_v43  ;;  %v2358_v46 = vadd.f32 %v2357_v45, %v4355_v1 }
 0x239   : > { %v2503_v47 = vmax.f32 %v2345_v44, 0.0  ;;  %v2504_v48 = vmax.f32 %v2358_v46, 0.0 }
 0x23b   : > { %v2575_v49 = vmin.f32 %v2503_v47, 6.0  ;;  %v2576_v50 = vmin.f32 %v2504_v48, 6.0 }
 0x23d   : > { %v2370_v51 = vpop.f32.mrf.mxu2  ;;  %v2687_v52 = vrot.slane %v2576_v50, 4  ;;  %v2383_v54 = vpop.f32.mrf.mxu3 }
 0x23e   : > { %v2371_v53 = vadd.f32 %v2370_v51, %v4355_v1  ;;  %v2346_v55 = vpop.f32.mrf.mxu0  ;;  %v2384_v56 = vadd.f32 %v2383_v54, %v4355_v1  ;;  %v2359_v57 = vpop.f32.mrf.mxu1 }
 0x23f   : > { %v2723_v60 = vsel %vm1283_vm0, %v2575_v49, %v2687_v52 }
 0x240   : > { %v2505_v61 = vmax.f32 %v2371_v53, 0.0  ;;  %2795 = vst [vmem:[%s4385_s11 + $0x100] sm:$0xff] %v2723_v60  ;;  %v2506_v62 = vmax.f32 %v2384_v56, 0.0 }
 0x242   : > { %v2577_v63 = vmin.f32 %v2505_v61, 6.0  ;;  %v2578_v0 = vmin.f32 %v2506_v62, 6.0 }
 0x244   : > { %v2688_v2 = vrot.slane %v2578_v0, 4 }
 0x245   : > { %v2372_v3 = vpop.f32.mrf.mxu2  ;;  %v2385_v4 = vpop.f32.mrf.mxu3 }
 0x246   : > { %v2396_v5 = vpop.f32.mrf.mxu0  ;;  %v2724_v6 = vsel %vm1283_vm0, %v2577_v63, %v2688_v2  ;;  %v2409_v8 = vpop.f32.mrf.mxu1 }
 0x247   : > { %v2397_v7 = vadd.f32 %v2396_v5, %v4355_v1  ;;  %2796 = vst [vmem:[%s4385_s11 + $0x108] sm:$0xff] %v2724_v6  ;;  %v2410_v9 = vadd.f32 %v2409_v8, %v4355_v1 }
 0x249   : > { %v2507_v10 = vmax.f32 %v2397_v7, 0.0  ;;  %v2508_v11 = vmax.f32 %v2410_v9, 0.0 }
 0x24b   : > { %v2579_v12 = vmin.f32 %v2507_v10, 6.0  ;;  %v2580_v13 = vmin.f32 %v2508_v11, 6.0 }
 0x24d   : > { %v2422_v14 = vpop.f32.mrf.mxu2  ;;  %v2689_v15 = vrot.slane %v2580_v13, 4  ;;  %v2435_v17 = vpop.f32.mrf.mxu3 }
 0x24e   : > { %v2423_v16 = vadd.f32 %v2422_v14, %v4355_v1  ;;  %v2398_v18 = vpop.f32.mrf.mxu0  ;;  %v2436_v19 = vadd.f32 %v2435_v17, %v4355_v1  ;;  %v2411_v21 = vpop.f32.mrf.mxu1 }
 0x24f   : > { %v2725_v59 = vsel %vm1283_vm0, %v2579_v12, %v2689_v15 }
 0x250   : > { %2797 = vst [vmem:[%s4385_s11 + $0x110] sm:$0xff] %v2725_v59  ;;  %v2509_v20 = vmax.f32 %v2423_v16, 0.0  ;;  %v2510_v58 = vmax.f32 %v2436_v19, 0.0 }
 0x252   : > { %v2582_v22 = vmin.f32 %v2510_v58, 6.0  ;;  %v2581_v23 = vmin.f32 %v2509_v20, 6.0 }
 0x254   : > { %v2690_v24 = vrot.slane %v2582_v22, 4 }
 0x255   : > { %v2424_v25 = vpop.f32.mrf.mxu2  ;;  %v2437_v26 = vpop.f32.mrf.mxu3 }
 0x256   : > { %v2726_v27 = vsel %vm1283_vm0, %v2581_v23, %v2690_v24 }
 0x257   : > { %2798 = vst [vmem:[%s4385_s11 + $0x118] sm:$0xff] %v2726_v27 }
 0x258 PF: > { %p10_p9 = scmp.ge.s32.totalorder %s3756_s16, 4   ;;  %s4760_s12 = smov %s3711_s13 }
 0x259   : > { %s4761_s13 = smov %s3765_s19  ;;  %s4762_s14 = smov %s3756_s16 }
 0x25a   :  { %12 = sbr.rel (!%p10_p9) target bundleno = 2 (0x2), region = 90 }

// kernel: gate_classifier_forward.9
= control target key start
LH: loop header
LB: loop body
LE: loop exit
PB: predicated region body
PF: predicated region fallthrough
CT: control target
= control target key end

     0   :  { %v460_v2 = vmov 0   ;;  %vm166_vm0 = vcmask 1041408   ;;  %vm162_vm1 = vcmask 293888   ;;  %vm341_vm2 = vcmask 1043456   ;;  %s647_s1 = inlined_call_operand.vmem [shape: bf16[36,1152], index: 1, kind: input, shape index: {}]   ;;  %s648_s2 = inlined_call_operand.vmem [shape: f32[4,1], index: 2, kind: input, shape index: {}]   ;;  %s649_s0 = inlined_call_operand.vmem [shape: bf16[4,36], index: 0, kind: input, shape index: {}]   ;;  %s650_s3 = inlined_call_operand.vmem [shape: f32[4,1152], index: 3, kind: output, shape index: {}]  }
   0x1   :  { %v36_v0 = vld [vmem:[%s647_s1 + $0x90] sm:$0x33]  ;;  %v37_v1 = vld [vmem:[%s647_s1 + $0x98] sm:$0x33]  ;;  %459 = vset.pattern.permute.xlu0 %v460_v2  ;;  %v397_v7 = vld [vmem:[%s647_s1 + $0x48] sm:$0xf] }
   0x2   :  { %v108_v3 = vunpack.c.l.b16 %v36_v0  ;;  %v109_v4 = vunpack.c.h.b16 %v36_v0  ;;  %v111_v5 = vunpack.c.h.b16 %v37_v1  ;;  %v110_v6 = vunpack.c.l.b16 %v37_v1  ;;  %v453_v8 = vld [vmem:[%s647_s1 + $0x68] sm:$0xf0]  ;;  %v399_v14 = vld [vmem:[%s647_s1 + $0x6c] sm:$0xf0]  ;;  %v450_v15 = vld [vmem:[%s647_s1 + $0x54] sm:$0xf] }
   0x3   :  { %v449_v13 = vld [vmem:[%s647_s1 + $0x4c] sm:$0xf]  ;;  %v407_v16 = vld [vmem:[%s647_s1 + $0x74] sm:$0xf0]  ;;  %v405_v17 = vld [vmem:[%s647_s1 + $0x50] sm:$0xf]  ;;  %v398_v24 = vor.u32 %v453_v8, %v397_v7 }
   0x4   :  { %v135_v9 = vpack.c.b16 %v108_v3, %v108_v3  ;;  %v136_v10 = vpack.c.b16 %v109_v4, %v109_v4  ;;  %v138_v11 = vpack.c.b16 %v111_v5, %v111_v5  ;;  %v137_v12 = vpack.c.b16 %v110_v6, %v110_v6  ;;  %v454_v18 = vld [vmem:[%s647_s1 + $0x70] sm:$0xf0]  ;;  %v361_v23 = vld [vmem:[%s647_s1] sm:$0xf]  ;;  %v444_v26 = vld [vmem:[%s647_s1 + $0x20] sm:$0xf0] }
   0x5   :  { %v402_v25 = vor.u32 %v449_v13, %v399_v14  ;;  %v440_v27 = vld [vmem:[%s647_s1 + $0x4] sm:$0xf]  ;;  %v363_v28 = vld [vmem:[%s647_s1 + $0x24] sm:$0xf0]  ;;  %v410_v29 = vor.u32 %v450_v15, %v407_v16  ;;  %v406_v30 = vor.u32 %v454_v18, %v405_v17  ;;  %v441_v31 = vld [vmem:[%s647_s1 + $0xc] sm:$0xf]  ;;  %v362_v41 = vor.u32 %v444_v26, %v361_v23 }
   0x6   :  { %v168_v19 = vsel %vm166_vm0, %v135_v9, 0  ;;  %v171_v20 = vsel %vm166_vm0, %v136_v10, 0  ;;  %v177_v21 = vsel %vm166_vm0, %v138_v11, 0  ;;  %v174_v22 = vsel %vm166_vm0, %v137_v12, 0  ;;  %v38_v32 = vld [vmem:[%s647_s1 + $0xa0] sm:$0x33] }
   0x7   :  { %199 = vmatpush.bf16.msra.mxu0 %v168_v19  ;;  %212 = vmatpush.bf16.msra.mxu1 %v171_v20  ;;  %v39_v33 = vld [vmem:[%s647_s1 + $0xa8] sm:$0x33]  ;;  %v371_v34 = vld [vmem:[%s647_s1 + $0x2c] sm:$0xf0]  ;;  %v112_v37 = vunpack.c.l.b16 %v38_v32  ;;  %v113_v38 = vunpack.c.h.b16 %v38_v32  ;;  %v41_v42 = vld [vmem:[%s648_s2] sm:$0xf]  ;;  %v366_v43 = vor.u32 %v440_v27, %v363_v28 }
   0x8   :  { %238 = vmatpush.bf16.msra.mxu3 %v177_v21  ;;  %225 = vmatpush.bf16.msra.mxu2 %v174_v22  ;;  %v369_v35 = vld [vmem:[%s647_s1 + $0x8] sm:$0xf]  ;;  %v445_v36 = vld [vmem:[%s647_s1 + $0x28] sm:$0xf0]  ;;  %v115_v39 = vunpack.c.h.b16 %v39_v33  ;;  %v114_v40 = vunpack.c.l.b16 %v39_v33  ;;  %v374_v46 = vor.u32 %v441_v31, %v371_v34  ;;  %v413_v49 = vld [vmem:[%s647_s1 + $0x58] sm:$0xf] }
   0x9   :  { %v139_v44 = vpack.c.b16 %v112_v37, %v112_v37  ;;  %v140_v45 = vpack.c.b16 %v113_v38, %v113_v38  ;;  %v370_v47 = vor.u32 %v445_v36, %v369_v35  ;;  %v455_v50 = vld [vmem:[%s647_s1 + $0x78] sm:$0xf0]  ;;  %44 = vperm.xlu0 %459, %v41_v42   ;;  %v415_v55 = vld [vmem:[%s647_s1 + $0x7c] sm:$0xf0]  ;;  %v40_v57 = vld [vmem:[%s647_s1 + $0xb0] sm:$0x3] }
   0xa   :  { %v142_v48 = vpack.c.b16 %v115_v39, %v115_v39  ;;  %v141_v51 = vpack.c.b16 %v114_v40, %v114_v40  ;;  %v451_v54 = vld [vmem:[%s647_s1 + $0x5c] sm:$0xf]  ;;  %v15_v56 = vld [vmem:[%s649_s0] sm:$0x3]  ;;  %v452_v58 = vld [vmem:[%s647_s1 + $0x64] sm:$0xf]  ;;  %v116_v61 = vunpack.c.l.b16 %v40_v57  ;;  %v414_v63 = vor.u32 %v455_v50, %v413_v49 }
   0xb   :  { %200 = vmatpush.bf16.msra.mxu0 %v398_v24  ;;  %213 = vmatpush.bf16.msra.mxu1 %v402_v25  ;;  %v180_v52 = vsel %vm166_vm0, %v139_v44, 0  ;;  %v183_v53 = vsel %vm166_vm0, %v140_v45, 0  ;;  %v423_v59 = vld [vmem:[%s647_s1 + $0x84] sm:$0xf0]  ;;  %v377_v60 = vld [vmem:[%s647_s1 + $0x10] sm:$0xf]  ;;  %v418_v1 = vor.u32 %v451_v54, %v415_v55 }
   0xc   :  { %239 = vmatpush.bf16.msra.mxu3 %v410_v29  ;;  %226 = vmatpush.bf16.msra.mxu2 %v406_v30  ;;  %v189_v62 = vsel %vm166_vm0, %v142_v48, 0  ;;  %v186_v0 = vsel %vm166_vm0, %v141_v51, 0  ;;  %v421_v2 = vld [vmem:[%s647_s1 + $0x60] sm:$0xf]  ;;  %v456_v3 = vld [vmem:[%s647_s1 + $0x80] sm:$0xf0]  ;;  %v143_v7 = vpack.c.b16 %v116_v61, %v116_v61  ;;  %v426_v8 = vor.u32 %v452_v58, %v423_v59 }
   0xd   :  { %v446_v4 = vld [vmem:[%s647_s1 + $0x30] sm:$0xf0]  ;;  %v379_v6 = vld [vmem:[%s647_s1 + $0x34] sm:$0xf0]  ;;  %v422_v9 = vor.u32 %v456_v3, %v421_v2  ;;  %v443_v10 = vld [vmem:[%s647_s1 + $0x1c] sm:$0xf] }
   0xe   :  { %v442_v5 = vld [vmem:[%s647_s1 + $0x14] sm:$0xf]  ;;  %v378_v11 = vor.u32 %v446_v4, %v377_v60  ;;  %v387_v13 = vld [vmem:[%s647_s1 + $0x3c] sm:$0xf0]  ;;  %v385_v14 = vld [vmem:[%s647_s1 + $0x18] sm:$0xf] }
   0xf   :  { %201 = vmatpush.bf16.msra.mxu0 %v362_v41  ;;  %214 = vmatpush.bf16.msra.mxu1 %v366_v43  ;;  %v382_v12 = vor.u32 %v442_v5, %v379_v6  ;;  %v447_v15 = vld [vmem:[%s647_s1 + $0x38] sm:$0xf0]  ;;  %v192_v16 = vsel %vm166_vm0, %v143_v7, 0  ;;  %v429_v17 = vld [vmem:[%s647_s1 + $0x68] sm:$0xf]  ;;  %v390_v19 = vor.u32 %v443_v10, %v387_v13 }
  0x10   :  { %240 = vmatpush.bf16.msra.mxu3 %v374_v46  ;;  %227 = vmatpush.bf16.msra.mxu2 %v370_v47  ;;  %v457_v18 = vld [vmem:[%s647_s1 + $0x88] sm:$0xf0]  ;;  %v386_v20 = vor.u32 %v447_v15, %v385_v14  ;;  %v393_v22 = vld [vmem:[%s647_s1 + $0x20] sm:$0xf]  ;;  %v448_v23 = vld [vmem:[%s647_s1 + $0x40] sm:$0xf0] }
  0x11   :  { %v430_v21 = vor.u32 %v457_v18, %v429_v17  ;;  %v394_v24 = vor.u32 %v448_v23, %v393_v22 }
  0x12   :  { %431 = vmatmul.msk.bf16.vlgmr.msra.gmra.mxu0 %vm162_vm1, %v15_v56  ;;  %432 = vmatmul.msk.bf16.vlgmr.msra.gmra.mxu1 %vm162_vm1, %v15_v56 }
  0x13   :  { %251 = vmatpush.bf16.msrb.mxu0 %v180_v52  ;;  %264 = vmatpush.bf16.msrb.mxu1 %v183_v53 }
  0x14   :  { %434 = vmatmul.msk.bf16.vlgmr.msra.gmra.mxu3 %vm162_vm1, %v15_v56  ;;  %433 = vmatmul.msk.bf16.vlgmr.msra.gmra.mxu2 %vm162_vm1, %v15_v56 }
  0x15   :  { %290 = vmatpush.bf16.msrb.mxu3 %v189_v62  ;;  %277 = vmatpush.bf16.msrb.mxu2 %v186_v0 }
  0x17   :  { %252 = vmatpush.bf16.msrb.mxu0 %v414_v63  ;;  %265 = vmatpush.bf16.msrb.mxu1 %v418_v1 }
  0x19   :  { %291 = vmatpush.bf16.msrb.mxu3 %v426_v8  ;;  %278 = vmatpush.bf16.msrb.mxu2 %v422_v9 }
  0x1b   :  { %253 = vmatpush.bf16.msrb.mxu0 %v378_v11  ;;  %266 = vmatpush.bf16.msrb.mxu1 %v382_v12 }
  0x1d   :  { %292 = vmatpush.bf16.msrb.mxu3 %v390_v19  ;;  %279 = vmatpush.bf16.msrb.mxu2 %v386_v20 }
  0x1f   :  { %303 = vmatpush.bf16.msra.mxu0 %v192_v16 }
  0x22   :  { %435 = vmatmul.msk.bf16.vlgmr.msrb.gmra.mxu0 %vm162_vm1, %v15_v56  ;;  %436 = vmatmul.msk.bf16.vlgmr.msrb.gmra.mxu1 %vm162_vm1, %v15_v56 }
  0x23   :  { %304 = vmatpush.bf16.msra.mxu0 %v430_v21 }
  0x24   :  { %438 = vmatmul.msk.bf16.vlgmr.msrb.gmra.mxu3 %vm162_vm1, %v15_v56  ;;  %437 = vmatmul.msk.bf16.vlgmr.msrb.gmra.mxu2 %vm162_vm1, %v15_v56 }
  0x27   :  { %305 = vmatpush.bf16.msra.mxu0 %v394_v24 }
  0x32   :  { %439 = vmatmul.msk.bf16.vlgmr.msra.gmra.mxu0 %vm162_vm1, %v15_v56 }
  0x7b   :  { %v45_v25 = vpop.permute.xlu0 %44 }
  0x8f   :  { %v203_v26 = vpop.f32.mrf.mxu0  ;;  %v216_v27 = vpop.f32.mrf.mxu1 }
  0x90   :  { %v204_v28 = vadd.f32 %v203_v26, %v45_v25  ;;  %v217_v29 = vadd.f32 %v216_v27, %v45_v25 }
  0x92   :  { %v311_v30 = vmax.f32 %v204_v28, 0.0  ;;  %v312_v31 = vmax.f32 %v217_v29, 0.0 }
  0x94   :  { %v321_v32 = vmin.f32 %v312_v31, 6.0  ;;  %v320_v33 = vmin.f32 %v311_v30, 6.0 }
  0x96   :  { %v337_v34 = vrot.slane %v321_v32, 4 }
  0x97   :  { %v242_v35 = vpop.f32.mrf.mxu3  ;;  %v229_v36 = vpop.f32.mrf.mxu2 }
  0x98   :  { %v243_v37 = vadd.f32 %v242_v35, %v45_v25  ;;  %v205_v38 = vpop.f32.mrf.mxu0  ;;  %v218_v39 = vpop.f32.mrf.mxu1  ;;  %v230_v40 = vadd.f32 %v229_v36, %v45_v25  ;;  %v342_v41 = vsel %vm341_vm2, %v320_v33, %v337_v34 }
  0x99   :  { %350 = vst [vmem:[%s650_s3] sm:$0xff] %v342_v41 }
  0x9a   :  { %v314_v42 = vmax.f32 %v243_v37, 0.0  ;;  %v313_v43 = vmax.f32 %v230_v40, 0.0 }
  0x9c   :  { %v323_v44 = vmin.f32 %v314_v42, 6.0  ;;  %v322_v45 = vmin.f32 %v313_v43, 6.0 }
  0x9e   :  { %v338_v46 = vrot.slane %v323_v44, 4 }
  0x9f   :  { %v244_v47 = vpop.f32.mrf.mxu3  ;;  %v231_v48 = vpop.f32.mrf.mxu2 }
  0xa0   :  { %v343_v49 = vsel %vm341_vm2, %v322_v45, %v338_v46  ;;  %v255_v50 = vpop.f32.mrf.mxu0  ;;  %v268_v51 = vpop.f32.mrf.mxu1 }
  0xa1   :  { %351 = vst [vmem:[%s650_s3 + $0x8] sm:$0xff] %v343_v49  ;;  %v256_v52 = vadd.f32 %v255_v50, %v45_v25  ;;  %v269_v53 = vadd.f32 %v268_v51, %v45_v25 }
  0xa3   :  { %v315_v54 = vmax.f32 %v256_v52, 0.0  ;;  %v316_v55 = vmax.f32 %v269_v53, 0.0 }
  0xa5   :  { %v325_v56 = vmin.f32 %v316_v55, 6.0  ;;  %v324_v57 = vmin.f32 %v315_v54, 6.0 }
  0xa7   :  { %v339_v58 = vrot.slane %v325_v56, 4  ;;  %v294_v59 = vpop.f32.mrf.mxu3  ;;  %v281_v60 = vpop.f32.mrf.mxu2 }
  0xa8   :  { %v295_v61 = vadd.f32 %v294_v59, %v45_v25  ;;  %v257_v62 = vpop.f32.mrf.mxu0  ;;  %v282_v63 = vadd.f32 %v281_v60, %v45_v25  ;;  %v270_v0 = vpop.f32.mrf.mxu1 }
  0xa9   :  { %v344_v1 = vsel %vm341_vm2, %v324_v57, %v339_v58 }
  0xaa   :  { %352 = vst [vmem:[%s650_s3 + $0x10] sm:$0xff] %v344_v1  ;;  %v318_v2 = vmax.f32 %v295_v61, 0.0  ;;  %v317_v3 = vmax.f32 %v282_v63, 0.0 }
  0xac   :  { %v327_v4 = vmin.f32 %v318_v2, 6.0  ;;  %v326_v5 = vmin.f32 %v317_v3, 6.0 }
  0xae   :  { %v340_v6 = vrot.slane %v327_v4, 4 }
  0xaf   :  { %v296_v7 = vpop.f32.mrf.mxu3  ;;  %v283_v8 = vpop.f32.mrf.mxu2 }
  0xb0   :  { %v345_v9 = vsel %vm341_vm2, %v326_v5, %v340_v6  ;;  %v307_v10 = vpop.f32.mrf.mxu0 }
  0xb1   :  { %353 = vst [vmem:[%s650_s3 + $0x18] sm:$0xff] %v345_v9  ;;  %v308_v11 = vadd.f32 %v307_v10, %v45_v25 }
  0xb3   :  { %v319_v12 = vmax.f32 %v308_v11, 0.0 }
  0xb5   :  { %v328_v13 = vmin.f32 %v319_v12, 6.0 }
  0xb7   :  { %354 = vst [vmem:[%s650_s3 + $0x20] sm:$0xf] %v328_v13 }
  0xb8   :  { %v309_v14 = vpop.f32.mrf.mxu0 }

// kernel: gate_classifier_forward.11
= control target key start
LH: loop header
LB: loop body
LE: loop exit
PB: predicated region body
PF: predicated region fallthrough
CT: control target
= control target key end

     0   :  { %vm73_vm0 = vcmask 1043456   ;;  %vm74_vm1 = vcmask 1044480   ;;  %v325_v2 = vmov 65535   ;;  %vm69_vm2 = vcmask 72704   ;;  %s436_s1 = inlined_call_operand.vmem [shape: bf16[9,1152], index: 1, kind: input, shape index: {}]   ;;  %s437_s0 = inlined_call_operand.vmem [shape: bf16[4,9], index: 0, kind: input, shape index: {}]   ;;  %s438_s2 = inlined_call_operand.vmem [shape: f32[4,1], index: 2, kind: input, shape index: {}]   ;;  %s439_s3 = inlined_call_operand.vmem [shape: f32[4,1152], index: 3, kind: output, shape index: {}]  }
   0x1   :  { %v270_v0 = vld [vmem:[%s436_s1] sm:$0xf]  ;;  %v317_v1 = vld [vmem:[%s436_s1 + $0x20] sm:$0x10]  ;;  %v75_v3 = vsel %vm73_vm0, 4294967295, %v325_v2  ;;  %v326_v8 = vmov 0  }
   0x2   :  { %v271_v4 = vor.u32 %v317_v1, %v270_v0  ;;  %v76_v5 = vsel %vm74_vm1, %v75_v3, 0  ;;  %v313_v6 = vld [vmem:[%s436_s1 + $0x4] sm:$0xf]  ;;  %v272_v7 = vld [vmem:[%s436_s1 + $0x24] sm:$0x10]  ;;  %324 = vset.pattern.permute.xlu0 %v326_v8 }
   0x3   :  { %v275_v9 = vor.u32 %v313_v6, %v272_v7  ;;  %v314_v10 = vld [vmem:[%s436_s1 + $0xc] sm:$0xf]  ;;  %v280_v11 = vld [vmem:[%s436_s1 + $0x2c] sm:$0x10]  ;;  %v278_v12 = vld [vmem:[%s436_s1 + $0x8] sm:$0xf] }
   0x4   :  { %v78_v13 = vand.u32 %v271_v4, %v76_v5  ;;  %v283_v14 = vor.u32 %v314_v10, %v280_v11  ;;  %v318_v15 = vld [vmem:[%s436_s1 + $0x28] sm:$0x10]  ;;  %v15_v16 = vld [vmem:[%s437_s0] sm:$0x3]  ;;  %v286_v17 = vld [vmem:[%s436_s1 + $0x10] sm:$0xf] }
   0x5   :  { %v81_v18 = vand.u32 %v275_v9, %v76_v5  ;;  %v279_v19 = vor.u32 %v318_v15, %v278_v12  ;;  %v319_v20 = vld [vmem:[%s436_s1 + $0x30] sm:$0x10]  ;;  %v316_v21 = vld [vmem:[%s436_s1 + $0x1c] sm:$0xf]  ;;  %v296_v22 = vld [vmem:[%s436_s1 + $0x3c] sm:$0x10] }
   0x6   :  { %111 = vmatpush.bf16.msra.mxu0 %v78_v13  ;;  %v87_v23 = vand.u32 %v283_v14, %v76_v5  ;;  %v287_v24 = vor.u32 %v319_v20, %v286_v17  ;;  %v299_v25 = vor.u32 %v316_v21, %v296_v22  ;;  %v294_v26 = vld [vmem:[%s436_s1 + $0x18] sm:$0xf]  ;;  %v320_v27 = vld [vmem:[%s436_s1 + $0x38] sm:$0x10]  ;;  %v26_v28 = vld [vmem:[%s438_s2] sm:$0xf] }
   0x7   :  { %124 = vmatpush.bf16.msra.mxu1 %v81_v18  ;;  %v84_v29 = vand.u32 %v279_v19, %v76_v5  ;;  %v295_v30 = vor.u32 %v320_v27, %v294_v26  ;;  %29 = vperm.xlu0 %324, %v26_v28   ;;  %v315_v31 = vld [vmem:[%s436_s1 + $0x14] sm:$0xf]  ;;  %v288_v32 = vld [vmem:[%s436_s1 + $0x34] sm:$0x10]  ;;  %v302_v33 = vld [vmem:[%s436_s1 + $0x20] sm:$0xf] }
   0x8   :  { %150 = vmatpush.bf16.msra.mxu3 %v87_v23  ;;  %v90_v34 = vand.u32 %v287_v24, %v76_v5  ;;  %v99_v35 = vand.u32 %v299_v25, %v76_v5  ;;  %v291_v36 = vor.u32 %v315_v31, %v288_v32  ;;  %v321_v37 = vld [vmem:[%s436_s1 + $0x40] sm:$0x10] }
   0x9   :  { %137 = vmatpush.bf16.msra.mxu2 %v84_v29  ;;  %304 = vmatmul.msk.bf16.vlgmr.msra.gmra.mxu0 %vm69_vm2, %v15_v16  ;;  %v96_v38 = vand.u32 %v295_v30, %v76_v5  ;;  %v303_v39 = vor.u32 %v321_v37, %v302_v33 }
   0xa   :  { %305 = vmatmul.msk.bf16.vlgmr.msra.gmra.mxu1 %vm69_vm2, %v15_v16  ;;  %163 = vmatpush.bf16.msrb.mxu0 %v90_v34  ;;  %v93_v40 = vand.u32 %v291_v36, %v76_v5 }
   0xb   :  { %307 = vmatmul.msk.bf16.vlgmr.msra.gmra.mxu3 %vm69_vm2, %v15_v16  ;;  %v102_v41 = vand.u32 %v303_v39, %v76_v5 }
   0xc   :  { %306 = vmatmul.msk.bf16.vlgmr.msra.gmra.mxu2 %vm69_vm2, %v15_v16  ;;  %202 = vmatpush.bf16.msrb.mxu3 %v99_v35 }
   0xd   :  { %189 = vmatpush.bf16.msrb.mxu2 %v96_v38  ;;  %176 = vmatpush.bf16.msrb.mxu1 %v93_v40 }
   0xe   :  { %215 = vmatpush.bf16.msra.mxu0 %v102_v41 }
  0x19   :  { %308 = vmatmul.msk.bf16.vlgmr.msrb.gmra.mxu0 %vm69_vm2, %v15_v16 }
  0x1a   :  { %309 = vmatmul.msk.bf16.vlgmr.msrb.gmra.mxu1 %vm69_vm2, %v15_v16 }
  0x1b   :  { %311 = vmatmul.msk.bf16.vlgmr.msrb.gmra.mxu3 %vm69_vm2, %v15_v16 }
  0x1c   :  { %310 = vmatmul.msk.bf16.vlgmr.msrb.gmra.mxu2 %vm69_vm2, %v15_v16 }
  0x29   :  { %312 = vmatmul.msk.bf16.vlgmr.msra.gmra.mxu0 %vm69_vm2, %v15_v16 }
  0x79   :  { %v30_v42 = vpop.permute.xlu0 %29 }
  0x86   :  { %v113_v43 = vpop.f32.mrf.mxu0 }
  0x87   :  { %v114_v44 = vadd.f32 %v113_v43, %v30_v42  ;;  %v126_v45 = vpop.f32.mrf.mxu1 }
  0x88   :  { %v127_v46 = vadd.f32 %v126_v45, %v30_v42 }
  0x89   :  { %v221_v47 = vmax.f32 %v114_v44, 0.0 }
  0x8a   :  { %v222_v48 = vmax.f32 %v127_v46, 0.0 }
  0x8b   :  { %v230_v50 = vmin.f32 %v221_v47, 6.0 }
  0x8c   :  { %v231_v49 = vmin.f32 %v222_v48, 6.0 }
  0x8e   :  { %v247_v51 = vrot.slane %v231_v49, 4  ;;  %v152_v52 = vpop.f32.mrf.mxu3  ;;  %v115_v53 = vpop.f32.mrf.mxu0 }
  0x8f   :  { %v153_v54 = vadd.f32 %v152_v52, %v30_v42  ;;  %v128_v55 = vpop.f32.mrf.mxu1  ;;  %v139_v56 = vpop.f32.mrf.mxu2 }
  0x90   :  { %v251_v57 = vsel %vm73_vm0, %v230_v50, %v247_v51  ;;  %v140_v58 = vadd.f32 %v139_v56, %v30_v42 }
  0x91   :  { %259 = vst [vmem:[%s439_s3] sm:$0xff] %v251_v57  ;;  %v224_v59 = vmax.f32 %v153_v54, 0.0 }
  0x92   :  { %v223_v60 = vmax.f32 %v140_v58, 0.0 }
  0x93   :  { %v233_v61 = vmin.f32 %v224_v59, 6.0 }
  0x94   :  { %v232_v62 = vmin.f32 %v223_v60, 6.0 }
  0x95   :  { %v248_v63 = vrot.slane %v233_v61, 4 }
  0x96   :  { %v154_v0 = vpop.f32.mrf.mxu3  ;;  %v165_v1 = vpop.f32.mrf.mxu0 }
  0x97   :  { %v252_v2 = vsel %vm73_vm0, %v232_v62, %v248_v63  ;;  %v141_v3 = vpop.f32.mrf.mxu2  ;;  %v166_v4 = vadd.f32 %v165_v1, %v30_v42  ;;  %v178_v5 = vpop.f32.mrf.mxu1 }
  0x98   :  { %260 = vst [vmem:[%s439_s3 + $0x8] sm:$0xff] %v252_v2  ;;  %v179_v6 = vadd.f32 %v178_v5, %v30_v42 }
  0x99   :  { %v225_v7 = vmax.f32 %v166_v4, 0.0 }
  0x9a   :  { %v226_v8 = vmax.f32 %v179_v6, 0.0 }
  0x9b   :  { %v234_v10 = vmin.f32 %v225_v7, 6.0 }
  0x9c   :  { %v235_v9 = vmin.f32 %v226_v8, 6.0 }
  0x9e   :  { %v249_v11 = vrot.slane %v235_v9, 4  ;;  %v204_v12 = vpop.f32.mrf.mxu3  ;;  %v167_v13 = vpop.f32.mrf.mxu0 }
  0x9f   :  { %v205_v14 = vadd.f32 %v204_v12, %v30_v42  ;;  %v191_v15 = vpop.f32.mrf.mxu2  ;;  %v180_v16 = vpop.f32.mrf.mxu1 }
  0xa0   :  { %v253_v17 = vsel %vm73_vm0, %v234_v10, %v249_v11  ;;  %v192_v18 = vadd.f32 %v191_v15, %v30_v42 }
  0xa1   :  { %261 = vst [vmem:[%s439_s3 + $0x10] sm:$0xff] %v253_v17  ;;  %v228_v19 = vmax.f32 %v205_v14, 0.0 }
  0xa2   :  { %v227_v20 = vmax.f32 %v192_v18, 0.0 }
  0xa3   :  { %v237_v21 = vmin.f32 %v228_v19, 6.0 }
  0xa4   :  { %v236_v22 = vmin.f32 %v227_v20, 6.0 }
  0xa5   :  { %v250_v23 = vrot.slane %v237_v21, 4 }
  0xa6   :  { %v206_v24 = vpop.f32.mrf.mxu3  ;;  %v217_v25 = vpop.f32.mrf.mxu0 }
  0xa7   :  { %v254_v26 = vsel %vm73_vm0, %v236_v22, %v250_v23  ;;  %v193_v27 = vpop.f32.mrf.mxu2  ;;  %v218_v28 = vadd.f32 %v217_v25, %v30_v42 }
  0xa8   :  { %262 = vst [vmem:[%s439_s3 + $0x18] sm:$0xff] %v254_v26 }
  0xa9   :  { %v229_v29 = vmax.f32 %v218_v28, 0.0 }
  0xab   :  { %v238_v30 = vmin.f32 %v229_v29, 6.0 }
  0xad   :  { %263 = vst [vmem:[%s439_s3 + $0x20] sm:$0xf] %v238_v30 }
  0xae   :  { %v219_v31 = vpop.f32.mrf.mxu0 }

// kernel: gate_classifier_forward.12
= control target key start
LH: loop header
LB: loop body
LE: loop exit
PB: predicated region body
PF: predicated region fallthrough
CT: control target
= control target key end

     0   :  { %v273_v2 = vmov 0   ;;  %vm128_vm0 = vcmask 1043456   ;;  %vm124_vm1 = vcmask 588800   ;;  %vm194_vm2 = vcmask 261120   ;;  %s399_s1 = inlined_call_operand.vmem [shape: bf16[72,288], index: 1, kind: input, shape index: {}]   ;;  %s400_s2 = inlined_call_operand.vmem [shape: f32[16,1], index: 2, kind: input, shape index: {}]   ;;  %s401_s0 = inlined_call_operand.vmem [shape: bf16[16,72], index: 0, kind: input, shape index: {}]   ;;  %s402_s3 = inlined_call_operand.vmem [shape: f32[16,288], index: 3, kind: output, shape index: {}]  }
   0x1   :  { %v33_v0 = vld [vmem:[%s399_s1 + $0x60] sm:$0xff]  ;;  %v34_v1 = vld [vmem:[%s399_s1 + $0x68] sm:$0xf]  ;;  %272 = vset.pattern.permute.xlu0 %v273_v2  ;;  %v269_v10 = vld [vmem:[%s399_s1 + $0x50] sm:$0xf0] }
   0x2   :  { %v94_v3 = vunpack.c.l.b16 %v33_v0  ;;  %v95_v4 = vunpack.c.h.b16 %v33_v0  ;;  %v96_v5 = vunpack.c.l.b16 %v34_v1  ;;  %v245_v6 = vld [vmem:[%s399_s1 + $0x48] sm:$0xf]  ;;  %v268_v11 = vld [vmem:[%s399_s1 + $0x4c] sm:$0xf]  ;;  %v247_v12 = vld [vmem:[%s399_s1 + $0x54] sm:$0xf0] }
   0x3   :  { %v253_v13 = vld [vmem:[%s399_s1 + $0x50] sm:$0xf]  ;;  %v270_v14 = vld [vmem:[%s399_s1 + $0x58] sm:$0xf0]  ;;  %v246_v18 = vor.u32 %v269_v10, %v245_v6  ;;  %v250_v19 = vor.u32 %v268_v11, %v247_v12  ;;  %v265_v23 = vld [vmem:[%s399_s1 + $0x34] sm:$0xf] }
   0x4   :  { %v109_v7 = vpack.c.b16 %v94_v3, %v94_v3  ;;  %v110_v8 = vpack.c.b16 %v95_v4, %v95_v4  ;;  %v111_v9 = vpack.c.b16 %v96_v5, %v96_v5  ;;  %v233_v20 = vld [vmem:[%s399_s1 + $0x30] sm:$0xf]  ;;  %v254_v21 = vor.u32 %v270_v14, %v253_v13  ;;  %v266_v22 = vld [vmem:[%s399_s1 + $0x38] sm:$0xf0]  ;;  %v235_v24 = vld [vmem:[%s399_s1 + $0x3c] sm:$0xf0] }
   0x5   :  { %v241_v25 = vld [vmem:[%s399_s1 + $0x38] sm:$0xf]  ;;  %v267_v26 = vld [vmem:[%s399_s1 + $0x40] sm:$0xf0]  ;;  %v234_v28 = vor.u32 %v266_v22, %v233_v20  ;;  %v238_v29 = vor.u32 %v265_v23, %v235_v24  ;;  %v262_v33 = vld [vmem:[%s399_s1 + $0x1c] sm:$0xf] }
   0x6   :  { %v130_v15 = vsel %vm128_vm0, %v109_v7, 0  ;;  %v133_v16 = vsel %vm128_vm0, %v110_v8, 0  ;;  %v136_v17 = vsel %vm128_vm0, %v111_v9, 0  ;;  %v35_v27 = vld [vmem:[%s400_s2] sm:$0xff]  ;;  %v221_v30 = vld [vmem:[%s399_s1 + $0x18] sm:$0xf]  ;;  %v242_v31 = vor.u32 %v267_v26, %v241_v25 }
   0x7   :  { %141 = vmatpush.bf16.msra.mxu0 %v130_v15  ;;  %155 = vmatpush.bf16.msra.mxu1 %v133_v16  ;;  %v263_v32 = vld [vmem:[%s399_s1 + $0x20] sm:$0xf0]  ;;  %v223_v34 = vld [vmem:[%s399_s1 + $0x24] sm:$0xf0]  ;;  %v229_v35 = vld [vmem:[%s399_s1 + $0x20] sm:$0xf] }
   0x8   :  { %169 = vmatpush.bf16.msra.mxu2 %v136_v17  ;;  %39 = vperm.xlu0 %272, %v35_v27   ;;  %v264_v36 = vld [vmem:[%s399_s1 + $0x28] sm:$0xf0]  ;;  %v222_v37 = vor.u32 %v263_v32, %v221_v30  ;;  %v226_v38 = vor.u32 %v262_v33, %v223_v34  ;;  %v209_v39 = vld [vmem:[%s399_s1] sm:$0xf]  ;;  %v259_v42 = vld [vmem:[%s399_s1 + $0x4] sm:$0xf] }
   0x9   :  { %v230_v40 = vor.u32 %v264_v36, %v229_v35  ;;  %v260_v41 = vld [vmem:[%s399_s1 + $0x8] sm:$0xf0]  ;;  %v211_v43 = vld [vmem:[%s399_s1 + $0xc] sm:$0xf0]  ;;  %v217_v44 = vld [vmem:[%s399_s1 + $0x8] sm:$0xf] }
   0xa   :  { %v261_v45 = vld [vmem:[%s399_s1 + $0x10] sm:$0xf0]  ;;  %v36_v46 = vld [vmem:[%s400_s2 + $0x8] sm:$0xff]  ;;  %v210_v47 = vor.u32 %v260_v41, %v209_v39  ;;  %v214_v48 = vor.u32 %v259_v42, %v211_v43  ;;  %v258_v50 = vld [vmem:[%s401_s0] sm:$0xff] }
   0xb   :  { %142 = vmatpush.bf16.msra.mxu0 %v246_v18  ;;  %156 = vmatpush.bf16.msra.mxu1 %v250_v19  ;;  %v218_v49 = vor.u32 %v261_v45, %v217_v44 }
   0xc   :  { %170 = vmatpush.bf16.msra.mxu2 %v254_v21 }
   0xf   :  { %143 = vmatpush.bf16.msra.mxu0 %v234_v28  ;;  %157 = vmatpush.bf16.msra.mxu1 %v238_v29 }
  0x10   :  { %171 = vmatpush.bf16.msra.mxu2 %v242_v31  ;;  %44 = vperm.xlu0 %272, %v36_v46  }
  0x13   :  { %144 = vmatpush.bf16.msra.mxu0 %v222_v37  ;;  %158 = vmatpush.bf16.msra.mxu1 %v226_v38 }
  0x14   :  { %172 = vmatpush.bf16.msra.mxu2 %v230_v40 }
  0x17   :  { %145 = vmatpush.bf16.msra.mxu0 %v210_v47  ;;  %159 = vmatpush.bf16.msra.mxu1 %v214_v48 }
  0x18   :  { %173 = vmatpush.bf16.msra.mxu2 %v218_v49 }
  0x1a   :  { %255 = vmatmul.msk.bf16.vlgmr.msra.gmra.mxu0 %vm124_vm1, %v258_v50  ;;  %256 = vmatmul.msk.bf16.vlgmr.msra.gmra.mxu1 %vm124_vm1, %v258_v50 }
  0x1b   :  { %257 = vmatmul.msk.bf16.vlgmr.msra.gmra.mxu2 %vm124_vm1, %v258_v50 }
  0x7a   :  { %v40_v51 = vpop.permute.xlu0 %39 }
  0x82   :  { %v45_v60 = vpop.permute.xlu0 %44 }
  0x97   :  { %v147_v52 = vpop.f32.mrf.mxu0  ;;  %v161_v53 = vpop.f32.mrf.mxu1 }
  0x98   :  { %v148_v54 = vadd.f32 %v147_v52, %v40_v51  ;;  %v162_v55 = vadd.f32 %v161_v53, %v40_v51 }
  0x9a   :  { %v180_v56 = vmax.f32 %v148_v54, 0.0  ;;  %v181_v57 = vmax.f32 %v162_v55, 0.0 }
  0x9c   :  { %v186_v58 = vmin.f32 %v180_v56, 6.0  ;;  %v187_v59 = vmin.f32 %v181_v57, 6.0 }
  0x9e   :  { %192 = vst [vmem:[%s402_s3] sm:$0xff] %v186_v58  ;;  %v175_v61 = vpop.f32.mrf.mxu2 }
  0x9f   :  { %193 = vst [vmem:[%s402_s3 + $0x8] sm:$0xff] %v187_v59  ;;  %v176_v62 = vadd.f32 %v175_v61, %v40_v51  ;;  %v149_v63 = vpop.f32.mrf.mxu0  ;;  %v163_v0 = vpop.f32.mrf.mxu1 }
  0xa0   :  { %v150_v1 = vadd.f32 %v149_v63, %v45_v60  ;;  %v164_v2 = vadd.f32 %v163_v0, %v45_v60 }
  0xa1   :  { %v182_v3 = vmax.f32 %v176_v62, 0.0 }
  0xa2   :  { %v183_v4 = vmax.f32 %v150_v1, 0.0  ;;  %v184_v5 = vmax.f32 %v164_v2, 0.0 }
  0xa3   :  { %v188_v6 = vmin.f32 %v182_v3, 6.0 }
  0xa4   :  { %v189_v7 = vmin.f32 %v183_v4, 6.0  ;;  %v190_v8 = vmin.f32 %v184_v5, 6.0 }
  0xa5   :  { %195 = vst.msk [vmem:[%s402_s3 + $0x10] sm:$0xff] %vm194_vm2, %v188_v6 }
  0xa6   :  { %196 = vst [vmem:[%s402_s3 + $0x18] sm:$0xff] %v189_v7  ;;  %v177_v9 = vpop.f32.mrf.mxu2 }
  0xa7   :  { %197 = vst [vmem:[%s402_s3 + $0x20] sm:$0xff] %v190_v8  ;;  %v178_v10 = vadd.f32 %v177_v9, %v45_v60 }
  0xa9   :  { %v185_v11 = vmax.f32 %v178_v10, 0.0 }
  0xab   :  { %v191_v12 = vmin.f32 %v185_v11, 6.0 }
  0xad   :  { %198 = vst.msk [vmem:[%s402_s3 + $0x28] sm:$0xff] %vm194_vm2, %v191_v12 }

// kernel: gate_classifier_forward.13
= control target key start
LH: loop header
LB: loop body
LE: loop exit
PB: predicated region body
PF: predicated region fallthrough
CT: control target
= control target key end

     0   :  { %vm218_vm0 = vcmask 130048   ;;  %vm320_vm1 = vcmask 261120   ;;  %s708_s1 = inlined_call_operand.vmem [shape: bf16[144,288], index: 1, kind: input, shape index: {}]   ;;  %s709_s0 = inlined_call_operand.vmem [shape: bf16[16,144], index: 0, kind: input, shape index: {}]   ;;  %s710_s2 = inlined_call_operand.vmem [shape: f32[16,1], index: 2, kind: input, shape index: {}]   ;;  %s711_s3 = inlined_call_operand.vmem [shape: f32[16,288], index: 3, kind: output, shape index: {}]  }
   0x1   :  { %v423_v0 = vld [vmem:[%s708_s1 + $0xa8] sm:$0xf]  ;;  %v472_v1 = vld [vmem:[%s708_s1 + $0xb0] sm:$0xf0]  ;;  %v435_v2 = vld [vmem:[%s708_s1 + $0xc0] sm:$0xf] }
   0x2   :  { %v424_v3 = vor.u32 %v472_v1, %v423_v0  ;;  %v475_v4 = vld [vmem:[%s708_s1 + $0xc8] sm:$0xf0]  ;;  %v425_v6 = vld [vmem:[%s708_s1 + $0xb4] sm:$0xf0]  ;;  %v431_v9 = vld [vmem:[%s708_s1 + $0xb0] sm:$0xf] }
   0x3   :  { %v471_v5 = vld [vmem:[%s708_s1 + $0xac] sm:$0xf]  ;;  %v436_v7 = vor.u32 %v475_v4, %v435_v2  ;;  %v473_v10 = vld [vmem:[%s708_s1 + $0xb8] sm:$0xf0]  ;;  %v411_v11 = vld [vmem:[%s708_s1 + $0x90] sm:$0xf] }
   0x4   :  { %v428_v8 = vor.u32 %v471_v5, %v425_v6  ;;  %222 = vmatpush.bf16.msra.mxu0 %v424_v3  ;;  %v432_v12 = vor.u32 %v473_v10, %v431_v9  ;;  %v469_v13 = vld [vmem:[%s708_s1 + $0x98] sm:$0xf0]  ;;  %v468_v14 = vld [vmem:[%s708_s1 + $0x94] sm:$0xf]  ;;  %v413_v15 = vld [vmem:[%s708_s1 + $0x9c] sm:$0xf0] }
   0x5   :  { %243 = vmatpush.bf16.msra.mxu1 %v436_v7  ;;  %v412_v16 = vor.u32 %v469_v13, %v411_v11  ;;  %v416_v17 = vor.u32 %v468_v14, %v413_v15  ;;  %v419_v18 = vld [vmem:[%s708_s1 + $0x98] sm:$0xf]  ;;  %v470_v19 = vld [vmem:[%s708_s1 + $0xa0] sm:$0xf0]  ;;  %v437_v22 = vld [vmem:[%s708_s1 + $0xcc] sm:$0xf0] }
   0x6   :  { %250 = vmatpush.bf16.msra.mxu2 %v428_v8  ;;  %v474_v20 = vld [vmem:[%s708_s1 + $0xc4] sm:$0xf]  ;;  %v420_v21 = vor.u32 %v470_v19, %v419_v18  ;;  %v399_v23 = vld [vmem:[%s708_s1 + $0x78] sm:$0xf]  ;;  %v465_v26 = vld [vmem:[%s708_s1 + $0x7c] sm:$0xf] }
   0x7   :  { %v466_v24 = vld [vmem:[%s708_s1 + $0x80] sm:$0xf0]  ;;  %v440_v25 = vor.u32 %v474_v20, %v437_v22  ;;  %v401_v27 = vld [vmem:[%s708_s1 + $0x84] sm:$0xf0]  ;;  %v333_v30 = vld [vmem:[%s709_s0 + $0x8] sm:$0xf0] }
   0x8   :  { %v448_v28 = vld [vmem:[%s709_s0 + $0x4] sm:$0xf]  ;;  %223 = vmatpush.bf16.msra.mxu0 %v412_v16  ;;  %v400_v29 = vor.u32 %v466_v24, %v399_v23  ;;  %v407_v31 = vld [vmem:[%s708_s1 + $0x80] sm:$0xf]  ;;  %v467_v32 = vld [vmem:[%s708_s1 + $0x88] sm:$0xf0]  ;;  %v404_v33 = vor.u32 %v465_v26, %v401_v27 }
   0x9   :  { %278 = vmatpush.bf16.msrb.mxu1 %v432_v12  ;;  %271 = vmatpush.bf16.msra.mxu3 %v440_v25  ;;  %v572_v34 = vor.u32 %v448_v28, %v333_v30  ;;  %v387_v35 = vld [vmem:[%s708_s1 + $0x60] sm:$0xf]  ;;  %v463_v36 = vld [vmem:[%s708_s1 + $0x68] sm:$0xf0]  ;;  %v408_v37 = vor.u32 %v467_v32, %v407_v31  ;;  %v462_v38 = vld [vmem:[%s708_s1 + $0x64] sm:$0xf] }
   0xa   :  { %251 = vmatpush.bf16.msra.mxu2 %v416_v17  ;;  %v389_v39 = vld [vmem:[%s708_s1 + $0x6c] sm:$0xf0]  ;;  %v395_v40 = vld [vmem:[%s708_s1 + $0x68] sm:$0xf]  ;;  %v464_v41 = vld [vmem:[%s708_s1 + $0x70] sm:$0xf0]  ;;  %v388_v42 = vor.u32 %v463_v36, %v387_v35 }
   0xb   :  { %445 = vmatmul.msk.bf16.vlgmr.msra.gmra.mxu1 %vm218_vm0, %v572_v34  ;;  %v375_v43 = vld [vmem:[%s708_s1 + $0x48] sm:$0xf]  ;;  %v392_v44 = vor.u32 %v462_v38, %v389_v39  ;;  %v460_v45 = vld [vmem:[%s708_s1 + $0x50] sm:$0xf0]  ;;  %v396_v48 = vor.u32 %v464_v41, %v395_v40  ;;  %v459_v49 = vld [vmem:[%s708_s1 + $0x4c] sm:$0xf] }
   0xc   :  { %224 = vmatpush.bf16.msra.mxu0 %v400_v29  ;;  %446 = vmatmul.msk.bf16.vlgmr.msra.gmra.mxu3 %vm218_vm0, %v572_v34  ;;  %v443_v46 = vld [vmem:[%s708_s1 + $0xc8] sm:$0xf]  ;;  %v476_v47 = vld [vmem:[%s708_s1 + $0xd0] sm:$0xf0]  ;;  %v377_v50 = vld [vmem:[%s708_s1 + $0x54] sm:$0xf0]  ;;  %v376_v54 = vor.u32 %v460_v45, %v375_v43 }
   0xd   :  { %279 = vmatpush.bf16.msrb.mxu1 %v420_v21  ;;  %v444_v51 = vor.u32 %v476_v47, %v443_v46  ;;  %v383_v52 = vld [vmem:[%s708_s1 + $0x50] sm:$0xf]  ;;  %v461_v53 = vld [vmem:[%s708_s1 + $0x58] sm:$0xf0]  ;;  %v380_v55 = vor.u32 %v459_v49, %v377_v50  ;;  %v456_v59 = vld [vmem:[%s708_s1 + $0x34] sm:$0xf] }
   0xe   :  { %252 = vmatpush.bf16.msra.mxu2 %v404_v33  ;;  %v363_v56 = vld [vmem:[%s708_s1 + $0x30] sm:$0xf]  ;;  %v457_v57 = vld [vmem:[%s708_s1 + $0x38] sm:$0xf0]  ;;  %v384_v58 = vor.u32 %v461_v53, %v383_v52  ;;  %v365_v60 = vld [vmem:[%s708_s1 + $0x3c] sm:$0xf0] }
   0xf   :  { %299 = vmatpush.bf16.msrb.mxu3 %v444_v51  ;;  %v371_v61 = vld [vmem:[%s708_s1 + $0x38] sm:$0xf]  ;;  %v458_v62 = vld [vmem:[%s708_s1 + $0x40] sm:$0xf0]  ;;  %v364_v63 = vor.u32 %v457_v57, %v363_v56  ;;  %v368_v1 = vor.u32 %v456_v59, %v365_v60  ;;  %v479_v4 = vmov 0   ;;  %v54_v19 = vld [vmem:[%s710_s2 + $0x8] sm:$0xff] }
  0x10   :  { %225 = vmatpush.bf16.msra.mxu0 %v388_v42  ;;  %v53_v0 = vld [vmem:[%s710_s2] sm:$0xff]  ;;  %v351_v2 = vld [vmem:[%s708_s1 + $0x18] sm:$0xf]  ;;  %478 = vset.pattern.permute.xlu0 %v479_v4  ;;  %v372_v5 = vor.u32 %v458_v62, %v371_v61  ;;  %v453_v6 = vld [vmem:[%s708_s1 + $0x1c] sm:$0xf] }
  0x11   :  { %280 = vmatpush.bf16.msrb.mxu1 %v408_v37  ;;  %v454_v3 = vld [vmem:[%s708_s1 + $0x20] sm:$0xf0]  ;;  %v353_v7 = vld [vmem:[%s708_s1 + $0x24] sm:$0xf0]  ;;  %57 = vperm.xlu0 %478, %v53_v0   ;;  %v359_v8 = vld [vmem:[%s708_s1 + $0x20] sm:$0xf] }
  0x12   :  { %253 = vmatpush.bf16.msra.mxu2 %v392_v44  ;;  %v455_v9 = vld [vmem:[%s708_s1 + $0x28] sm:$0xf0]  ;;  %v352_v10 = vor.u32 %v454_v3, %v351_v2  ;;  %v356_v11 = vor.u32 %v453_v6, %v353_v7  ;;  %v339_v12 = vld [vmem:[%s708_s1] sm:$0xf]  ;;  %v450_v15 = vld [vmem:[%s708_s1 + $0x4] sm:$0xf] }
  0x13   :  { %v451_v13 = vld [vmem:[%s708_s1 + $0x8] sm:$0xf0]  ;;  %v360_v14 = vor.u32 %v455_v9, %v359_v8  ;;  %v341_v16 = vld [vmem:[%s708_s1 + $0xc] sm:$0xf0]  ;;  %v347_v17 = vld [vmem:[%s708_s1 + $0x8] sm:$0xf] }
  0x14   :  { %226 = vmatpush.bf16.msra.mxu0 %v376_v54  ;;  %v452_v18 = vld [vmem:[%s708_s1 + $0x10] sm:$0xf0]  ;;  %v340_v20 = vor.u32 %v451_v13, %v339_v12  ;;  %v331_v21 = vld [vmem:[%s709_s0] sm:$0xf]  ;;  %v449_v22 = vld [vmem:[%s709_s0 + $0x4] sm:$0xf0]  ;;  %v344_v23 = vor.u32 %v450_v15, %v341_v16 }
  0x15   :  { %281 = vmatpush.bf16.msrb.mxu1 %v396_v48  ;;  %v348_v24 = vor.u32 %v452_v18, %v347_v17  ;;  %v332_v25 = vor.u32 %v449_v22, %v331_v21 }
  0x16   :  { %254 = vmatpush.bf16.msra.mxu2 %v380_v55 }
  0x18   :  { %227 = vmatpush.bf16.msra.mxu0 %v364_v63 }
  0x19   :  { %282 = vmatpush.bf16.msrb.mxu1 %v384_v58  ;;  %62 = vperm.xlu0 %478, %v54_v19  }
  0x1a   :  { %255 = vmatpush.bf16.msra.mxu2 %v368_v1 }
  0x1c   :  { %228 = vmatpush.bf16.msra.mxu0 %v352_v10  ;;  %447 = vmatmul.msk.bf16.vlgmr.msrb.gmra.mxu3 %vm218_vm0, %v572_v34 }
  0x1d   :  { %283 = vmatpush.bf16.msrb.mxu1 %v372_v5 }
  0x1e   :  { %256 = vmatpush.bf16.msra.mxu2 %v356_v11 }
  0x20   :  { %229 = vmatpush.bf16.msra.mxu0 %v340_v20 }
  0x21   :  { %284 = vmatpush.bf16.msrb.mxu1 %v360_v14 }
  0x22   :  { %257 = vmatpush.bf16.msra.mxu2 %v344_v23 }
  0x23   :  { %230 = vmatmul.bf16.vlgmr.msra.gmra.mxu0 %v332_v25 }
  0x25   :  { %285 = vmatpush.bf16.msrb.mxu1 %v348_v24  ;;  %258 = vmatmul.bf16.vlgmr.msra.gmra.mxu2 %v332_v25 }
  0x28   :  { %286 = vmatmul.bf16.vlgmr.msrb.gmra.mxu1 %v332_v25 }
  0x83   :  { %v58_v30 = vpop.permute.xlu0 %57 }
  0x88   :  { %v245_v27 = vpop.f32.mrf.mxu1 }
  0x8b   :  { %v63_v42 = vpop.permute.xlu0 %62 }
  0x8f   :  { %v273_v26 = vpop.f32.mrf.mxu3 }
  0x90   :  { %v247_v29 = vpop.f32.mrf.mxu1 }
  0x97   :  { %v275_v28 = vpop.f32.mrf.mxu3 }
  0x9f   :  { %v301_v33 = vpop.f32.mrf.mxu3 }
  0xa0   :  { %v231_v31 = vpop.f32.mrf.mxu0 }
  0xa1   :  { %v232_v32 = vadd.f32 %v231_v31, %v58_v30 }
  0xa3   :  { %v246_v35 = vadd.f32 %v245_v27, %v232_v32 }
  0xa5   :  { %v287_v34 = vpop.f32.mrf.mxu1  ;;  %v306_v37 = vmax.f32 %v246_v35, 0.0 }
  0xa6   :  { %v288_v36 = vadd.f32 %v287_v34, %v58_v30 }
  0xa7   :  { %v312_v39 = vmin.f32 %v306_v37, 6.0  ;;  %v303_v52 = vpop.f32.mrf.mxu3 }
  0xa8   :  { %v302_v38 = vadd.f32 %v301_v33, %v288_v36  ;;  %v259_v41 = vpop.f32.mrf.mxu2  ;;  %v233_v44 = vpop.f32.mrf.mxu0 }
  0xa9   :  { %v260_v43 = vadd.f32 %v259_v41, %v58_v30  ;;  %318 = vst [vmem:[%s711_s3] sm:$0xff] %v312_v39  ;;  %v234_v46 = vadd.f32 %v233_v44, %v63_v42 }
  0xaa   :  { %v308_v40 = vmax.f32 %v302_v38, 0.0 }
  0xab   :  { %v274_v47 = vadd.f32 %v273_v26, %v260_v43  ;;  %v248_v49 = vadd.f32 %v247_v29, %v234_v46 }
  0xac   :  { %v314_v45 = vmin.f32 %v308_v40, 6.0 }
  0xad   :  { %v289_v48 = vpop.f32.mrf.mxu1  ;;  %v307_v51 = vmax.f32 %v274_v47, 0.0  ;;  %v309_v53 = vmax.f32 %v248_v49, 0.0 }
  0xae   :  { %321 = vst.msk [vmem:[%s711_s3 + $0x10] sm:$0xff] %vm320_vm1, %v314_v45  ;;  %v290_v50 = vadd.f32 %v289_v48, %v63_v42 }
  0xaf   :  { %v313_v55 = vmin.f32 %v307_v51, 6.0  ;;  %v315_v56 = vmin.f32 %v309_v53, 6.0 }
  0xb0   :  { %v304_v54 = vadd.f32 %v303_v52, %v290_v50  ;;  %v261_v58 = vpop.f32.mrf.mxu2 }
  0xb1   :  { %319 = vst [vmem:[%s711_s3 + $0x8] sm:$0xff] %v313_v55  ;;  %v262_v59 = vadd.f32 %v261_v58, %v63_v42 }
  0xb2   :  { %v311_v57 = vmax.f32 %v304_v54, 0.0  ;;  %322 = vst [vmem:[%s711_s3 + $0x18] sm:$0xff] %v315_v56 }
  0xb3   :  { %v276_v61 = vadd.f32 %v275_v28, %v262_v59 }
  0xb4   :  { %v317_v60 = vmin.f32 %v311_v57, 6.0 }
  0xb5   :  { %v310_v62 = vmax.f32 %v276_v61, 0.0 }
  0xb6   :  { %324 = vst.msk [vmem:[%s711_s3 + $0x28] sm:$0xff] %vm320_vm1, %v317_v60 }
  0xb7   :  { %v316_v63 = vmin.f32 %v310_v62, 6.0 }
  0xb9   :  { %323 = vst [vmem:[%s711_s3 + $0x20] sm:$0xff] %v316_v63 }

// kernel: gate_classifier_forward.14
= control target key start
LH: loop header
LB: loop body
LE: loop exit
PB: predicated region body
PF: predicated region fallthrough
CT: control target
= control target key end

     0   :  { %v273_v6 = vmov 0   ;;  %vm133_vm0 = vcmask 130048   ;;  %vm186_vm1 = vcmask 588800   ;;  %s375_s1 = inlined_call_operand.vmem [shape: bf16[144,72], index: 1, kind: input, shape index: {}]   ;;  %s376_s0 = inlined_call_operand.vmem [shape: bf16[32,144], index: 0, kind: input, shape index: {}]   ;;  %s377_s2 = inlined_call_operand.vmem [shape: f32[32,1], index: 2, kind: input, shape index: {}]   ;;  %s378_s3 = inlined_call_operand.vmem [shape: f32[32,72], index: 3, kind: output, shape index: {}]  }
   0x1   :  { %v260_v0 = vld [vmem:[%s375_s1 + $0x38] sm:$0xff]  ;;  %v261_v1 = vld [vmem:[%s375_s1 + $0x40] sm:$0xff]  ;;  %v259_v3 = vld [vmem:[%s375_s1 + $0x30] sm:$0xff]  ;;  %272 = vset.pattern.permute.xlu1 %v273_v6  ;;  %271 = vset.pattern.permute.xlu0 %v273_v6 }
   0x2   :  { %v249_v2 = vld [vmem:[%s376_s0 + $0x4] sm:$0xf]  ;;  %140 = vmatpush.bf16.msra.mxu0 %v260_v0  ;;  %262 = vmatpush.bf16.msra.mxu2 %v260_v0  ;;  %v199_v4 = vld [vmem:[%s376_s0 + $0x8] sm:$0xf0]  ;;  %v39_v7 = vld [vmem:[%s377_s2 + $0x10] sm:$0xff] }
   0x3   :  { %166 = vmatpush.bf16.msra.mxu1 %v261_v1  ;;  %v202_v5 = vor.u32 %v249_v2, %v199_v4  ;;  %v258_v8 = vld [vmem:[%s375_s1 + $0x28] sm:$0xff]  ;;  %v37_v9 = vld [vmem:[%s377_s2] sm:$0xff]  ;;  %53 = vperm.xlu1 %272, %v39_v7   ;;  %v40_v11 = vld [vmem:[%s377_s2 + $0x18] sm:$0xff] }
   0x4   :  { %43 = vperm.xlu0 %271, %v37_v9   ;;  %v257_v10 = vld [vmem:[%s375_s1 + $0x20] sm:$0xff]  ;;  %v38_v12 = vld [vmem:[%s377_s2 + $0x8] sm:$0xff]  ;;  %v256_v13 = vld [vmem:[%s375_s1 + $0x18] sm:$0xff] }
   0x5   :  { %v251_v14 = vld [vmem:[%s376_s0 + $0x14] sm:$0xf]  ;;  %v207_v15 = vld [vmem:[%s376_s0 + $0x18] sm:$0xf0]  ;;  %v254_v18 = vld [vmem:[%s375_s1 + $0x8] sm:$0xff] }
   0x6   :  { %141 = vmatpush.bf16.msra.mxu0 %v259_v3  ;;  %263 = vmatpush.bf16.msra.mxu2 %v259_v3  ;;  %v255_v16 = vld [vmem:[%s375_s1 + $0x10] sm:$0xff]  ;;  %v210_v17 = vor.u32 %v251_v14, %v207_v15  ;;  %v253_v19 = vld [vmem:[%s375_s1] sm:$0xff]  ;;  %v250_v21 = vld [vmem:[%s376_s0 + $0x4] sm:$0xf0] }
   0x7   :  { %247 = vmatmul.msk.bf16.vlgmr.msra.gmra.mxu1 %vm133_vm0, %v202_v5  ;;  %v197_v20 = vld [vmem:[%s376_s0] sm:$0xf]  ;;  %v205_v22 = vld [vmem:[%s376_s0 + $0x10] sm:$0xf]  ;;  %v252_v23 = vld [vmem:[%s376_s0 + $0x14] sm:$0xf0] }
   0x8   :  { %v198_v24 = vor.u32 %v250_v21, %v197_v20  ;;  %v206_v25 = vor.u32 %v252_v23, %v205_v22 }
   0xa   :  { %142 = vmatpush.bf16.msra.mxu0 %v258_v8  ;;  %264 = vmatpush.bf16.msra.mxu2 %v258_v8 }
   0xb   :  { %58 = vperm.xlu1 %272, %v40_v11  }
   0xc   :  { %48 = vperm.xlu0 %271, %v38_v12  }
   0xe   :  { %143 = vmatpush.bf16.msra.mxu0 %v257_v10  ;;  %265 = vmatpush.bf16.msra.mxu2 %v257_v10 }
  0x12   :  { %144 = vmatpush.bf16.msra.mxu0 %v256_v13  ;;  %266 = vmatpush.bf16.msra.mxu2 %v256_v13 }
  0x16   :  { %145 = vmatpush.bf16.msra.mxu0 %v255_v16  ;;  %267 = vmatpush.bf16.msra.mxu2 %v255_v16 }
  0x17   :  { %248 = vmatmul.msk.bf16.gmra.mxu1 %vm133_vm0, %v210_v17 }
  0x1a   :  { %146 = vmatpush.bf16.msra.mxu0 %v254_v18  ;;  %268 = vmatpush.bf16.msra.mxu2 %v254_v18 }
  0x1e   :  { %147 = vmatpush.bf16.msra.mxu0 %v253_v19  ;;  %269 = vmatpush.bf16.msra.mxu2 %v253_v19 }
  0x21   :  { %148 = vmatmul.bf16.vlgmr.msra.gmra.mxu0 %v198_v24  ;;  %153 = vmatmul.bf16.vlgmr.msra.gmra.mxu2 %v206_v25 }
  0x75   :  { %v54_v32 = vpop.permute.xlu1 %53 }
  0x76   :  { %v44_v28 = vpop.permute.xlu0 %43 }
  0x7d   :  { %v59_v46 = vpop.permute.xlu1 %58 }
  0x7e   :  { %v49_v38 = vpop.permute.xlu0 %48 }
  0x84   :  { %v168_v26 = vpop.f32.mrf.mxu1 }
  0x8c   :  { %v170_v27 = vpop.f32.mrf.mxu1 }
  0x94   :  { %v173_v34 = vpop.f32.mrf.mxu1 }
  0x9c   :  { %v175_v50 = vpop.f32.mrf.mxu1 }
  0x9e   :  { %v149_v29 = vpop.f32.mrf.mxu0 }
  0x9f   :  { %v150_v30 = vadd.f32 %v149_v29, %v44_v28 }
  0xa1   :  { %v169_v31 = vadd.f32 %v168_v26, %v150_v30 }
  0xa3   :  { %v178_v33 = vmax.f32 %v169_v31, 0.0 }
  0xa4   :  { %v154_v35 = vpop.f32.mrf.mxu2 }
  0xa5   :  { %v182_v36 = vmin.f32 %v178_v33, 6.0  ;;  %v155_v37 = vadd.f32 %v154_v35, %v54_v32 }
  0xa6   :  { %v151_v39 = vpop.f32.mrf.mxu0 }
  0xa7   :  { %187 = vst.msk [vmem:[%s378_s3] sm:$0xff] %vm186_vm1, %v182_v36  ;;  %v174_v40 = vadd.f32 %v173_v34, %v155_v37  ;;  %v152_v41 = vadd.f32 %v151_v39, %v49_v38 }
  0xa9   :  { %v180_v42 = vmax.f32 %v174_v40, 0.0  ;;  %v171_v43 = vadd.f32 %v170_v27, %v152_v41 }
  0xab   :  { %v184_v44 = vmin.f32 %v180_v42, 6.0  ;;  %v179_v45 = vmax.f32 %v171_v43, 0.0 }
  0xac   :  { %v156_v47 = vpop.f32.mrf.mxu2 }
  0xad   :  { %189 = vst.msk [vmem:[%s378_s3 + $0x10] sm:$0xff] %vm186_vm1, %v184_v44  ;;  %v183_v48 = vmin.f32 %v179_v45, 6.0  ;;  %v157_v49 = vadd.f32 %v156_v47, %v59_v46 }
  0xaf   :  { %188 = vst.msk [vmem:[%s378_s3 + $0x8] sm:$0xff] %vm186_vm1, %v183_v48  ;;  %v176_v51 = vadd.f32 %v175_v50, %v157_v49 }
  0xb1   :  { %v181_v52 = vmax.f32 %v176_v51, 0.0 }
  0xb3   :  { %v185_v53 = vmin.f32 %v181_v52, 6.0 }
  0xb5   :  { %190 = vst.msk [vmem:[%s378_s3 + $0x18] sm:$0xff] %vm186_vm1, %v185_v53 }

// kernel: tile.7
= control target key start
LH: loop header
LB: loop body
LE: loop exit
PB: predicated region body
PF: predicated region fallthrough
CT: control target
= control target key end

     0   :  { %vm132_vm0 = vcmask 1047556   ;;  %s244_s15 = smov 36   ;;  %vm134_vm1 = vcmask 293888   ;;  %vm171_vm2 = vcmask 589088   ;;  %s387_s0 = inlined_call_operand.vmem [shape: f32[32,2,36], index: 0, kind: input, shape index: {}]   ;;  %s388_s1 = inlined_call_operand.vmem [shape: f32[32,72], index: 1, kind: output, shape index: {}]  }
   0x1   :  { %v230_v0 = vld [vmem:[%s387_s0 + $0xe] sm:$0x3]  ;;  %v231_v1 = vld [vmem:[%s387_s0 + $0xc] sm:$0x3]  ;;  %v232_v2 = vld [vmem:[%s387_s0 + $0xa] sm:$0x3] }
   0x2   :  { %103 = vst [vmem:[#allocation0 + $0x38] sm:$0x3] %v230_v0  ;;  %v233_v3 = vld [vmem:[%s387_s0 + $0x8] sm:$0x3]  ;;  %v234_v4 = vld [vmem:[%s387_s0 + $0x6] sm:$0x3] }
   0x3   :  { %107 = vst [vmem:[#allocation0 + $0x30] sm:$0x3] %v231_v1  ;;  %v235_v5 = vld [vmem:[%s387_s0 + $0x4] sm:$0x3]  ;;  %v236_v6 = vld [vmem:[%s387_s0 + $0x2] sm:$0x3] }
   0x4   :  { %111 = vst [vmem:[#allocation0 + $0x28] sm:$0x3] %v232_v2  ;;  %v128_v7 = vld [vmem:[%s387_s0] sm:$0x3]  ;;  %v214_v8 = vld [vmem:[%s387_s0 + $0x2e] sm:$0x3] }
   0x5   :  { %115 = vst [vmem:[#allocation0 + $0x20] sm:$0x3] %v233_v3  ;;  %v215_v9 = vld [vmem:[%s387_s0 + $0x2c] sm:$0x3]  ;;  %v216_v10 = vld [vmem:[%s387_s0 + $0x2a] sm:$0x3] }
   0x6   :  { %119 = vst [vmem:[#allocation0 + $0x18] sm:$0x3] %v234_v4  ;;  %v217_v11 = vld [vmem:[%s387_s0 + $0x28] sm:$0x3]  ;;  %v218_v12 = vld [vmem:[%s387_s0 + $0x26] sm:$0x3] }
   0x7   :  { %123 = vst [vmem:[#allocation0 + $0x10] sm:$0x3] %v235_v5  ;;  %v219_v13 = vld [vmem:[%s387_s0 + $0x24] sm:$0x3]  ;;  %v220_v14 = vld [vmem:[%s387_s0 + $0x22] sm:$0x3] }
   0x8   :  { %127 = vst [vmem:[#allocation0 + $0x8] sm:$0x3] %v236_v6  ;;  %v221_v15 = vld [vmem:[%s387_s0 + $0x20] sm:$0x3]  ;;  %v222_v17 = vld [vmem:[%s387_s0 + $0x1e] sm:$0x3] }
   0x9   :  { %129 = vst [vmem:[#allocation0] sm:$0x3] %v128_v7  ;;  %v223_v18 = vld [vmem:[%s387_s0 + $0x1c] sm:$0x3]  ;;  %v224_v21 = vld [vmem:[%s387_s0 + $0x1a] sm:$0x3] }
   0xa   :  { %39 = vst [vmem:[#allocation0 + $0xb8] sm:$0x3] %v214_v8  ;;  %v225_v22 = vld [vmem:[%s387_s0 + $0x18] sm:$0x3]  ;;  %v226_v23 = vld [vmem:[%s387_s0 + $0x16] sm:$0x3] }
   0xb   :  { %43 = vst [vmem:[#allocation0 + $0xb0] sm:$0x3] %v215_v9  ;;  %v227_v24 = vld [vmem:[%s387_s0 + $0x14] sm:$0x3]  ;;  %v228_v25 = vld [vmem:[%s387_s0 + $0x12] sm:$0x3] }
   0xc   :  { %47 = vst [vmem:[#allocation0 + $0xa8] sm:$0x3] %v216_v10  ;;  %v166_v16 = vld [vmem:[#allocation0 + $0x1] ss:$8 sm:$0xf0]  }
   0xd   :  { %51 = vst [vmem:[#allocation0 + $0xa0] sm:$0x3] %v217_v11  ;;  %v229_v26 = vld [vmem:[%s387_s0 + $0x10] sm:$0x3]  ;;  %v206_v28 = vld [vmem:[%s387_s0 + $0x3e] sm:$0x3] }
   0xe   :  { %55 = vst [vmem:[#allocation0 + $0x98] sm:$0x3] %v218_v12  ;;  %v207_v29 = vld [vmem:[%s387_s0 + $0x3c] sm:$0x3]  ;;  %v208_v32 = vld [vmem:[%s387_s0 + $0x3a] sm:$0x3] }
   0xf   :  { %59 = vst [vmem:[#allocation0 + $0x90] sm:$0x3] %v219_v13  ;;  %v209_v33 = vld [vmem:[%s387_s0 + $0x38] sm:$0x3]  ;;  %v210_v34 = vld [vmem:[%s387_s0 + $0x36] sm:$0x3] }
  0x10   :  { %v164_v19 = vld [vmem:[#allocation0 + $0x1] ss:$8 sm:$0xf]   ;;  %63 = vst [vmem:[#allocation0 + $0x88] sm:$0x3] %v220_v14 }
  0x11   :  { %v168_v20 = vsel %vm132_vm0, %v166_v16, %v164_v19  ;;  %67 = vst [vmem:[#allocation0 + $0x80] sm:$0x3] %v221_v15  ;;  %v211_v35 = vld [vmem:[%s387_s0 + $0x34] sm:$0x3]  ;;  %v212_v36 = vld [vmem:[%s387_s0 + $0x32] sm:$0x3] }
  0x12   :  { %169 = vrot.lane.b32.xlu0 %v168_v20, %s244_s15  ;;  %71 = vst [vmem:[#allocation0 + $0x78] sm:$0x3] %v222_v17  ;;  %v213_v37 = vld [vmem:[%s387_s0 + $0x30] sm:$0x3] }
  0x13   :  { %75 = vst [vmem:[#allocation0 + $0x70] sm:$0x3] %v223_v18  ;;  %v130_v44 = vld [vmem:[#allocation0] ss:$8 sm:$0xf]  }
  0x14   :  { %79 = vst [vmem:[#allocation0 + $0x68] sm:$0x3] %v224_v21  ;;  %v187_v27 = vld [vmem:[#allocation0 + $0x81] ss:$8 sm:$0xf0]  }
  0x15   :  { %83 = vst [vmem:[#allocation0 + $0x60] sm:$0x3] %v225_v22  ;;  %v131_v45 = vld [vmem:[#allocation0] ss:$8 sm:$0xf0]  }
  0x16   :  { %87 = vst [vmem:[#allocation0 + $0x58] sm:$0x3] %v226_v23  ;;  %v133_v46 = vsel %vm132_vm0, %v131_v45, %v130_v44  ;;  %v148_v48 = vld [vmem:[#allocation0 + $0x80] ss:$8 sm:$0xf0]  }
  0x17   :  { %91 = vst [vmem:[#allocation0 + $0x50] sm:$0x3] %v227_v24 }
  0x18   :  { %v185_v30 = vld [vmem:[#allocation0 + $0x81] ss:$8 sm:$0xf]   ;;  %95 = vst [vmem:[#allocation0 + $0x48] sm:$0x3] %v228_v25 }
  0x19   :  { %v189_v31 = vsel %vm132_vm0, %v187_v27, %v185_v30  ;;  %99 = vst [vmem:[#allocation0 + $0x40] sm:$0x3] %v229_v26  ;;  %v146_v47 = vld [vmem:[#allocation0 + $0x80] ss:$8 sm:$0xf]  }
  0x1a   :  { %190 = vrot.lane.b32.xlu1 %v189_v31, %s244_s15  ;;  %7 = vst [vmem:[#allocation0 + $0xf8] sm:$0x3] %v206_v28  ;;  %v150_v49 = vsel %vm132_vm0, %v148_v48, %v146_v47 }
  0x1b   :  { %11 = vst [vmem:[#allocation0 + $0xf0] sm:$0x3] %v207_v29 }
  0x1c   :  { %15 = vst [vmem:[#allocation0 + $0xe8] sm:$0x3] %v208_v32  ;;  %v176_v38 = vld [vmem:[#allocation0 + $0x41] ss:$8 sm:$0xf0]  }
  0x1d   :  { %19 = vst [vmem:[#allocation0 + $0xe0] sm:$0x3] %v209_v33  ;;  %v139_v51 = vld [vmem:[#allocation0 + $0x40] ss:$8 sm:$0xf0]  }
  0x1e   :  { %23 = vst [vmem:[#allocation0 + $0xd8] sm:$0x3] %v210_v34 }
  0x1f   :  { %27 = vst [vmem:[#allocation0 + $0xd0] sm:$0x3] %v211_v35 }
  0x20   :  { %v174_v39 = vld [vmem:[#allocation0 + $0x41] ss:$8 sm:$0xf]   ;;  %31 = vst [vmem:[#allocation0 + $0xc8] sm:$0x3] %v212_v36 }
  0x21   :  { %v178_v40 = vsel %vm132_vm0, %v176_v38, %v174_v39  ;;  %35 = vst [vmem:[#allocation0 + $0xc0] sm:$0x3] %v213_v37  ;;  %v137_v50 = vld [vmem:[#allocation0 + $0x40] ss:$8 sm:$0xf]  }
  0x22   :  { %179 = vrot.lane.b32.xlu0 %v178_v40, %s244_s15  ;;  %135 = vst.msk [vmem:[%s388_s1] sm:$0xff] %vm134_vm1, %v133_v46   ;;  %v141_v52 = vsel %vm132_vm0, %v139_v51, %v137_v50 }
  0x23   :  { %238 = vst.msk [vmem:[%s388_s1 + $0x10] sm:$0xff] %vm134_vm1, %v150_v49  }
  0x24   :  { %v198_v41 = vld [vmem:[#allocation0 + $0xc1] ss:$8 sm:$0xf0]   ;;  %237 = vst.msk [vmem:[%s388_s1 + $0x8] sm:$0xff] %vm134_vm1, %v141_v52  }
  0x25   :  { %v157_v54 = vld [vmem:[#allocation0 + $0xc0] ss:$8 sm:$0xf0]  }
  0x28   :  { %v196_v42 = vld [vmem:[#allocation0 + $0xc1] ss:$8 sm:$0xf]   ;;  %v155_v53 = vld [vmem:[#allocation0 + $0xc0] ss:$8 sm:$0xf]  }
  0x29   :  { %v200_v43 = vsel %vm132_vm0, %v198_v41, %v196_v42  ;;  %v159_v55 = vsel %vm132_vm0, %v157_v54, %v155_v53 }
  0x2a   :  { %201 = vrot.lane.b32.xlu1 %v200_v43, %s244_s15  ;;  %239 = vst.msk [vmem:[%s388_s1 + $0x18] sm:$0xff] %vm134_vm1, %v159_v55  }
  0x84   :  { %v170_v56 = vpop.permute.xlu0 %169  }
  0x85   :  { %172 = vst.msk [vmem:[%s388_s1] sm:$0xff] %vm171_vm2, %v170_v56  }
  0x8c   :  { %v191_v57 = vpop.permute.xlu1 %190  }
  0x8d   :  { %241 = vst.msk [vmem:[%s388_s1 + $0x10] sm:$0xff] %vm171_vm2, %v191_v57  }
  0x94   :  { %v180_v58 = vpop.permute.xlu0 %179  }
  0x95   :  { %240 = vst.msk [vmem:[%s388_s1 + $0x8] sm:$0xff] %vm171_vm2, %v180_v58  }
  0x9c   :  { %v202_v59 = vpop.permute.xlu1 %201  }
  0x9d   :  { %242 = vst.msk [vmem:[%s388_s1 + $0x18] sm:$0xff] %vm171_vm2, %v202_v59  }

// kernel: gate_classifier_forward.15
= control target key start
LH: loop header
LB: loop body
LE: loop exit
PB: predicated region body
PF: predicated region fallthrough
CT: control target
= control target key end

     0   :  { %s761_s0 = inlined_call_operand.vmem [shape: bf16[32,288], index: 0, kind: input, shape index: {}]   ;;  %s762_s1 = inlined_call_operand.vmem [shape: bf16[288,72], index: 1, kind: input, shape index: {}]   ;;  %s763_s2 = inlined_call_operand.vmem [shape: f32[32,1], index: 2, kind: input, shape index: {}]   ;;  %s764_s3 = inlined_call_operand.vmem [shape: f32[32,72], index: 3, kind: input, shape index: {}]   ;;  %s765_s4 = inlined_call_operand.vmem [shape: f32[72,2], index: 4, kind: input, shape index: {}]   ;;  %s766_s5 = inlined_call_operand.<no memory space> [shape: f32[1,1], index: 5, kind: input, shape index: {}]   ;;  %s767_s6 = inlined_call_operand.hbm [shape: f32[1,2], index: 6, kind: output, shape index: {}]  }
   0x1   :  { %v11_v0 = vstv %s766_s5 }
   0x2   :  { %12 = vst [vmem:[#allocation2] sm:$0x1] %v11_v0 }
   0x3   :  { %v516_v1 = vld [vmem:[%s762_s1 + $0x38] sm:$0xff]  ;;  %v515_v3 = vld [vmem:[%s762_s1 + $0x30] sm:$0xff]  ;;  %v526_v4 = vld [vmem:[%s762_s1 + $0x88] sm:$0xff]  ;;  %v570_v6 = vmov 0   ;;  %vm233_vm0 = vcmask 261120  }
   0x4   :  { %v524_v2 = vld [vmem:[%s762_s1 + $0x78] sm:$0xff]  ;;  %240 = vmatpush.bf16.msra.mxu0 %v516_v1  ;;  %527 = vmatpush.bf16.msra.mxu3 %v516_v1  ;;  %v523_v5 = vld [vmem:[%s762_s1 + $0x70] sm:$0xff]  ;;  %v525_v7 = vld [vmem:[%s762_s1 + $0x80] sm:$0xff] }
   0x5   :  { %259 = vmatpush.bf16.msra.mxu1 %v524_v2  ;;  %537 = vset.pattern.permute.xlu0 %v570_v6  ;;  %v413_v8 = vld [vmem:[%s761_s0 + $0x8] sm:$0xf]  ;;  %v505_v9 = vld [vmem:[%s761_s0 + $0x10] sm:$0xf0]  ;;  %v71_v13 = vld [vmem:[%s763_s2] sm:$0xff] }
   0x6   :  { %284 = vmatpush.bf16.msra.mxu2 %v526_v4  ;;  %538 = vset.pattern.permute.xlu1 %v570_v6  ;;  %v514_v10 = vld [vmem:[%s762_s1 + $0x28] sm:$0xff]  ;;  %v414_v12 = vor.u32 %v505_v9, %v413_v8  ;;  %v513_v14 = vld [vmem:[%s762_s1 + $0x20] sm:$0xff] }
   0x7   :  { %539 = vset.pattern.permute.xlu2 %v570_v6  ;;  %v522_v11 = vld [vmem:[%s762_s1 + $0x68] sm:$0xff] }
   0x8   :  { %241 = vmatpush.bf16.msra.mxu0 %v515_v3  ;;  %528 = vmatpush.bf16.msra.mxu3 %v515_v3 }
   0x9   :  { %260 = vmatpush.bf16.msra.mxu1 %v523_v5 }
   0xa   :  { %285 = vmatpush.bf16.msra.mxu2 %v525_v7 }
   0xc   :  { %242 = vmatpush.bf16.msra.mxu0 %v514_v10  ;;  %529 = vmatpush.bf16.msra.mxu3 %v514_v10 }
   0xd   :  { %13 = vsyncpa [#allocation4], 0  ;;  %261 = vmatpush.bf16.msra.mxu1 %v522_v11  ;;  %v521_v15 = vld [vmem:[%s762_s1 + $0x60] sm:$0xff]  ;;  %499 = vmatmul.msk.bf16.vlgmr.msra.gmra.mxu2 %vm233_vm0, %v414_v12  ;;  %v512_v16 = vld [vmem:[%s762_s1 + $0x18] sm:$0xff]  ;;  %vm313_vm1 = vcmask 588800   ;;  %s394_s14 = sshll.u32 %s767_s6, 4  ;;  %s395_s14 = int_to_ptr.hbm [resolvable:$true] %s394_s14 }
   0xe   :  { %77 = vperm.xlu0 %537, %v71_v13   ;;  %v520_v17 = vld [vmem:[%s762_s1 + $0x58] sm:$0xff]  ;;  %v511_v18 = vld [vmem:[%s762_s1 + $0x10] sm:$0xff]  ;;  %v72_v20 = vld [vmem:[%s763_s2 + $0x8] sm:$0xff]  ;;  %vm385_vm5 = vcmask 8192  }
   0xf   :  { %v73_v19 = vld [vmem:[%s763_s2 + $0x10] sm:$0xff]  ;;  %v425_v22 = vld [vmem:[%s761_s0 + $0x20] sm:$0xf]  ;;  %v508_v23 = vld [vmem:[%s761_s0 + $0x28] sm:$0xf0] }
  0x10   :  { %243 = vmatpush.bf16.msra.mxu0 %v513_v14  ;;  %530 = vmatpush.bf16.msra.mxu3 %v513_v14  ;;  %v519_v21 = vld [vmem:[%s762_s1 + $0x50] sm:$0xff]  ;;  %v510_v24 = vld [vmem:[%s762_s1 + $0x8] sm:$0xff]  ;;  %v426_v26 = vor.u32 %v508_v23, %v425_v22  ;;  %v509_v27 = vld [vmem:[%s762_s1] sm:$0xff] }
  0x11   :  { %262 = vmatpush.bf16.msra.mxu1 %v521_v15  ;;  %87 = vperm.xlu1 %538, %v73_v19   ;;  %v518_v25 = vld [vmem:[%s762_s1 + $0x48] sm:$0xff]  ;;  %v405_v28 = vld [vmem:[%s761_s0] sm:$0xf]  ;;  %v74_v29 = vld [vmem:[%s763_s2 + $0x18] sm:$0xff] }
  0x12   :  { %v504_v30 = vld [vmem:[%s761_s0 + $0x8] sm:$0xf0]  ;;  %v417_v31 = vld [vmem:[%s761_s0 + $0x18] sm:$0xf]  ;;  %v507_v32 = vld [vmem:[%s761_s0 + $0x20] sm:$0xf0] }
  0x13   :  { %v517_v33 = vld [vmem:[%s762_s1 + $0x40] sm:$0xff]  ;;  %v407_v35 = vld [vmem:[%s761_s0 + $0xc] sm:$0xf0]  ;;  %v406_v36 = vor.u32 %v504_v30, %v405_v28  ;;  %v418_v37 = vor.u32 %v507_v32, %v417_v31  ;;  %v506_v39 = vld [vmem:[%s761_s0 + $0x1c] sm:$0xf] }
  0x14   :  { %244 = vmatpush.bf16.msra.mxu0 %v512_v16  ;;  %531 = vmatpush.bf16.msra.mxu3 %v512_v16  ;;  %v503_v34 = vld [vmem:[%s761_s0 + $0x4] sm:$0xf]  ;;  %v419_v40 = vld [vmem:[%s761_s0 + $0x24] sm:$0xf0]  ;;  %v334_v47 = vld [vmem:[%s765_s4 + $0x38] sm:$0xff] }
  0x15   :  { %263 = vmatpush.bf16.msra.mxu1 %v520_v17  ;;  %v410_v38 = vor.u32 %v503_v34, %v407_v35  ;;  %v422_v41 = vor.u32 %v506_v39, %v419_v40  ;;  %v335_v46 = vld [vmem:[%s765_s4 + $0x40] sm:$0xff]  ;;  %v333_v48 = vld [vmem:[%s765_s4 + $0x30] sm:$0xff]  ;;  %v332_v49 = vld [vmem:[%s765_s4 + $0x28] sm:$0xff] }
  0x16   :  { %82 = vperm.xlu0 %537, %v72_v20   ;;  %v331_v52 = vld [vmem:[%s765_s4 + $0x20] sm:$0xff]  ;;  %v330_v57 = vld [vmem:[%s765_s4 + $0x18] sm:$0xff]  ;;  %v329_v61 = vld [vmem:[%s765_s4 + $0x10] sm:$0xff] }
  0x17   :  { %v328_v63 = vld [vmem:[%s765_s4 + $0x8] sm:$0xff]  ;;  %v327_v2 = vld [vmem:[%s765_s4] sm:$0xff]  ;;  %v307_v20 = vld [vmem:[%s764_s3 + $0x10] sm:$0xff] }
  0x18   :  { %245 = vmatpush.bf16.msra.mxu0 %v511_v18  ;;  %532 = vmatpush.bf16.msra.mxu3 %v511_v18  ;;  %v336_v8 = vld [vmem:[#allocation2] sm:$0x1]  ;;  %v306_v15 = vld [vmem:[%s764_s3 + $0x8] sm:$0xff]  ;;  %v308_v30 = vld [vmem:[%s764_s3 + $0x18] sm:$0xff] }
  0x19   :  { %264 = vmatpush.bf16.msra.mxu1 %v519_v21  ;;  %92 = vperm.xlu1 %538, %v74_v29   ;;  %v305_v19 = vld [vmem:[%s764_s3] sm:$0xff]  ;;  %s571_s3 = smov [#allocation3]  }
  0x1a   :  { %339 = vperm.xlu2 %539, %v336_v8   ;;  %s392_s11 = sshll.u32 %s571_s3, 4  ;;  %s393_s11 = int_to_ptr.vmem [resolvable:$true] %s392_s11 }
  0x1c   :  { %246 = vmatpush.bf16.msra.mxu0 %v510_v24  ;;  %533 = vmatpush.bf16.msra.mxu3 %v510_v24 }
  0x1d   :  { %265 = vmatpush.bf16.msra.mxu1 %v518_v25  ;;  %500 = vmatmul.msk.bf16.gmra.mxu2 %vm233_vm0, %v426_v26 }
  0x20   :  { %247 = vmatpush.bf16.msra.mxu0 %v509_v27  ;;  %534 = vmatpush.bf16.msra.mxu3 %v509_v27 }
  0x21   :  { %266 = vmatpush.bf16.msra.mxu1 %v517_v33 }
  0x23   :  { %248 = vmatmul.bf16.vlgmr.msra.gmra.mxu0 %v406_v36  ;;  %253 = vmatmul.bf16.vlgmr.msra.gmra.mxu3 %v418_v37 }
  0x24   :  { %267 = vmatmul.bf16.vlgmr.msra.gmra.mxu1 %v410_v38  ;;  %353 = vmatpush.msrb.mxu3 %v335_v46 }
  0x26   :  { %354 = vmatpush.msrb.mxu3 %v334_v47 }
  0x28   :  { %355 = vmatpush.msrb.mxu3 %v333_v48 }
  0x2a   :  { %356 = vmatpush.msrb.mxu3 %v332_v49 }
  0x2c   :  { %357 = vmatpush.msrb.mxu3 %v331_v52 }
  0x2e   :  { %358 = vmatpush.msrb.mxu3 %v330_v57 }
  0x30   :  { %359 = vmatpush.msrb.mxu3 %v329_v61 }
  0x32   :  { %360 = vmatpush.msrb.mxu3 %v328_v63 }
  0x34   :  { %272 = vmatmul.bf16.gmra.mxu1 %v422_v41  ;;  %361 = vmatpush.msrb.mxu3 %v327_v2 }
  0x80   :  { %v78_v42 = vpop.permute.xlu0 %77 }
  0x83   :  { %v88_v58 = vpop.permute.xlu1 %87 }
  0x88   :  { %v83_v50 = vpop.permute.xlu0 %82 }
  0x8b   :  { %v93_v11 = vpop.permute.xlu1 %92 }
  0x90   :  { %v287_v43 = vpop.f32.mrf.mxu2 }
  0x98   :  { %v289_v51 = vpop.f32.mrf.mxu2 }
  0xa0   :  { %v249_v44 = vpop.f32.mrf.mxu0  ;;  %v292_v4 = vpop.f32.mrf.mxu2 }
  0xa1   :  { %v268_v45 = vpop.f32.mrf.mxu1  ;;  %v250_v53 = vadd.f32 %v249_v44, %v78_v42 }
  0xa3   :  { %v269_v62 = vadd.f32 %v268_v45, %v250_v53  ;;  %v340_v45 = vpop.permute.xlu2 %339 }
  0xa4   :  { %v342_v46 = vperm.slane %v340_v45, 0 }
  0xa5   :  { %v288_v3 = vadd.f32 %v287_v43, %v269_v62 }
  0xa6   :  { %v254_v59 = vpop.f32.mrf.mxu3 }
  0xa7   :  { %v255_v0 = vadd.f32 %v254_v59, %v88_v58  ;;  %v297_v9 = vmax.f32 %v288_v3, 0.0 }
  0xa8   :  { %v251_v54 = vpop.f32.mrf.mxu0  ;;  %v294_v24 = vpop.f32.mrf.mxu2 }
  0xa9   :  { %v252_v55 = vadd.f32 %v251_v54, %v83_v50  ;;  %v270_v56 = vpop.f32.mrf.mxu1  ;;  %v301_v16 = vmin.f32 %v297_v9, 6.0 }
  0xab   :  { %v271_v60 = vadd.f32 %v270_v56, %v252_v55  ;;  %v309_v25 = vmul.f32 %v305_v19, %v301_v16 }
  0xad   :  { %v290_v1 = vadd.f32 %v289_v51, %v271_v60  ;;  %v314_v32 = vsel %vm313_vm1, %v309_v25, 0.0 }
  0xae   :  { %v256_v12 = vpop.f32.mrf.mxu3 }
  0xaf   :  { %v298_v6 = vmax.f32 %v290_v1, 0.0  ;;  %v257_v17 = vadd.f32 %v256_v12, %v93_v11 }
  0xb1   :  { %v273_v5 = vpop.f32.mrf.mxu1  ;;  %v302_v13 = vmin.f32 %v298_v6, 6.0 }
  0xb2   :  { %v274_v7 = vadd.f32 %v273_v5, %v255_v0 }
  0xb3   :  { %v310_v22 = vmul.f32 %v306_v15, %v302_v13 }
  0xb4   :  { %v293_v10 = vadd.f32 %v292_v4, %v274_v7 }
  0xb5   :  { %v315_v29 = vsel %vm313_vm1, %v310_v22, 0.0 }
  0xb6   :  { %v299_v14 = vmax.f32 %v293_v10, 0.0  ;;  %v316_v34 = vadd.f32 %v315_v29, %v314_v32 }
  0xb8   :  { %v303_v18 = vmin.f32 %v299_v14, 6.0 }
  0xb9   :  { %v275_v21 = vpop.f32.mrf.mxu1 }
  0xba   :  { %v276_v23 = vadd.f32 %v275_v21, %v257_v17  ;;  %v311_v26 = vmul.f32 %v307_v20, %v303_v18 }
  0xbc   :  { %v295_v27 = vadd.f32 %v294_v24, %v276_v23  ;;  %v317_v33 = vsel %vm313_vm1, %v311_v26, 0.0 }
  0xbd   :  { %v318_v36 = vadd.f32 %v317_v33, %v316_v34 }
  0xbe   :  { %v300_v28 = vmax.f32 %v295_v27, 0.0 }
  0xc0   :  { %v304_v31 = vmin.f32 %v300_v28, 6.0 }
  0xc2   :  { %v312_v35 = vmul.f32 %v308_v30, %v304_v31 }
  0xc4   :  { %v319_v37 = vsel %vm313_vm1, %v312_v35, 0.0 }
  0xc5   :  { %v320_v38 = vadd.f32 %v319_v37, %v318_v36 }
  0xc7   :  { %v321_v39 = vrot.slane %v320_v38, 4 }
  0xc9   :  { %v322_v40 = vadd.f32 %v321_v39, %v320_v38 }
  0xcb   :  { %v323_v41 = vrot.slane %v322_v40, 2 }
  0xcd   :  { %v324_v42 = vadd.f32 %v323_v41, %v322_v40 }
  0xcf   :  { %v325_v43 = vrot.slane %v324_v42, 1 }
  0xd1   :  { %v326_v44 = vadd.f32 %v325_v43, %v324_v42 }
  0xd3   :  { %501 = vmatmul.msk.f32.vlgmr.msrb.gmra.mxu3 %vm313_vm1, %v326_v44 }
 0x156   :  { %v363_v47 = vpop.f32.mrf.mxu3 }
 0x157   :  { %v364_v48 = vadd.f32 %v363_v47, %v342_v46 }
 0x159   :  { %v502_v49 = vmul.f32 -1.442695, %v364_v48 }
 0x15b   :  { %540 = vpow2.f32 %v502_v49 }
 0x161   :  { %v541_v50 = vpop.eup %540 }
 0x162   :  { %v369_v51 = vadd.f32 1.0, %v541_v50 }
 0x164   :  { %542 = vrcp.f32 %v369_v51  ;;  %v381_v55 = vand.u32 2147483648, %v369_v51  ;;  %v379_v57 = vand.u32 2147483647, %v369_v51  ;;  %vm375_vm3 = vweird.f32 %v369_v51 }
 0x166   :  { %v382_v59 = vor.u32 1.1754944e-38, %v381_v55  ;;  %vm380_vm6 = vcmp.eq.f32.partialorder %v379_v57, 8.507059e+37 }
 0x16a   :  { %v543_v52 = vpop.eup %542 }
 0x16b   :  { %v371_v53 = vmul.f32 %v543_v52, %v369_v51  ;;  %vm376_vm2 = vweird.f32 %v543_v52 }
 0x16c   :  { %vm377_vm4 = vmor %vm375_vm3, %vm376_vm2 }
 0x16d   :  { %v372_v54 = vsub.f32 1.0, %v371_v53 }
 0x16f   :  { %v373_v56 = vmul.f32 %v543_v52, %v372_v54 }
 0x171   :  { %v374_v58 = vadd.f32 %v543_v52, %v373_v56 }
 0x173   :  { %v378_v60 = vsel %vm377_vm4, %v543_v52, %v374_v58 }
 0x174   :  { %v383_v61 = vsel %vm380_vm6, %v382_v59, %v378_v60 }
 0x175   :  { %386 = vst.msk [vmem:[#allocation3] sm:$0x1] %vm385_vm5, %v383_v61 }
 0x176   :  { %397 = dma.vmem_to_hbm [thread:$0]  %s393_s11, 16, %s395_s14, [#allocation4]  }
 0x177   :  { %568 = dma.done.wait [#allocation4], 16  }
 0x178   :  { %569 = vsyncadd [#allocation4], 4294967280 }
 0x179   :  { %402 = vsyncpa [#allocation4], 1 }

</bundles_post_ra>
